<compile_context>
chip_gen: v7x
topology: tpu7x:2x2x1
jax: 0.10.0
libtpu: 0.0.40
codegen_flags: <defaults>
</compile_context>

<pallas_src>
import functools

import jax
import jax.numpy as jnp
from jax import lax
from jax.experimental import pallas as pl
from jax.experimental.pallas import tpu as pltpu


# ---------------------------------------------------------------------------
# Pallas kernels
# ---------------------------------------------------------------------------

def _input_proj_kernel(x_ref, w_ref, b_ref, gx_ref):
    """Per-gate input projection for all timesteps (off the serial path).

    x_ref:  (R, F_in)     R rows of flattened (time*batch) layer input
    w_ref:  (4, F_in, U)  per-gate input-to-hidden weights (gate order i, f, g, o)
    b_ref:  (4, 1, U)     per-gate combined bias (b_ih + b_hh)
    gx_ref: (4, R, U)     per-gate pre-activations
    """
    x = x_ref[...]
    for k in range(4):                      # static unroll over the 4 gates
        gx_ref[k] = (
            jnp.dot(x, w_ref[k], preferred_element_type=jnp.float32) + b_ref[k]
        ).astype(gx_ref.dtype)


def _recurrence_kernel(*refs, chunk, fuse_skip):
    """Sequential LSTM recurrence over one time chunk.

    Grid axis 0 = time chunks ("arbitrary" => strictly sequential).

    gx_ref:   (4, T, B, U)  precomputed x @ W_ih + b for this chunk (gate-major)
    whh_ref:  (4, U, U)     per-gate hidden-to-hidden weights
    skip_ref: (T, B, U)     (optional) residual skip input
    y_ref:    (T, B, U)     hidden-state output (optionally relu(h + skip))
    h_ref, c_ref: (B, U)    VMEM scratch carrying the recurrence across chunks
    """
    if fuse_skip:
        gx_ref, whh_ref, skip_ref, y_ref, h_ref, c_ref = refs
    else:
        gx_ref, whh_ref, y_ref, h_ref, c_ref = refs
        skip_ref = None

    @pl.when(pl.program_id(0) == 0)
    def _():
        h_ref[...] = jnp.zeros_like(h_ref)
        c_ref[...] = jnp.zeros_like(c_ref)

    w_i = whh_ref[0]
    w_f = whh_ref[1]
    w_g = whh_ref[2]
    w_o = whh_ref[3]

    def step(tt, carry):
        h, c = carry
        i_g = jax.nn.sigmoid(
            gx_ref[0, tt] + jnp.dot(h, w_i, preferred_element_type=jnp.float32))
        f_g = jax.nn.sigmoid(
            gx_ref[1, tt] + jnp.dot(h, w_f, preferred_element_type=jnp.float32))
        g_g = jnp.tanh(
            gx_ref[2, tt] + jnp.dot(h, w_g, preferred_element_type=jnp.float32))
        o_g = jax.nn.sigmoid(
            gx_ref[3, tt] + jnp.dot(h, w_o, preferred_element_type=jnp.float32))
        c_new = f_g * c + i_g * g_g
        h_new = o_g * jnp.tanh(c_new)
        out = h_new
        if fuse_skip:
            # relu(y + dropout(skip)); dropout == identity in eval mode.
            out = jnp.maximum(h_new + skip_ref[tt], 0.0)
        y_ref[tt] = out.astype(y_ref.dtype)
        return h_new, c_new

    h_fin, c_fin = lax.fori_loop(0, chunk, step, (h_ref[...], c_ref[...]),
                                 unroll=True)
    h_ref[...] = h_fin
    c_ref[...] = c_fin


def _head_kernel(y_ref, w_ref, b_ref, o_ref):
    """pred = tanh(y) @ W_h^T + b_h  (Linear(units, units)), one row tile."""
    z = jnp.tanh(y_ref[...].astype(jnp.float32))
    o_ref[...] = (
        jnp.dot(z, w_ref[...], preferred_element_type=jnp.float32) + b_ref[...]
    ).astype(o_ref.dtype)


# ---------------------------------------------------------------------------
# Wrappers around pallas_call
# ---------------------------------------------------------------------------

def _row_tile(n, target=512):
    # target is a multiple of 8; when n is small use the full extent as one block.
    return n if n <= target else target


def _time_chunk(s, max_chunk=16):
    # Largest chunk <= max_chunk that divides S (keeps the unrolled body bounded).
    t = min(s, max_chunk)
    while s % t:
        t -= 1
    return t


def lstm_input_proj(x2d, wih_g, b_g, units):
    """x2d: (N, F_in) -> gx: (4, N, units) gate-major pre-activations."""
    n, f_in = x2d.shape
    r = _row_tile(n)
    return pl.pallas_call(
        _input_proj_kernel,
        out_shape=jax.ShapeDtypeStruct((4, n, units), jnp.float32),
        grid=(pl.cdiv(n, r),),
        in_specs=[
            pl.BlockSpec((r, f_in), lambda i: (i, 0)),
            pl.BlockSpec((4, f_in, units), lambda i: (0, 0, 0)),
            pl.BlockSpec((4, 1, units), lambda i: (0, 0, 0)),
        ],
        out_specs=pl.BlockSpec((4, r, units), lambda i: (0, i, 0)),
        compiler_params=pltpu.CompilerParams(dimension_semantics=("parallel",)),
    )(x2d, wih_g, b_g)


def lstm_recurrence(gx, whh_g, units, skip=None, out_dtype=jnp.float32):
    """gx: (4, S, B, units) -> y: (S, B, units); optionally fused relu(y + skip)."""
    _, s, b, u = gx.shape
    t = _time_chunk(s)
    in_specs = [
        pl.BlockSpec((4, t, b, u), lambda i: (0, i, 0, 0)),
        pl.BlockSpec((4, u, u), lambda i: (0, 0, 0)),
    ]
    args = [gx, whh_g]
    if skip is not None:
        in_specs.append(pl.BlockSpec((t, b, u), lambda i: (i, 0, 0)))
        args.append(skip)
    kernel = functools.partial(_recurrence_kernel, chunk=t,
                               fuse_skip=(skip is not None))
    return pl.pallas_call(
        kernel,
        out_shape=jax.ShapeDtypeStruct((s, b, u), out_dtype),
        grid=(s // t,),
        in_specs=in_specs,
        out_specs=pl.BlockSpec((t, b, u), lambda i: (i, 0, 0)),
        scratch_shapes=[
            pltpu.VMEM((b, u), jnp.float32),
            pltpu.VMEM((b, u), jnp.float32),
        ],
        compiler_params=pltpu.CompilerParams(
            dimension_semantics=("arbitrary",)),   # sequential recurrence
    )(*args)


def head_op(y2d, w_t, bias):
    """y2d: (N, U) -> tanh(y2d) @ w_t + bias, row-tiled."""
    n, u = y2d.shape
    r = _row_tile(n)
    return pl.pallas_call(
        _head_kernel,
        out_shape=jax.ShapeDtypeStruct((n, u), y2d.dtype),
        grid=(pl.cdiv(n, r),),
        in_specs=[
            pl.BlockSpec((r, u), lambda i: (i, 0)),
            pl.BlockSpec((u, u), lambda i: (0, 0)),
            pl.BlockSpec((1, u), lambda i: (0, 0)),
        ],
        out_specs=pl.BlockSpec((r, u), lambda i: (i, 0)),
        compiler_params=pltpu.CompilerParams(dimension_semantics=("parallel",)),
    )(y2d, w_t, bias)


# ---------------------------------------------------------------------------
# Parameter init (deterministic, mirrors nn.LSTM / nn.Linear shapes)
# ---------------------------------------------------------------------------

def init_params(key, units, num_features, n_layers, n_blocks):
    scale = 1.0 / jnp.sqrt(jnp.float32(units))

    def unif(k, shape):
        return jax.random.uniform(k, shape, jnp.float32, -scale, scale)

    blocks = []
    for blk in range(n_blocks):
        layers = []
        for layer in range(n_layers):
            in_size = num_features if (blk == 0 and layer == 0) else units
            key, k1, k2, k3, k4 = jax.random.split(key, 5)
            # nn.LSTM stores weight_ih_l{k}: (4U, in), weight_hh_l{k}: (4U, U),
            # biases (4U,), gate order [i, f, g, o].
            wih = unif(k1, (4 * units, in_size))
            whh = unif(k2, (4 * units, units))
            b_ih = unif(k3, (4 * units,))
            b_hh = unif(k4, (4 * units,))
            # Gate-major, transposed for right-multiplication:
            wih_g = jnp.transpose(wih.reshape(4, units, in_size), (0, 2, 1))  # (4, in, U)
            whh_g = jnp.transpose(whh.reshape(4, units, units), (0, 2, 1))    # (4, U, U)
            b_g = (b_ih + b_hh).reshape(4, 1, units)                           # (4, 1, U)
            layers.append((wih_g, whh_g, b_g))
        blocks.append(layers)

    key, k1, k2 = jax.random.split(key, 3)
    hidden_w = unif(k1, (units, units))            # nn.Linear weight (out, in)
    hidden_b = unif(k2, (units,))
    return {
        "blocks": blocks,
        "hidden_w_t": hidden_w.T,                  # (in, out)
        "hidden_b": hidden_b.reshape(1, units),
    }


# ---------------------------------------------------------------------------
# Full forward pass (matches Residual_LSTM.forward, eval mode)
# ---------------------------------------------------------------------------

@functools.partial(jax.jit, static_argnames=("units",))
def residual_lstm_forward(x_bsf, params, units):
    """x_bsf: (batch, seq, num_features) -> (batch, seq, units)."""
    batch, seq, _ = x_bsf.shape
    x = jnp.transpose(x_bsf, (1, 0, 2))            # time-major (S, B, F)
    n_blocks = len(params["blocks"])

    y = None
    skip = None
    for i, block in enumerate(params["blocks"]):
        h = x if i == 0 else y                     # (S, B, F_in)
        n_layers = len(block)
        for li, (wih_g, whh_g, b_g) in enumerate(block):
            s, b, f_in = h.shape
            # Hoisted input projection (one big matmul, off the serial path).
            gx = lstm_input_proj(h.reshape(s * b, f_in), wih_g, b_g, units)
            gx = gx.reshape(4, s, b, units)
            # Residual relu is fused into the last layer of every non-first block.
            fuse_here = (li == n_layers - 1) and (i > 0)
            h = lstm_recurrence(gx, whh_g, units,
                                skip=skip if fuse_here else None)
        if i == 0:
            y = h
            skip = h
        elif i < n_blocks - 1:
            y = h                                  # h == relu(lstm(y) + skip)
            skip = h
        else:
            y = h                                  # last block: fused relu output

    pred = head_op(y.reshape(seq * batch, units),
                   params["hidden_w_t"], params["hidden_b"])
    pred = pred.reshape(seq, batch, units)
    return jnp.transpose(pred, (1, 0, 2))          # back to (B, S, units)


# ---------------------------------------------------------------------------
# Demo
# ---------------------------------------------------------------------------

if __name__ == "__main__":
    units = 32
    seqlen = 8
    num_features = 4
    n_layers = 2
    n_blocks = 3
    batch = 2

    key = jax.random.PRNGKey(0)
    key, pkey, xkey = jax.random.split(key, 3)

    params = init_params(pkey, units, num_features, n_layers, n_blocks)
    x = jax.random.normal(xkey, (batch, seqlen, num_features), jnp.float32)

    out = residual_lstm_forward(x, params, units)
    out = jax.block_until_ready(out)
    assert out.shape == (batch, seqlen, units), out.shape
    assert bool(jnp.all(jnp.isfinite(out)))
    print("KERNEL_OK")
</pallas_src>

<mosaic_0001>
module attributes {stable_mosaic.version = 11 : i64} {
  func.func @_input_proj_kernel(%arg0: i32, %arg1: memref<16x4xf32, #tpu.memory_space<vmem>>, %arg2: memref<4x4x32xf32, #tpu.memory_space<vmem>>, %arg3: memref<4x1x32xf32, #tpu.memory_space<vmem>>, %arg4: memref<4x16x32xf32, #tpu.memory_space<vmem>>) attributes {dimension_semantics = [#tpu.dimension_semantics<parallel>], iteration_bounds = array<i64: 1>, scalar_prefetch = 0 : i64, scratch_operands = 0 : i64, tpu.core_type = #tpu.core_type<tc>, window_params = [{transform_indices = @transform_0, window_bounds = array<i64: 16, 4>}, {pipeline_mode = #tpu.pipeline_mode<synchronous>, transform_indices = @transform_1, window_bounds = array<i64: 4, 4, 32>}, {pipeline_mode = #tpu.pipeline_mode<synchronous>, transform_indices = @transform_2, window_bounds = array<i64: 4, 1, 32>}, {transform_indices = @transform_3, window_bounds = array<i64: 4, 16, 32>}]} {
    %c0 = arith.constant 0 : index
    %c0_0 = arith.constant 0 : index
    %0 = vector.load %arg1[%c0, %c0_0] : memref<16x4xf32, #tpu.memory_space<vmem>>, vector<16x4xf32>
    %c0_1 = arith.constant 0 : index
    %c0_2 = arith.constant 0 : index
    %c0_3 = arith.constant 0 : index
    %1 = vector.load %arg2[%c0_1, %c0_2, %c0_3] : memref<4x4x32xf32, #tpu.memory_space<vmem>>, vector<1x4x32xf32>
    %2 = vector.shape_cast %1 : vector<1x4x32xf32> to vector<4x32xf32>
    %cst = arith.constant dense<0.000000e+00> : vector<16x32xf32>
    %3 = tpu.matmul %0, %2, %cst {dimension_numbers = #tpu.dot_dimension_numbers<[1], [0], [0], [1], [0, 0, 1, 1], [], []>} : vector<16x4xf32>, vector<4x32xf32>, vector<16x32xf32> -> vector<16x32xf32>
    %c0_4 = arith.constant 0 : index
    %c0_5 = arith.constant 0 : index
    %c0_6 = arith.constant 0 : index
    %4 = vector.load %arg3[%c0_4, %c0_5, %c0_6] : memref<4x1x32xf32, #tpu.memory_space<vmem>>, vector<1x1x32xf32>
    %5 = vector.shape_cast %4 : vector<1x1x32xf32> to vector<1x32xf32>
    %6 = vector.broadcast %5 : vector<1x32xf32> to vector<16x32xf32>
    %7 = arith.addf %3, %6 : vector<16x32xf32>
    %c0_7 = arith.constant 0 : index
    %c0_8 = arith.constant 0 : index
    %c0_9 = arith.constant 0 : index
    %8 = vector.load %arg4[%c0_7, %c0_8, %c0_9] : memref<4x16x32xf32, #tpu.memory_space<vmem>>, vector<1x16x32xf32>
    %9 = vector.shape_cast %8 : vector<1x16x32xf32> to vector<16x32xf32>
    %10 = vector.shape_cast %7 : vector<16x32xf32> to vector<1x16x32xf32>
    tpu.vector_store %arg4[%c0_7, %c0_8, %c0_9], %10 {strides = array<i32>} : memref<4x16x32xf32, #tpu.memory_space<vmem>>, vector<1x16x32xf32>,
    %c1 = arith.constant 1 : index
    %c0_10 = arith.constant 0 : index
    %c0_11 = arith.constant 0 : index
    %11 = vector.load %arg2[%c1, %c0_10, %c0_11] : memref<4x4x32xf32, #tpu.memory_space<vmem>>, vector<1x4x32xf32>
    %12 = vector.shape_cast %11 : vector<1x4x32xf32> to vector<4x32xf32>
    %cst_12 = arith.constant dense<0.000000e+00> : vector<16x32xf32>
    %13 = tpu.matmul %0, %12, %cst_12 {dimension_numbers = #tpu.dot_dimension_numbers<[1], [0], [0], [1], [0, 0, 1, 1], [], []>} : vector<16x4xf32>, vector<4x32xf32>, vector<16x32xf32> -> vector<16x32xf32>
    %c1_13 = arith.constant 1 : index
    %c0_14 = arith.constant 0 : index
    %c0_15 = arith.constant 0 : index
    %14 = vector.load %arg3[%c1_13, %c0_14, %c0_15] : memref<4x1x32xf32, #tpu.memory_space<vmem>>, vector<1x1x32xf32>
    %15 = vector.shape_cast %14 : vector<1x1x32xf32> to vector<1x32xf32>
    %16 = vector.broadcast %15 : vector<1x32xf32> to vector<16x32xf32>
    %17 = arith.addf %13, %16 : vector<16x32xf32>
    %c1_16 = arith.constant 1 : index
    %c0_17 = arith.constant 0 : index
    %c0_18 = arith.constant 0 : index
    %18 = vector.load %arg4[%c1_16, %c0_17, %c0_18] : memref<4x16x32xf32, #tpu.memory_space<vmem>>, vector<1x16x32xf32>
    %19 = vector.shape_cast %18 : vector<1x16x32xf32> to vector<16x32xf32>
    %20 = vector.shape_cast %17 : vector<16x32xf32> to vector<1x16x32xf32>
    tpu.vector_store %arg4[%c1_16, %c0_17, %c0_18], %20 {strides = array<i32>} : memref<4x16x32xf32, #tpu.memory_space<vmem>>, vector<1x16x32xf32>,
    %c2 = arith.constant 2 : index
    %c0_19 = arith.constant 0 : index
    %c0_20 = arith.constant 0 : index
    %21 = vector.load %arg2[%c2, %c0_19, %c0_20] : memref<4x4x32xf32, #tpu.memory_space<vmem>>, vector<1x4x32xf32>
    %22 = vector.shape_cast %21 : vector<1x4x32xf32> to vector<4x32xf32>
    %cst_21 = arith.constant dense<0.000000e+00> : vector<16x32xf32>
    %23 = tpu.matmul %0, %22, %cst_21 {dimension_numbers = #tpu.dot_dimension_numbers<[1], [0], [0], [1], [0, 0, 1, 1], [], []>} : vector<16x4xf32>, vector<4x32xf32>, vector<16x32xf32> -> vector<16x32xf32>
    %c2_22 = arith.constant 2 : index
    %c0_23 = arith.constant 0 : index
    %c0_24 = arith.constant 0 : index
    %24 = vector.load %arg3[%c2_22, %c0_23, %c0_24] : memref<4x1x32xf32, #tpu.memory_space<vmem>>, vector<1x1x32xf32>
    %25 = vector.shape_cast %24 : vector<1x1x32xf32> to vector<1x32xf32>
    %26 = vector.broadcast %25 : vector<1x32xf32> to vector<16x32xf32>
    %27 = arith.addf %23, %26 : vector<16x32xf32>
    %c2_25 = arith.constant 2 : index
    %c0_26 = arith.constant 0 : index
    %c0_27 = arith.constant 0 : index
    %28 = vector.load %arg4[%c2_25, %c0_26, %c0_27] : memref<4x16x32xf32, #tpu.memory_space<vmem>>, vector<1x16x32xf32>
    %29 = vector.shape_cast %28 : vector<1x16x32xf32> to vector<16x32xf32>
    %30 = vector.shape_cast %27 : vector<16x32xf32> to vector<1x16x32xf32>
    tpu.vector_store %arg4[%c2_25, %c0_26, %c0_27], %30 {strides = array<i32>} : memref<4x16x32xf32, #tpu.memory_space<vmem>>, vector<1x16x32xf32>,
    %c3 = arith.constant 3 : index
    %c0_28 = arith.constant 0 : index
    %c0_29 = arith.constant 0 : index
    %31 = vector.load %arg2[%c3, %c0_28, %c0_29] : memref<4x4x32xf32, #tpu.memory_space<vmem>>, vector<1x4x32xf32>
    %32 = vector.shape_cast %31 : vector<1x4x32xf32> to vector<4x32xf32>
    %cst_30 = arith.constant dense<0.000000e+00> : vector<16x32xf32>
    %33 = tpu.matmul %0, %32, %cst_30 {dimension_numbers = #tpu.dot_dimension_numbers<[1], [0], [0], [1], [0, 0, 1, 1], [], []>} : vector<16x4xf32>, vector<4x32xf32>, vector<16x32xf32> -> vector<16x32xf32>
    %c3_31 = arith.constant 3 : index
    %c0_32 = arith.constant 0 : index
    %c0_33 = arith.constant 0 : index
    %34 = vector.load %arg3[%c3_31, %c0_32, %c0_33] : memref<4x1x32xf32, #tpu.memory_space<vmem>>, vector<1x1x32xf32>
    %35 = vector.shape_cast %34 : vector<1x1x32xf32> to vector<1x32xf32>
    %36 = vector.broadcast %35 : vector<1x32xf32> to vector<16x32xf32>
    %37 = arith.addf %33, %36 : vector<16x32xf32>
    %c3_34 = arith.constant 3 : index
    %c0_35 = arith.constant 0 : index
    %c0_36 = arith.constant 0 : index
    %38 = vector.load %arg4[%c3_34, %c0_35, %c0_36] : memref<4x16x32xf32, #tpu.memory_space<vmem>>, vector<1x16x32xf32>
    %39 = vector.shape_cast %38 : vector<1x16x32xf32> to vector<16x32xf32>
    %40 = vector.shape_cast %37 : vector<16x32xf32> to vector<1x16x32xf32>
    tpu.vector_store %arg4[%c3_34, %c0_35, %c0_36], %40 {strides = array<i32>} : memref<4x16x32xf32, #tpu.memory_space<vmem>>, vector<1x16x32xf32>,
    return
  }
  func.func @transform_0(%arg0: i32) -> (i32, i32) {
    %c0_i32 = arith.constant 0 : i32
    %c0_i32_0 = arith.constant 0 : i32
    return %arg0, %c0_i32 : i32, i32
  }
  func.func @transform_1(%arg0: i32) -> (i32, i32, i32) {
    %c0_i32 = arith.constant 0 : i32
    %c0_i32_0 = arith.constant 0 : i32
    %c0_i32_1 = arith.constant 0 : i32
    %c0_i32_2 = arith.constant 0 : i32
    return %c0_i32, %c0_i32_0, %c0_i32_1 : i32, i32, i32
  }
  func.func @transform_2(%arg0: i32) -> (i32, i32, i32) {
    %c0_i32 = arith.constant 0 : i32
    %c0_i32_0 = arith.constant 0 : i32
    %c0_i32_1 = arith.constant 0 : i32
    %c0_i32_2 = arith.constant 0 : i32
    return %c0_i32, %c0_i32_0, %c0_i32_1 : i32, i32, i32
  }
  func.func @transform_3(%arg0: i32) -> (i32, i32, i32) {
    %c0_i32 = arith.constant 0 : i32
    %c0_i32_0 = arith.constant 0 : i32
    %c0_i32_1 = arith.constant 0 : i32
    return %c0_i32, %arg0, %c0_i32_0 : i32, i32, i32
  }
}

module attributes {stable_mosaic.version = 11 : i64} {
  func.func @_input_proj_kernel(%arg0: i32, %arg1: memref<16x32xf32, #tpu.memory_space<vmem>>, %arg2: memref<4x32x32xf32, #tpu.memory_space<vmem>>, %arg3: memref<4x1x32xf32, #tpu.memory_space<vmem>>, %arg4: memref<4x16x32xf32, #tpu.memory_space<vmem>>) attributes {dimension_semantics = [#tpu.dimension_semantics<parallel>], iteration_bounds = array<i64: 1>, scalar_prefetch = 0 : i64, scratch_operands = 0 : i64, tpu.core_type = #tpu.core_type<tc>, window_params = [{transform_indices = @transform_0, window_bounds = array<i64: 16, 32>}, {pipeline_mode = #tpu.pipeline_mode<synchronous>, transform_indices = @transform_1, window_bounds = array<i64: 4, 32, 32>}, {pipeline_mode = #tpu.pipeline_mode<synchronous>, transform_indices = @transform_2, window_bounds = array<i64: 4, 1, 32>}, {transform_indices = @transform_3, window_bounds = array<i64: 4, 16, 32>}]} {
    %c0 = arith.constant 0 : index
    %c0_0 = arith.constant 0 : index
    %0 = vector.load %arg1[%c0, %c0_0] : memref<16x32xf32, #tpu.memory_space<vmem>>, vector<16x32xf32>
    %c0_1 = arith.constant 0 : index
    %c0_2 = arith.constant 0 : index
    %c0_3 = arith.constant 0 : index
    %1 = vector.load %arg2[%c0_1, %c0_2, %c0_3] : memref<4x32x32xf32, #tpu.memory_space<vmem>>, vector<1x32x32xf32>
    %2 = vector.shape_cast %1 : vector<1x32x32xf32> to vector<32x32xf32>
    %cst = arith.constant dense<0.000000e+00> : vector<16x32xf32>
    %3 = tpu.matmul %0, %2, %cst {dimension_numbers = #tpu.dot_dimension_numbers<[1], [0], [0], [1], [0, 0, 1, 1], [], []>} : vector<16x32xf32>, vector<32x32xf32>, vector<16x32xf32> -> vector<16x32xf32>
    %c0_4 = arith.constant 0 : index
    %c0_5 = arith.constant 0 : index
    %c0_6 = arith.constant 0 : index
    %4 = vector.load %arg3[%c0_4, %c0_5, %c0_6] : memref<4x1x32xf32, #tpu.memory_space<vmem>>, vector<1x1x32xf32>
    %5 = vector.shape_cast %4 : vector<1x1x32xf32> to vector<1x32xf32>
    %6 = vector.broadcast %5 : vector<1x32xf32> to vector<16x32xf32>
    %7 = arith.addf %3, %6 : vector<16x32xf32>
    %c0_7 = arith.constant 0 : index
    %c0_8 = arith.constant 0 : index
    %c0_9 = arith.constant 0 : index
    %8 = vector.load %arg4[%c0_7, %c0_8, %c0_9] : memref<4x16x32xf32, #tpu.memory_space<vmem>>, vector<1x16x32xf32>
    %9 = vector.shape_cast %8 : vector<1x16x32xf32> to vector<16x32xf32>
    %10 = vector.shape_cast %7 : vector<16x32xf32> to vector<1x16x32xf32>
    tpu.vector_store %arg4[%c0_7, %c0_8, %c0_9], %10 {strides = array<i32>} : memref<4x16x32xf32, #tpu.memory_space<vmem>>, vector<1x16x32xf32>,
    %c1 = arith.constant 1 : index
    %c0_10 = arith.constant 0 : index
    %c0_11 = arith.constant 0 : index
    %11 = vector.load %arg2[%c1, %c0_10, %c0_11] : memref<4x32x32xf32, #tpu.memory_space<vmem>>, vector<1x32x32xf32>
    %12 = vector.shape_cast %11 : vector<1x32x32xf32> to vector<32x32xf32>
    %cst_12 = arith.constant dense<0.000000e+00> : vector<16x32xf32>
    %13 = tpu.matmul %0, %12, %cst_12 {dimension_numbers = #tpu.dot_dimension_numbers<[1], [0], [0], [1], [0, 0, 1, 1], [], []>} : vector<16x32xf32>, vector<32x32xf32>, vector<16x32xf32> -> vector<16x32xf32>
    %c1_13 = arith.constant 1 : index
    %c0_14 = arith.constant 0 : index
    %c0_15 = arith.constant 0 : index
    %14 = vector.load %arg3[%c1_13, %c0_14, %c0_15] : memref<4x1x32xf32, #tpu.memory_space<vmem>>, vector<1x1x32xf32>
    %15 = vector.shape_cast %14 : vector<1x1x32xf32> to vector<1x32xf32>
    %16 = vector.broadcast %15 : vector<1x32xf32> to vector<16x32xf32>
    %17 = arith.addf %13, %16 : vector<16x32xf32>
    %c1_16 = arith.constant 1 : index
    %c0_17 = arith.constant 0 : index
    %c0_18 = arith.constant 0 : index
    %18 = vector.load %arg4[%c1_16, %c0_17, %c0_18] : memref<4x16x32xf32, #tpu.memory_space<vmem>>, vector<1x16x32xf32>
    %19 = vector.shape_cast %18 : vector<1x16x32xf32> to vector<16x32xf32>
    %20 = vector.shape_cast %17 : vector<16x32xf32> to vector<1x16x32xf32>
    tpu.vector_store %arg4[%c1_16, %c0_17, %c0_18], %20 {strides = array<i32>} : memref<4x16x32xf32, #tpu.memory_space<vmem>>, vector<1x16x32xf32>,
    %c2 = arith.constant 2 : index
    %c0_19 = arith.constant 0 : index
    %c0_20 = arith.constant 0 : index
    %21 = vector.load %arg2[%c2, %c0_19, %c0_20] : memref<4x32x32xf32, #tpu.memory_space<vmem>>, vector<1x32x32xf32>
    %22 = vector.shape_cast %21 : vector<1x32x32xf32> to vector<32x32xf32>
    %cst_21 = arith.constant dense<0.000000e+00> : vector<16x32xf32>
    %23 = tpu.matmul %0, %22, %cst_21 {dimension_numbers = #tpu.dot_dimension_numbers<[1], [0], [0], [1], [0, 0, 1, 1], [], []>} : vector<16x32xf32>, vector<32x32xf32>, vector<16x32xf32> -> vector<16x32xf32>
    %c2_22 = arith.constant 2 : index
    %c0_23 = arith.constant 0 : index
    %c0_24 = arith.constant 0 : index
    %24 = vector.load %arg3[%c2_22, %c0_23, %c0_24] : memref<4x1x32xf32, #tpu.memory_space<vmem>>, vector<1x1x32xf32>
    %25 = vector.shape_cast %24 : vector<1x1x32xf32> to vector<1x32xf32>
    %26 = vector.broadcast %25 : vector<1x32xf32> to vector<16x32xf32>
    %27 = arith.addf %23, %26 : vector<16x32xf32>
    %c2_25 = arith.constant 2 : index
    %c0_26 = arith.constant 0 : index
    %c0_27 = arith.constant 0 : index
    %28 = vector.load %arg4[%c2_25, %c0_26, %c0_27] : memref<4x16x32xf32, #tpu.memory_space<vmem>>, vector<1x16x32xf32>
    %29 = vector.shape_cast %28 : vector<1x16x32xf32> to vector<16x32xf32>
    %30 = vector.shape_cast %27 : vector<16x32xf32> to vector<1x16x32xf32>
    tpu.vector_store %arg4[%c2_25, %c0_26, %c0_27], %30 {strides = array<i32>} : memref<4x16x32xf32, #tpu.memory_space<vmem>>, vector<1x16x32xf32>,
    %c3 = arith.constant 3 : index
    %c0_28 = arith.constant 0 : index
    %c0_29 = arith.constant 0 : index
    %31 = vector.load %arg2[%c3, %c0_28, %c0_29] : memref<4x32x32xf32, #tpu.memory_space<vmem>>, vector<1x32x32xf32>
    %32 = vector.shape_cast %31 : vector<1x32x32xf32> to vector<32x32xf32>
    %cst_30 = arith.constant dense<0.000000e+00> : vector<16x32xf32>
    %33 = tpu.matmul %0, %32, %cst_30 {dimension_numbers = #tpu.dot_dimension_numbers<[1], [0], [0], [1], [0, 0, 1, 1], [], []>} : vector<16x32xf32>, vector<32x32xf32>, vector<16x32xf32> -> vector<16x32xf32>
    %c3_31 = arith.constant 3 : index
    %c0_32 = arith.constant 0 : index
    %c0_33 = arith.constant 0 : index
    %34 = vector.load %arg3[%c3_31, %c0_32, %c0_33] : memref<4x1x32xf32, #tpu.memory_space<vmem>>, vector<1x1x32xf32>
    %35 = vector.shape_cast %34 : vector<1x1x32xf32> to vector<1x32xf32>
    %36 = vector.broadcast %35 : vector<1x32xf32> to vector<16x32xf32>
    %37 = arith.addf %33, %36 : vector<16x32xf32>
    %c3_34 = arith.constant 3 : index
    %c0_35 = arith.constant 0 : index
    %c0_36 = arith.constant 0 : index
    %38 = vector.load %arg4[%c3_34, %c0_35, %c0_36] : memref<4x16x32xf32, #tpu.memory_space<vmem>>, vector<1x16x32xf32>
    %39 = vector.shape_cast %38 : vector<1x16x32xf32> to vector<16x32xf32>
    %40 = vector.shape_cast %37 : vector<16x32xf32> to vector<1x16x32xf32>
    tpu.vector_store %arg4[%c3_34, %c0_35, %c0_36], %40 {strides = array<i32>} : memref<4x16x32xf32, #tpu.memory_space<vmem>>, vector<1x16x32xf32>,
    return
  }
  func.func @transform_0(%arg0: i32) -> (i32, i32) {
    %c0_i32 = arith.constant 0 : i32
    %c0_i32_0 = arith.constant 0 : i32
    return %arg0, %c0_i32 : i32, i32
  }
  func.func @transform_1(%arg0: i32) -> (i32, i32, i32) {
    %c0_i32 = arith.constant 0 : i32
    %c0_i32_0 = arith.constant 0 : i32
    %c0_i32_1 = arith.constant 0 : i32
    %c0_i32_2 = arith.constant 0 : i32
    return %c0_i32, %c0_i32_0, %c0_i32_1 : i32, i32, i32
  }
  func.func @transform_2(%arg0: i32) -> (i32, i32, i32) {
    %c0_i32 = arith.constant 0 : i32
    %c0_i32_0 = arith.constant 0 : i32
    %c0_i32_1 = arith.constant 0 : i32
    %c0_i32_2 = arith.constant 0 : i32
    return %c0_i32, %c0_i32_0, %c0_i32_1 : i32, i32, i32
  }
  func.func @transform_3(%arg0: i32) -> (i32, i32, i32) {
    %c0_i32 = arith.constant 0 : i32
    %c0_i32_0 = arith.constant 0 : i32
    %c0_i32_1 = arith.constant 0 : i32
    return %c0_i32, %arg0, %c0_i32_0 : i32, i32, i32
  }
}

module attributes {stable_mosaic.version = 11 : i64} {
  func.func @_recurrence_kernel(%arg0: i32, %arg1: memref<4x8x2x32xf32, #tpu.memory_space<vmem>>, %arg2: memref<4x32x32xf32, #tpu.memory_space<vmem>>, %arg3: memref<8x2x32xf32, #tpu.memory_space<vmem>>, %arg4: memref<2x32xf32, #tpu.memory_space<vmem>>, %arg5: memref<2x32xf32, #tpu.memory_space<vmem>>) attributes {dimension_semantics = [#tpu.dimension_semantics<arbitrary>], iteration_bounds = array<i64: 1>, scalar_prefetch = 0 : i64, scratch_operands = 2 : i64, tpu.core_type = #tpu.core_type<tc>, window_params = [{transform_indices = @transform_0, window_bounds = array<i64: 4, 8, 2, 32>}, {pipeline_mode = #tpu.pipeline_mode<synchronous>, transform_indices = @transform_1, window_bounds = array<i64: 4, 32, 32>}, {transform_indices = @transform_2, window_bounds = array<i64: 8, 2, 32>}]} {
    %c0_i32 = arith.constant 0 : i32
    %0 = arith.cmpi eq, %arg0, %c0_i32 : i32
    %1 = arith.extui %0 : i1 to i32
    %c0_i32_0 = arith.constant 0 : i32
    %2 = arith.cmpi ne, %1, %c0_i32_0 : i32
    scf.if %2 {
      %cst_185 = arith.constant 0.000000e+00 : f32
      %375 = vector.broadcast %cst_185 : f32 to vector<2x32xf32>
      %c0_186 = arith.constant 0 : index
      %c0_187 = arith.constant 0 : index
      %376 = vector.load %arg4[%c0_186, %c0_187] : memref<2x32xf32, #tpu.memory_space<vmem>>, vector<2x32xf32>
      tpu.vector_store %arg4[%c0_186, %c0_187], %375 {strides = array<i32>} : memref<2x32xf32, #tpu.memory_space<vmem>>, vector<2x32xf32>,
      %cst_188 = arith.constant 0.000000e+00 : f32
      %377 = vector.broadcast %cst_188 : f32 to vector<2x32xf32>
      %c0_189 = arith.constant 0 : index
      %c0_190 = arith.constant 0 : index
      %378 = vector.load %arg5[%c0_189, %c0_190] : memref<2x32xf32, #tpu.memory_space<vmem>>, vector<2x32xf32>
      tpu.vector_store %arg5[%c0_189, %c0_190], %377 {strides = array<i32>} : memref<2x32xf32, #tpu.memory_space<vmem>>, vector<2x32xf32>,
    } else {
    }
    %c0 = arith.constant 0 : index
    %c0_1 = arith.constant 0 : index
    %c0_2 = arith.constant 0 : index
    %3 = vector.load %arg2[%c0, %c0_1, %c0_2] : memref<4x32x32xf32, #tpu.memory_space<vmem>>, vector<1x32x32xf32>
    %4 = vector.shape_cast %3 : vector<1x32x32xf32> to vector<32x32xf32>
    %c1 = arith.constant 1 : index
    %c0_3 = arith.constant 0 : index
    %c0_4 = arith.constant 0 : index
    %5 = vector.load %arg2[%c1, %c0_3, %c0_4] : memref<4x32x32xf32, #tpu.memory_space<vmem>>, vector<1x32x32xf32>
    %6 = vector.shape_cast %5 : vector<1x32x32xf32> to vector<32x32xf32>
    %c2 = arith.constant 2 : index
    %c0_5 = arith.constant 0 : index
    %c0_6 = arith.constant 0 : index
    %7 = vector.load %arg2[%c2, %c0_5, %c0_6] : memref<4x32x32xf32, #tpu.memory_space<vmem>>, vector<1x32x32xf32>
    %8 = vector.shape_cast %7 : vector<1x32x32xf32> to vector<32x32xf32>
    %c3 = arith.constant 3 : index
    %c0_7 = arith.constant 0 : index
    %c0_8 = arith.constant 0 : index
    %9 = vector.load %arg2[%c3, %c0_7, %c0_8] : memref<4x32x32xf32, #tpu.memory_space<vmem>>, vector<1x32x32xf32>
    %10 = vector.shape_cast %9 : vector<1x32x32xf32> to vector<32x32xf32>
    %c0_9 = arith.constant 0 : index
    %c0_10 = arith.constant 0 : index
    %11 = vector.load %arg4[%c0_9, %c0_10] : memref<2x32xf32, #tpu.memory_space<vmem>>, vector<2x32xf32>
    %c0_11 = arith.constant 0 : index
    %c0_12 = arith.constant 0 : index
    %12 = vector.load %arg5[%c0_11, %c0_12] : memref<2x32xf32, #tpu.memory_space<vmem>>, vector<2x32xf32>
    %c0_i32_13 = arith.constant 0 : i32
    %c0_14 = arith.constant 0 : index
    %13 = arith.index_cast %c0_i32_13 : i32 to index
    %c0_15 = arith.constant 0 : index
    %c0_16 = arith.constant 0 : index
    %14 = vector.load %arg1[%c0_14, %13, %c0_15, %c0_16] : memref<4x8x2x32xf32, #tpu.memory_space<vmem>>, vector<1x1x2x32xf32>
    %15 = vector.shape_cast %14 : vector<1x1x2x32xf32> to vector<2x32xf32>
    %cst = arith.constant dense<0.000000e+00> : vector<2x32xf32>
    %16 = tpu.matmul %11, %4, %cst {dimension_numbers = #tpu.dot_dimension_numbers<[1], [0], [0], [1], [0, 0, 1, 1], [], []>} : vector<2x32xf32>, vector<32x32xf32>, vector<2x32xf32> -> vector<2x32xf32>
    %17 = arith.addf %15, %16 : vector<2x32xf32>
    %18 = arith.negf %17 : vector<2x32xf32>
    %19 = math.exp %18 : vector<2x32xf32>
    %cst_17 = arith.constant 1.000000e+00 : f32
    %20 = vector.broadcast %cst_17 : f32 to vector<2x32xf32>
    %21 = arith.addf %20, %19 : vector<2x32xf32>
    %22 = arith.divf %20, %21 : vector<2x32xf32>
    %c1_18 = arith.constant 1 : index
    %23 = arith.index_cast %c0_i32_13 : i32 to index
    %c0_19 = arith.constant 0 : index
    %c0_20 = arith.constant 0 : index
    %24 = vector.load %arg1[%c1_18, %23, %c0_19, %c0_20] : memref<4x8x2x32xf32, #tpu.memory_space<vmem>>, vector<1x1x2x32xf32>
    %25 = vector.shape_cast %24 : vector<1x1x2x32xf32> to vector<2x32xf32>
    %cst_21 = arith.constant dense<0.000000e+00> : vector<2x32xf32>
    %26 = tpu.matmul %11, %6, %cst_21 {dimension_numbers = #tpu.dot_dimension_numbers<[1], [0], [0], [1], [0, 0, 1, 1], [], []>} : vector<2x32xf32>, vector<32x32xf32>, vector<2x32xf32> -> vector<2x32xf32>
    %27 = arith.addf %25, %26 : vector<2x32xf32>
    %28 = arith.negf %27 : vector<2x32xf32>
    %29 = math.exp %28 : vector<2x32xf32>
    %cst_22 = arith.constant 1.000000e+00 : f32
    %30 = vector.broadcast %cst_22 : f32 to vector<2x32xf32>
    %31 = arith.addf %30, %29 : vector<2x32xf32>
    %32 = arith.divf %30, %31 : vector<2x32xf32>
    %c2_23 = arith.constant 2 : index
    %33 = arith.index_cast %c0_i32_13 : i32 to index
    %c0_24 = arith.constant 0 : index
    %c0_25 = arith.constant 0 : index
    %34 = vector.load %arg1[%c2_23, %33, %c0_24, %c0_25] : memref<4x8x2x32xf32, #tpu.memory_space<vmem>>, vector<1x1x2x32xf32>
    %35 = vector.shape_cast %34 : vector<1x1x2x32xf32> to vector<2x32xf32>
    %cst_26 = arith.constant dense<0.000000e+00> : vector<2x32xf32>
    %36 = tpu.matmul %11, %8, %cst_26 {dimension_numbers = #tpu.dot_dimension_numbers<[1], [0], [0], [1], [0, 0, 1, 1], [], []>} : vector<2x32xf32>, vector<32x32xf32>, vector<2x32xf32> -> vector<2x32xf32>
    %37 = arith.addf %35, %36 : vector<2x32xf32>
    %38 = math.tanh %37 : vector<2x32xf32>
    %c3_27 = arith.constant 3 : index
    %39 = arith.index_cast %c0_i32_13 : i32 to index
    %c0_28 = arith.constant 0 : index
    %c0_29 = arith.constant 0 : index
    %40 = vector.load %arg1[%c3_27, %39, %c0_28, %c0_29] : memref<4x8x2x32xf32, #tpu.memory_space<vmem>>, vector<1x1x2x32xf32>
    %41 = vector.shape_cast %40 : vector<1x1x2x32xf32> to vector<2x32xf32>
    %cst_30 = arith.constant dense<0.000000e+00> : vector<2x32xf32>
    %42 = tpu.matmul %11, %10, %cst_30 {dimension_numbers = #tpu.dot_dimension_numbers<[1], [0], [0], [1], [0, 0, 1, 1], [], []>} : vector<2x32xf32>, vector<32x32xf32>, vector<2x32xf32> -> vector<2x32xf32>
    %43 = arith.addf %41, %42 : vector<2x32xf32>
    %44 = arith.negf %43 : vector<2x32xf32>
    %45 = math.exp %44 : vector<2x32xf32>
    %cst_31 = arith.constant 1.000000e+00 : f32
    %46 = vector.broadcast %cst_31 : f32 to vector<2x32xf32>
    %47 = arith.addf %46, %45 : vector<2x32xf32>
    %48 = arith.divf %46, %47 : vector<2x32xf32>
    %49 = arith.mulf %32, %12 : vector<2x32xf32>
    %50 = arith.mulf %22, %38 : vector<2x32xf32>
    %51 = arith.addf %49, %50 : vector<2x32xf32>
    %52 = math.tanh %51 : vector<2x32xf32>
    %53 = arith.mulf %48, %52 : vector<2x32xf32>
    %54 = arith.index_cast %c0_i32_13 : i32 to index
    %c0_32 = arith.constant 0 : index
    %c0_33 = arith.constant 0 : index
    %55 = vector.load %arg3[%54, %c0_32, %c0_33] : memref<8x2x32xf32, #tpu.memory_space<vmem>>, vector<1x2x32xf32>
    %56 = vector.shape_cast %55 : vector<1x2x32xf32> to vector<2x32xf32>
    %57 = vector.shape_cast %53 : vector<2x32xf32> to vector<1x2x32xf32>
    tpu.vector_store %arg3[%54, %c0_32, %c0_33], %57 {strides = array<i32>} : memref<8x2x32xf32, #tpu.memory_space<vmem>>, vector<1x2x32xf32>,
    %c1_i32 = arith.constant 1 : i32
    %c0_34 = arith.constant 0 : index
    %58 = arith.index_cast %c1_i32 : i32 to index
    %c0_35 = arith.constant 0 : index
    %c0_36 = arith.constant 0 : index
    %59 = vector.load %arg1[%c0_34, %58, %c0_35, %c0_36] : memref<4x8x2x32xf32, #tpu.memory_space<vmem>>, vector<1x1x2x32xf32>
    %60 = vector.shape_cast %59 : vector<1x1x2x32xf32> to vector<2x32xf32>
    %cst_37 = arith.constant dense<0.000000e+00> : vector<2x32xf32>
    %61 = tpu.matmul %53, %4, %cst_37 {dimension_numbers = #tpu.dot_dimension_numbers<[1], [0], [0], [1], [0, 0, 1, 1], [], []>} : vector<2x32xf32>, vector<32x32xf32>, vector<2x32xf32> -> vector<2x32xf32>
    %62 = arith.addf %60, %61 : vector<2x32xf32>
    %63 = arith.negf %62 : vector<2x32xf32>
    %64 = math.exp %63 : vector<2x32xf32>
    %cst_38 = arith.constant 1.000000e+00 : f32
    %65 = vector.broadcast %cst_38 : f32 to vector<2x32xf32>
    %66 = arith.addf %65, %64 : vector<2x32xf32>
    %67 = arith.divf %65, %66 : vector<2x32xf32>
    %c1_39 = arith.constant 1 : index
    %68 = arith.index_cast %c1_i32 : i32 to index
    %c0_40 = arith.constant 0 : index
    %c0_41 = arith.constant 0 : index
    %69 = vector.load %arg1[%c1_39, %68, %c0_40, %c0_41] : memref<4x8x2x32xf32, #tpu.memory_space<vmem>>, vector<1x1x2x32xf32>
    %70 = vector.shape_cast %69 : vector<1x1x2x32xf32> to vector<2x32xf32>
    %cst_42 = arith.constant dense<0.000000e+00> : vector<2x32xf32>
    %71 = tpu.matmul %53, %6, %cst_42 {dimension_numbers = #tpu.dot_dimension_numbers<[1], [0], [0], [1], [0, 0, 1, 1], [], []>} : vector<2x32xf32>, vector<32x32xf32>, vector<2x32xf32> -> vector<2x32xf32>
    %72 = arith.addf %70, %71 : vector<2x32xf32>
    %73 = arith.negf %72 : vector<2x32xf32>
    %74 = math.exp %73 : vector<2x32xf32>
    %cst_43 = arith.constant 1.000000e+00 : f32
    %75 = vector.broadcast %cst_43 : f32 to vector<2x32xf32>
    %76 = arith.addf %75, %74 : vector<2x32xf32>
    %77 = arith.divf %75, %76 : vector<2x32xf32>
    %c2_44 = arith.constant 2 : index
    %78 = arith.index_cast %c1_i32 : i32 to index
    %c0_45 = arith.constant 0 : index
    %c0_46 = arith.constant 0 : index
    %79 = vector.load %arg1[%c2_44, %78, %c0_45, %c0_46] : memref<4x8x2x32xf32, #tpu.memory_space<vmem>>, vector<1x1x2x32xf32>
    %80 = vector.shape_cast %79 : vector<1x1x2x32xf32> to vector<2x32xf32>
    %cst_47 = arith.constant dense<0.000000e+00> : vector<2x32xf32>
    %81 = tpu.matmul %53, %8, %cst_47 {dimension_numbers = #tpu.dot_dimension_numbers<[1], [0], [0], [1], [0, 0, 1, 1], [], []>} : vector<2x32xf32>, vector<32x32xf32>, vector<2x32xf32> -> vector<2x32xf32>
    %82 = arith.addf %80, %81 : vector<2x32xf32>
    %83 = math.tanh %82 : vector<2x32xf32>
    %c3_48 = arith.constant 3 : index
    %84 = arith.index_cast %c1_i32 : i32 to index
    %c0_49 = arith.constant 0 : index
    %c0_50 = arith.constant 0 : index
    %85 = vector.load %arg1[%c3_48, %84, %c0_49, %c0_50] : memref<4x8x2x32xf32, #tpu.memory_space<vmem>>, vector<1x1x2x32xf32>
    %86 = vector.shape_cast %85 : vector<1x1x2x32xf32> to vector<2x32xf32>
    %cst_51 = arith.constant dense<0.000000e+00> : vector<2x32xf32>
    %87 = tpu.matmul %53, %10, %cst_51 {dimension_numbers = #tpu.dot_dimension_numbers<[1], [0], [0], [1], [0, 0, 1, 1], [], []>} : vector<2x32xf32>, vector<32x32xf32>, vector<2x32xf32> -> vector<2x32xf32>
    %88 = arith.addf %86, %87 : vector<2x32xf32>
    %89 = arith.negf %88 : vector<2x32xf32>
    %90 = math.exp %89 : vector<2x32xf32>
    %cst_52 = arith.constant 1.000000e+00 : f32
    %91 = vector.broadcast %cst_52 : f32 to vector<2x32xf32>
    %92 = arith.addf %91, %90 : vector<2x32xf32>
    %93 = arith.divf %91, %92 : vector<2x32xf32>
    %94 = arith.mulf %77, %51 : vector<2x32xf32>
    %95 = arith.mulf %67, %83 : vector<2x32xf32>
    %96 = arith.addf %94, %95 : vector<2x32xf32>
    %97 = math.tanh %96 : vector<2x32xf32>
    %98 = arith.mulf %93, %97 : vector<2x32xf32>
    %99 = arith.index_cast %c1_i32 : i32 to index
    %c0_53 = arith.constant 0 : index
    %c0_54 = arith.constant 0 : index
    %100 = vector.load %arg3[%99, %c0_53, %c0_54] : memref<8x2x32xf32, #tpu.memory_space<vmem>>, vector<1x2x32xf32>
    %101 = vector.shape_cast %100 : vector<1x2x32xf32> to vector<2x32xf32>
    %102 = vector.shape_cast %98 : vector<2x32xf32> to vector<1x2x32xf32>
    tpu.vector_store %arg3[%99, %c0_53, %c0_54], %102 {strides = array<i32>} : memref<8x2x32xf32, #tpu.memory_space<vmem>>, vector<1x2x32xf32>,
    %c2_i32 = arith.constant 2 : i32
    %c0_55 = arith.constant 0 : index
    %103 = arith.index_cast %c2_i32 : i32 to index
    %c0_56 = arith.constant 0 : index
    %c0_57 = arith.constant 0 : index
    %104 = vector.load %arg1[%c0_55, %103, %c0_56, %c0_57] : memref<4x8x2x32xf32, #tpu.memory_space<vmem>>, vector<1x1x2x32xf32>
    %105 = vector.shape_cast %104 : vector<1x1x2x32xf32> to vector<2x32xf32>
    %cst_58 = arith.constant dense<0.000000e+00> : vector<2x32xf32>
    %106 = tpu.matmul %98, %4, %cst_58 {dimension_numbers = #tpu.dot_dimension_numbers<[1], [0], [0], [1], [0, 0, 1, 1], [], []>} : vector<2x32xf32>, vector<32x32xf32>, vector<2x32xf32> -> vector<2x32xf32>
    %107 = arith.addf %105, %106 : vector<2x32xf32>
    %108 = arith.negf %107 : vector<2x32xf32>
    %109 = math.exp %108 : vector<2x32xf32>
    %cst_59 = arith.constant 1.000000e+00 : f32
    %110 = vector.broadcast %cst_59 : f32 to vector<2x32xf32>
    %111 = arith.addf %110, %109 : vector<2x32xf32>
    %112 = arith.divf %110, %111 : vector<2x32xf32>
    %c1_60 = arith.constant 1 : index
    %113 = arith.index_cast %c2_i32 : i32 to index
    %c0_61 = arith.constant 0 : index
    %c0_62 = arith.constant 0 : index
    %114 = vector.load %arg1[%c1_60, %113, %c0_61, %c0_62] : memref<4x8x2x32xf32, #tpu.memory_space<vmem>>, vector<1x1x2x32xf32>
    %115 = vector.shape_cast %114 : vector<1x1x2x32xf32> to vector<2x32xf32>
    %cst_63 = arith.constant dense<0.000000e+00> : vector<2x32xf32>
    %116 = tpu.matmul %98, %6, %cst_63 {dimension_numbers = #tpu.dot_dimension_numbers<[1], [0], [0], [1], [0, 0, 1, 1], [], []>} : vector<2x32xf32>, vector<32x32xf32>, vector<2x32xf32> -> vector<2x32xf32>
    %117 = arith.addf %115, %116 : vector<2x32xf32>
    %118 = arith.negf %117 : vector<2x32xf32>
    %119 = math.exp %118 : vector<2x32xf32>
    %cst_64 = arith.constant 1.000000e+00 : f32
    %120 = vector.broadcast %cst_64 : f32 to vector<2x32xf32>
    %121 = arith.addf %120, %119 : vector<2x32xf32>
    %122 = arith.divf %120, %121 : vector<2x32xf32>
    %c2_65 = arith.constant 2 : index
    %123 = arith.index_cast %c2_i32 : i32 to index
    %c0_66 = arith.constant 0 : index
    %c0_67 = arith.constant 0 : index
    %124 = vector.load %arg1[%c2_65, %123, %c0_66, %c0_67] : memref<4x8x2x32xf32, #tpu.memory_space<vmem>>, vector<1x1x2x32xf32>
    %125 = vector.shape_cast %124 : vector<1x1x2x32xf32> to vector<2x32xf32>
    %cst_68 = arith.constant dense<0.000000e+00> : vector<2x32xf32>
    %126 = tpu.matmul %98, %8, %cst_68 {dimension_numbers = #tpu.dot_dimension_numbers<[1], [0], [0], [1], [0, 0, 1, 1], [], []>} : vector<2x32xf32>, vector<32x32xf32>, vector<2x32xf32> -> vector<2x32xf32>
    %127 = arith.addf %125, %126 : vector<2x32xf32>
    %128 = math.tanh %127 : vector<2x32xf32>
    %c3_69 = arith.constant 3 : index
    %129 = arith.index_cast %c2_i32 : i32 to index
    %c0_70 = arith.constant 0 : index
    %c0_71 = arith.constant 0 : index
    %130 = vector.load %arg1[%c3_69, %129, %c0_70, %c0_71] : memref<4x8x2x32xf32, #tpu.memory_space<vmem>>, vector<1x1x2x32xf32>
    %131 = vector.shape_cast %130 : vector<1x1x2x32xf32> to vector<2x32xf32>
    %cst_72 = arith.constant dense<0.000000e+00> : vector<2x32xf32>
    %132 = tpu.matmul %98, %10, %cst_72 {dimension_numbers = #tpu.dot_dimension_numbers<[1], [0], [0], [1], [0, 0, 1, 1], [], []>} : vector<2x32xf32>, vector<32x32xf32>, vector<2x32xf32> -> vector<2x32xf32>
    %133 = arith.addf %131, %132 : vector<2x32xf32>
    %134 = arith.negf %133 : vector<2x32xf32>
    %135 = math.exp %134 : vector<2x32xf32>
    %cst_73 = arith.constant 1.000000e+00 : f32
    %136 = vector.broadcast %cst_73 : f32 to vector<2x32xf32>
    %137 = arith.addf %136, %135 : vector<2x32xf32>
    %138 = arith.divf %136, %137 : vector<2x32xf32>
    %139 = arith.mulf %122, %96 : vector<2x32xf32>
    %140 = arith.mulf %112, %128 : vector<2x32xf32>
    %141 = arith.addf %139, %140 : vector<2x32xf32>
    %142 = math.tanh %141 : vector<2x32xf32>
    %143 = arith.mulf %138, %142 : vector<2x32xf32>
    %144 = arith.index_cast %c2_i32 : i32 to index
    %c0_74 = arith.constant 0 : index
    %c0_75 = arith.constant 0 : index
    %145 = vector.load %arg3[%144, %c0_74, %c0_75] : memref<8x2x32xf32, #tpu.memory_space<vmem>>, vector<1x2x32xf32>
    %146 = vector.shape_cast %145 : vector<1x2x32xf32> to vector<2x32xf32>
    %147 = vector.shape_cast %143 : vector<2x32xf32> to vector<1x2x32xf32>
    tpu.vector_store %arg3[%144, %c0_74, %c0_75], %147 {strides = array<i32>} : memref<8x2x32xf32, #tpu.memory_space<vmem>>, vector<1x2x32xf32>,
    %c3_i32 = arith.constant 3 : i32
    %c0_76 = arith.constant 0 : index
    %148 = arith.index_cast %c3_i32 : i32 to index
    %c0_77 = arith.constant 0 : index
    %c0_78 = arith.constant 0 : index
    %149 = vector.load %arg1[%c0_76, %148, %c0_77, %c0_78] : memref<4x8x2x32xf32, #tpu.memory_space<vmem>>, vector<1x1x2x32xf32>
    %150 = vector.shape_cast %149 : vector<1x1x2x32xf32> to vector<2x32xf32>
    %cst_79 = arith.constant dense<0.000000e+00> : vector<2x32xf32>
    %151 = tpu.matmul %143, %4, %cst_79 {dimension_numbers = #tpu.dot_dimension_numbers<[1], [0], [0], [1], [0, 0, 1, 1], [], []>} : vector<2x32xf32>, vector<32x32xf32>, vector<2x32xf32> -> vector<2x32xf32>
    %152 = arith.addf %150, %151 : vector<2x32xf32>
    %153 = arith.negf %152 : vector<2x32xf32>
    %154 = math.exp %153 : vector<2x32xf32>
    %cst_80 = arith.constant 1.000000e+00 : f32
    %155 = vector.broadcast %cst_80 : f32 to vector<2x32xf32>
    %156 = arith.addf %155, %154 : vector<2x32xf32>
    %157 = arith.divf %155, %156 : vector<2x32xf32>
    %c1_81 = arith.constant 1 : index
    %158 = arith.index_cast %c3_i32 : i32 to index
    %c0_82 = arith.constant 0 : index
    %c0_83 = arith.constant 0 : index
    %159 = vector.load %arg1[%c1_81, %158, %c0_82, %c0_83] : memref<4x8x2x32xf32, #tpu.memory_space<vmem>>, vector<1x1x2x32xf32>
    %160 = vector.shape_cast %159 : vector<1x1x2x32xf32> to vector<2x32xf32>
    %cst_84 = arith.constant dense<0.000000e+00> : vector<2x32xf32>
    %161 = tpu.matmul %143, %6, %cst_84 {dimension_numbers = #tpu.dot_dimension_numbers<[1], [0], [0], [1], [0, 0, 1, 1], [], []>} : vector<2x32xf32>, vector<32x32xf32>, vector<2x32xf32> -> vector<2x32xf32>
    %162 = arith.addf %160, %161 : vector<2x32xf32>
    %163 = arith.negf %162 : vector<2x32xf32>
    %164 = math.exp %163 : vector<2x32xf32>
    %cst_85 = arith.constant 1.000000e+00 : f32
    %165 = vector.broadcast %cst_85 : f32 to vector<2x32xf32>
    %166 = arith.addf %165, %164 : vector<2x32xf32>
    %167 = arith.divf %165, %166 : vector<2x32xf32>
    %c2_86 = arith.constant 2 : index
    %168 = arith.index_cast %c3_i32 : i32 to index
    %c0_87 = arith.constant 0 : index
    %c0_88 = arith.constant 0 : index
    %169 = vector.load %arg1[%c2_86, %168, %c0_87, %c0_88] : memref<4x8x2x32xf32, #tpu.memory_space<vmem>>, vector<1x1x2x32xf32>
    %170 = vector.shape_cast %169 : vector<1x1x2x32xf32> to vector<2x32xf32>
    %cst_89 = arith.constant dense<0.000000e+00> : vector<2x32xf32>
    %171 = tpu.matmul %143, %8, %cst_89 {dimension_numbers = #tpu.dot_dimension_numbers<[1], [0], [0], [1], [0, 0, 1, 1], [], []>} : vector<2x32xf32>, vector<32x32xf32>, vector<2x32xf32> -> vector<2x32xf32>
    %172 = arith.addf %170, %171 : vector<2x32xf32>
    %173 = math.tanh %172 : vector<2x32xf32>
    %c3_90 = arith.constant 3 : index
    %174 = arith.index_cast %c3_i32 : i32 to index
    %c0_91 = arith.constant 0 : index
    %c0_92 = arith.constant 0 : index
    %175 = vector.load %arg1[%c3_90, %174, %c0_91, %c0_92] : memref<4x8x2x32xf32, #tpu.memory_space<vmem>>, vector<1x1x2x32xf32>
    %176 = vector.shape_cast %175 : vector<1x1x2x32xf32> to vector<2x32xf32>
    %cst_93 = arith.constant dense<0.000000e+00> : vector<2x32xf32>
    %177 = tpu.matmul %143, %10, %cst_93 {dimension_numbers = #tpu.dot_dimension_numbers<[1], [0], [0], [1], [0, 0, 1, 1], [], []>} : vector<2x32xf32>, vector<32x32xf32>, vector<2x32xf32> -> vector<2x32xf32>
    %178 = arith.addf %176, %177 : vector<2x32xf32>
    %179 = arith.negf %178 : vector<2x32xf32>
    %180 = math.exp %179 : vector<2x32xf32>
    %cst_94 = arith.constant 1.000000e+00 : f32
    %181 = vector.broadcast %cst_94 : f32 to vector<2x32xf32>
    %182 = arith.addf %181, %180 : vector<2x32xf32>
    %183 = arith.divf %181, %182 : vector<2x32xf32>
    %184 = arith.mulf %167, %141 : vector<2x32xf32>
    %185 = arith.mulf %157, %173 : vector<2x32xf32>
    %186 = arith.addf %184, %185 : vector<2x32xf32>
    %187 = math.tanh %186 : vector<2x32xf32>
    %188 = arith.mulf %183, %187 : vector<2x32xf32>
    %189 = arith.index_cast %c3_i32 : i32 to index
    %c0_95 = arith.constant 0 : index
    %c0_96 = arith.constant 0 : index
    %190 = vector.load %arg3[%189, %c0_95, %c0_96] : memref<8x2x32xf32, #tpu.memory_space<vmem>>, vector<1x2x32xf32>
    %191 = vector.shape_cast %190 : vector<1x2x32xf32> to vector<2x32xf32>
    %192 = vector.shape_cast %188 : vector<2x32xf32> to vector<1x2x32xf32>
    tpu.vector_store %arg3[%189, %c0_95, %c0_96], %192 {strides = array<i32>} : memref<8x2x32xf32, #tpu.memory_space<vmem>>, vector<1x2x32xf32>,
    %c4_i32 = arith.constant 4 : i32
    %c0_97 = arith.constant 0 : index
    %193 = arith.index_cast %c4_i32 : i32 to index
    %c0_98 = arith.constant 0 : index
    %c0_99 = arith.constant 0 : index
    %194 = vector.load %arg1[%c0_97, %193, %c0_98, %c0_99] : memref<4x8x2x32xf32, #tpu.memory_space<vmem>>, vector<1x1x2x32xf32>
    %195 = vector.shape_cast %194 : vector<1x1x2x32xf32> to vector<2x32xf32>
    %cst_100 = arith.constant dense<0.000000e+00> : vector<2x32xf32>
    %196 = tpu.matmul %188, %4, %cst_100 {dimension_numbers = #tpu.dot_dimension_numbers<[1], [0], [0], [1], [0, 0, 1, 1], [], []>} : vector<2x32xf32>, vector<32x32xf32>, vector<2x32xf32> -> vector<2x32xf32>
    %197 = arith.addf %195, %196 : vector<2x32xf32>
    %198 = arith.negf %197 : vector<2x32xf32>
    %199 = math.exp %198 : vector<2x32xf32>
    %cst_101 = arith.constant 1.000000e+00 : f32
    %200 = vector.broadcast %cst_101 : f32 to vector<2x32xf32>
    %201 = arith.addf %200, %199 : vector<2x32xf32>
    %202 = arith.divf %200, %201 : vector<2x32xf32>
    %c1_102 = arith.constant 1 : index
    %203 = arith.index_cast %c4_i32 : i32 to index
    %c0_103 = arith.constant 0 : index
    %c0_104 = arith.constant 0 : index
    %204 = vector.load %arg1[%c1_102, %203, %c0_103, %c0_104] : memref<4x8x2x32xf32, #tpu.memory_space<vmem>>, vector<1x1x2x32xf32>
    %205 = vector.shape_cast %204 : vector<1x1x2x32xf32> to vector<2x32xf32>
    %cst_105 = arith.constant dense<0.000000e+00> : vector<2x32xf32>
    %206 = tpu.matmul %188, %6, %cst_105 {dimension_numbers = #tpu.dot_dimension_numbers<[1], [0], [0], [1], [0, 0, 1, 1], [], []>} : vector<2x32xf32>, vector<32x32xf32>, vector<2x32xf32> -> vector<2x32xf32>
    %207 = arith.addf %205, %206 : vector<2x32xf32>
    %208 = arith.negf %207 : vector<2x32xf32>
    %209 = math.exp %208 : vector<2x32xf32>
    %cst_106 = arith.constant 1.000000e+00 : f32
    %210 = vector.broadcast %cst_106 : f32 to vector<2x32xf32>
    %211 = arith.addf %210, %209 : vector<2x32xf32>
    %212 = arith.divf %210, %211 : vector<2x32xf32>
    %c2_107 = arith.constant 2 : index
    %213 = arith.index_cast %c4_i32 : i32 to index
    %c0_108 = arith.constant 0 : index
    %c0_109 = arith.constant 0 : index
    %214 = vector.load %arg1[%c2_107, %213, %c0_108, %c0_109] : memref<4x8x2x32xf32, #tpu.memory_space<vmem>>, vector<1x1x2x32xf32>
    %215 = vector.shape_cast %214 : vector<1x1x2x32xf32> to vector<2x32xf32>
    %cst_110 = arith.constant dense<0.000000e+00> : vector<2x32xf32>
    %216 = tpu.matmul %188, %8, %cst_110 {dimension_numbers = #tpu.dot_dimension_numbers<[1], [0], [0], [1], [0, 0, 1, 1], [], []>} : vector<2x32xf32>, vector<32x32xf32>, vector<2x32xf32> -> vector<2x32xf32>
    %217 = arith.addf %215, %216 : vector<2x32xf32>
    %218 = math.tanh %217 : vector<2x32xf32>
    %c3_111 = arith.constant 3 : index
    %219 = arith.index_cast %c4_i32 : i32 to index
    %c0_112 = arith.constant 0 : index
    %c0_113 = arith.constant 0 : index
    %220 = vector.load %arg1[%c3_111, %219, %c0_112, %c0_113] : memref<4x8x2x32xf32, #tpu.memory_space<vmem>>, vector<1x1x2x32xf32>
    %221 = vector.shape_cast %220 : vector<1x1x2x32xf32> to vector<2x32xf32>
    %cst_114 = arith.constant dense<0.000000e+00> : vector<2x32xf32>
    %222 = tpu.matmul %188, %10, %cst_114 {dimension_numbers = #tpu.dot_dimension_numbers<[1], [0], [0], [1], [0, 0, 1, 1], [], []>} : vector<2x32xf32>, vector<32x32xf32>, vector<2x32xf32> -> vector<2x32xf32>
    %223 = arith.addf %221, %222 : vector<2x32xf32>
    %224 = arith.negf %223 : vector<2x32xf32>
    %225 = math.exp %224 : vector<2x32xf32>
    %cst_115 = arith.constant 1.000000e+00 : f32
    %226 = vector.broadcast %cst_115 : f32 to vector<2x32xf32>
    %227 = arith.addf %226, %225 : vector<2x32xf32>
    %228 = arith.divf %226, %227 : vector<2x32xf32>
    %229 = arith.mulf %212, %186 : vector<2x32xf32>
    %230 = arith.mulf %202, %218 : vector<2x32xf32>
    %231 = arith.addf %229, %230 : vector<2x32xf32>
    %232 = math.tanh %231 : vector<2x32xf32>
    %233 = arith.mulf %228, %232 : vector<2x32xf32>
    %234 = arith.index_cast %c4_i32 : i32 to index
    %c0_116 = arith.constant 0 : index
    %c0_117 = arith.constant 0 : index
    %235 = vector.load %arg3[%234, %c0_116, %c0_117] : memref<8x2x32xf32, #tpu.memory_space<vmem>>, vector<1x2x32xf32>
    %236 = vector.shape_cast %235 : vector<1x2x32xf32> to vector<2x32xf32>
    %237 = vector.shape_cast %233 : vector<2x32xf32> to vector<1x2x32xf32>
    tpu.vector_store %arg3[%234, %c0_116, %c0_117], %237 {strides = array<i32>} : memref<8x2x32xf32, #tpu.memory_space<vmem>>, vector<1x2x32xf32>,
    %c5_i32 = arith.constant 5 : i32
    %c0_118 = arith.constant 0 : index
    %238 = arith.index_cast %c5_i32 : i32 to index
    %c0_119 = arith.constant 0 : index
    %c0_120 = arith.constant 0 : index
    %239 = vector.load %arg1[%c0_118, %238, %c0_119, %c0_120] : memref<4x8x2x32xf32, #tpu.memory_space<vmem>>, vector<1x1x2x32xf32>
    %240 = vector.shape_cast %239 : vector<1x1x2x32xf32> to vector<2x32xf32>
    %cst_121 = arith.constant dense<0.000000e+00> : vector<2x32xf32>
    %241 = tpu.matmul %233, %4, %cst_121 {dimension_numbers = #tpu.dot_dimension_numbers<[1], [0], [0], [1], [0, 0, 1, 1], [], []>} : vector<2x32xf32>, vector<32x32xf32>, vector<2x32xf32> -> vector<2x32xf32>
    %242 = arith.addf %240, %241 : vector<2x32xf32>
    %243 = arith.negf %242 : vector<2x32xf32>
    %244 = math.exp %243 : vector<2x32xf32>
    %cst_122 = arith.constant 1.000000e+00 : f32
    %245 = vector.broadcast %cst_122 : f32 to vector<2x32xf32>
    %246 = arith.addf %245, %244 : vector<2x32xf32>
    %247 = arith.divf %245, %246 : vector<2x32xf32>
    %c1_123 = arith.constant 1 : index
    %248 = arith.index_cast %c5_i32 : i32 to index
    %c0_124 = arith.constant 0 : index
    %c0_125 = arith.constant 0 : index
    %249 = vector.load %arg1[%c1_123, %248, %c0_124, %c0_125] : memref<4x8x2x32xf32, #tpu.memory_space<vmem>>, vector<1x1x2x32xf32>
    %250 = vector.shape_cast %249 : vector<1x1x2x32xf32> to vector<2x32xf32>
    %cst_126 = arith.constant dense<0.000000e+00> : vector<2x32xf32>
    %251 = tpu.matmul %233, %6, %cst_126 {dimension_numbers = #tpu.dot_dimension_numbers<[1], [0], [0], [1], [0, 0, 1, 1], [], []>} : vector<2x32xf32>, vector<32x32xf32>, vector<2x32xf32> -> vector<2x32xf32>
    %252 = arith.addf %250, %251 : vector<2x32xf32>
    %253 = arith.negf %252 : vector<2x32xf32>
    %254 = math.exp %253 : vector<2x32xf32>
    %cst_127 = arith.constant 1.000000e+00 : f32
    %255 = vector.broadcast %cst_127 : f32 to vector<2x32xf32>
    %256 = arith.addf %255, %254 : vector<2x32xf32>
    %257 = arith.divf %255, %256 : vector<2x32xf32>
    %c2_128 = arith.constant 2 : index
    %258 = arith.index_cast %c5_i32 : i32 to index
    %c0_129 = arith.constant 0 : index
    %c0_130 = arith.constant 0 : index
    %259 = vector.load %arg1[%c2_128, %258, %c0_129, %c0_130] : memref<4x8x2x32xf32, #tpu.memory_space<vmem>>, vector<1x1x2x32xf32>
    %260 = vector.shape_cast %259 : vector<1x1x2x32xf32> to vector<2x32xf32>
    %cst_131 = arith.constant dense<0.000000e+00> : vector<2x32xf32>
    %261 = tpu.matmul %233, %8, %cst_131 {dimension_numbers = #tpu.dot_dimension_numbers<[1], [0], [0], [1], [0, 0, 1, 1], [], []>} : vector<2x32xf32>, vector<32x32xf32>, vector<2x32xf32> -> vector<2x32xf32>
    %262 = arith.addf %260, %261 : vector<2x32xf32>
    %263 = math.tanh %262 : vector<2x32xf32>
    %c3_132 = arith.constant 3 : index
    %264 = arith.index_cast %c5_i32 : i32 to index
    %c0_133 = arith.constant 0 : index
    %c0_134 = arith.constant 0 : index
    %265 = vector.load %arg1[%c3_132, %264, %c0_133, %c0_134] : memref<4x8x2x32xf32, #tpu.memory_space<vmem>>, vector<1x1x2x32xf32>
    %266 = vector.shape_cast %265 : vector<1x1x2x32xf32> to vector<2x32xf32>
    %cst_135 = arith.constant dense<0.000000e+00> : vector<2x32xf32>
    %267 = tpu.matmul %233, %10, %cst_135 {dimension_numbers = #tpu.dot_dimension_numbers<[1], [0], [0], [1], [0, 0, 1, 1], [], []>} : vector<2x32xf32>, vector<32x32xf32>, vector<2x32xf32> -> vector<2x32xf32>
    %268 = arith.addf %266, %267 : vector<2x32xf32>
    %269 = arith.negf %268 : vector<2x32xf32>
    %270 = math.exp %269 : vector<2x32xf32>
    %cst_136 = arith.constant 1.000000e+00 : f32
    %271 = vector.broadcast %cst_136 : f32 to vector<2x32xf32>
    %272 = arith.addf %271, %270 : vector<2x32xf32>
    %273 = arith.divf %271, %272 : vector<2x32xf32>
    %274 = arith.mulf %257, %231 : vector<2x32xf32>
    %275 = arith.mulf %247, %263 : vector<2x32xf32>
    %276 = arith.addf %274, %275 : vector<2x32xf32>
    %277 = math.tanh %276 : vector<2x32xf32>
    %278 = arith.mulf %273, %277 : vector<2x32xf32>
    %279 = arith.index_cast %c5_i32 : i32 to index
    %c0_137 = arith.constant 0 : index
    %c0_138 = arith.constant 0 : index
    %280 = vector.load %arg3[%279, %c0_137, %c0_138] : memref<8x2x32xf32, #tpu.memory_space<vmem>>, vector<1x2x32xf32>
    %281 = vector.shape_cast %280 : vector<1x2x32xf32> to vector<2x32xf32>
    %282 = vector.shape_cast %278 : vector<2x32xf32> to vector<1x2x32xf32>
    tpu.vector_store %arg3[%279, %c0_137, %c0_138], %282 {strides = array<i32>} : memref<8x2x32xf32, #tpu.memory_space<vmem>>, vector<1x2x32xf32>,
    %c6_i32 = arith.constant 6 : i32
    %c0_139 = arith.constant 0 : index
    %283 = arith.index_cast %c6_i32 : i32 to index
    %c0_140 = arith.constant 0 : index
    %c0_141 = arith.constant 0 : index
    %284 = vector.load %arg1[%c0_139, %283, %c0_140, %c0_141] : memref<4x8x2x32xf32, #tpu.memory_space<vmem>>, vector<1x1x2x32xf32>
    %285 = vector.shape_cast %284 : vector<1x1x2x32xf32> to vector<2x32xf32>
    %cst_142 = arith.constant dense<0.000000e+00> : vector<2x32xf32>
    %286 = tpu.matmul %278, %4, %cst_142 {dimension_numbers = #tpu.dot_dimension_numbers<[1], [0], [0], [1], [0, 0, 1, 1], [], []>} : vector<2x32xf32>, vector<32x32xf32>, vector<2x32xf32> -> vector<2x32xf32>
    %287 = arith.addf %285, %286 : vector<2x32xf32>
    %288 = arith.negf %287 : vector<2x32xf32>
    %289 = math.exp %288 : vector<2x32xf32>
    %cst_143 = arith.constant 1.000000e+00 : f32
    %290 = vector.broadcast %cst_143 : f32 to vector<2x32xf32>
    %291 = arith.addf %290, %289 : vector<2x32xf32>
    %292 = arith.divf %290, %291 : vector<2x32xf32>
    %c1_144 = arith.constant 1 : index
    %293 = arith.index_cast %c6_i32 : i32 to index
    %c0_145 = arith.constant 0 : index
    %c0_146 = arith.constant 0 : index
    %294 = vector.load %arg1[%c1_144, %293, %c0_145, %c0_146] : memref<4x8x2x32xf32, #tpu.memory_space<vmem>>, vector<1x1x2x32xf32>
    %295 = vector.shape_cast %294 : vector<1x1x2x32xf32> to vector<2x32xf32>
    %cst_147 = arith.constant dense<0.000000e+00> : vector<2x32xf32>
    %296 = tpu.matmul %278, %6, %cst_147 {dimension_numbers = #tpu.dot_dimension_numbers<[1], [0], [0], [1], [0, 0, 1, 1], [], []>} : vector<2x32xf32>, vector<32x32xf32>, vector<2x32xf32> -> vector<2x32xf32>
    %297 = arith.addf %295, %296 : vector<2x32xf32>
    %298 = arith.negf %297 : vector<2x32xf32>
    %299 = math.exp %298 : vector<2x32xf32>
    %cst_148 = arith.constant 1.000000e+00 : f32
    %300 = vector.broadcast %cst_148 : f32 to vector<2x32xf32>
    %301 = arith.addf %300, %299 : vector<2x32xf32>
    %302 = arith.divf %300, %301 : vector<2x32xf32>
    %c2_149 = arith.constant 2 : index
    %303 = arith.index_cast %c6_i32 : i32 to index
    %c0_150 = arith.constant 0 : index
    %c0_151 = arith.constant 0 : index
    %304 = vector.load %arg1[%c2_149, %303, %c0_150, %c0_151] : memref<4x8x2x32xf32, #tpu.memory_space<vmem>>, vector<1x1x2x32xf32>
    %305 = vector.shape_cast %304 : vector<1x1x2x32xf32> to vector<2x32xf32>
    %cst_152 = arith.constant dense<0.000000e+00> : vector<2x32xf32>
    %306 = tpu.matmul %278, %8, %cst_152 {dimension_numbers = #tpu.dot_dimension_numbers<[1], [0], [0], [1], [0, 0, 1, 1], [], []>} : vector<2x32xf32>, vector<32x32xf32>, vector<2x32xf32> -> vector<2x32xf32>
    %307 = arith.addf %305, %306 : vector<2x32xf32>
    %308 = math.tanh %307 : vector<2x32xf32>
    %c3_153 = arith.constant 3 : index
    %309 = arith.index_cast %c6_i32 : i32 to index
    %c0_154 = arith.constant 0 : index
    %c0_155 = arith.constant 0 : index
    %310 = vector.load %arg1[%c3_153, %309, %c0_154, %c0_155] : memref<4x8x2x32xf32, #tpu.memory_space<vmem>>, vector<1x1x2x32xf32>
    %311 = vector.shape_cast %310 : vector<1x1x2x32xf32> to vector<2x32xf32>
    %cst_156 = arith.constant dense<0.000000e+00> : vector<2x32xf32>
    %312 = tpu.matmul %278, %10, %cst_156 {dimension_numbers = #tpu.dot_dimension_numbers<[1], [0], [0], [1], [0, 0, 1, 1], [], []>} : vector<2x32xf32>, vector<32x32xf32>, vector<2x32xf32> -> vector<2x32xf32>
    %313 = arith.addf %311, %312 : vector<2x32xf32>
    %314 = arith.negf %313 : vector<2x32xf32>
    %315 = math.exp %314 : vector<2x32xf32>
    %cst_157 = arith.constant 1.000000e+00 : f32
    %316 = vector.broadcast %cst_157 : f32 to vector<2x32xf32>
    %317 = arith.addf %316, %315 : vector<2x32xf32>
    %318 = arith.divf %316, %317 : vector<2x32xf32>
    %319 = arith.mulf %302, %276 : vector<2x32xf32>
    %320 = arith.mulf %292, %308 : vector<2x32xf32>
    %321 = arith.addf %319, %320 : vector<2x32xf32>
    %322 = math.tanh %321 : vector<2x32xf32>
    %323 = arith.mulf %318, %322 : vector<2x32xf32>
    %324 = arith.index_cast %c6_i32 : i32 to index
    %c0_158 = arith.constant 0 : index
    %c0_159 = arith.constant 0 : index
    %325 = vector.load %arg3[%324, %c0_158, %c0_159] : memref<8x2x32xf32, #tpu.memory_space<vmem>>, vector<1x2x32xf32>
    %326 = vector.shape_cast %325 : vector<1x2x32xf32> to vector<2x32xf32>
    %327 = vector.shape_cast %323 : vector<2x32xf32> to vector<1x2x32xf32>
    tpu.vector_store %arg3[%324, %c0_158, %c0_159], %327 {strides = array<i32>} : memref<8x2x32xf32, #tpu.memory_space<vmem>>, vector<1x2x32xf32>,
    %c7_i32 = arith.constant 7 : i32
    %c0_160 = arith.constant 0 : index
    %328 = arith.index_cast %c7_i32 : i32 to index
    %c0_161 = arith.constant 0 : index
    %c0_162 = arith.constant 0 : index
    %329 = vector.load %arg1[%c0_160, %328, %c0_161, %c0_162] : memref<4x8x2x32xf32, #tpu.memory_space<vmem>>, vector<1x1x2x32xf32>
    %330 = vector.shape_cast %329 : vector<1x1x2x32xf32> to vector<2x32xf32>
    %cst_163 = arith.constant dense<0.000000e+00> : vector<2x32xf32>
    %331 = tpu.matmul %323, %4, %cst_163 {dimension_numbers = #tpu.dot_dimension_numbers<[1], [0], [0], [1], [0, 0, 1, 1], [], []>} : vector<2x32xf32>, vector<32x32xf32>, vector<2x32xf32> -> vector<2x32xf32>
    %332 = arith.addf %330, %331 : vector<2x32xf32>
    %333 = arith.negf %332 : vector<2x32xf32>
    %334 = math.exp %333 : vector<2x32xf32>
    %cst_164 = arith.constant 1.000000e+00 : f32
    %335 = vector.broadcast %cst_164 : f32 to vector<2x32xf32>
    %336 = arith.addf %335, %334 : vector<2x32xf32>
    %337 = arith.divf %335, %336 : vector<2x32xf32>
    %c1_165 = arith.constant 1 : index
    %338 = arith.index_cast %c7_i32 : i32 to index
    %c0_166 = arith.constant 0 : index
    %c0_167 = arith.constant 0 : index
    %339 = vector.load %arg1[%c1_165, %338, %c0_166, %c0_167] : memref<4x8x2x32xf32, #tpu.memory_space<vmem>>, vector<1x1x2x32xf32>
    %340 = vector.shape_cast %339 : vector<1x1x2x32xf32> to vector<2x32xf32>
    %cst_168 = arith.constant dense<0.000000e+00> : vector<2x32xf32>
    %341 = tpu.matmul %323, %6, %cst_168 {dimension_numbers = #tpu.dot_dimension_numbers<[1], [0], [0], [1], [0, 0, 1, 1], [], []>} : vector<2x32xf32>, vector<32x32xf32>, vector<2x32xf32> -> vector<2x32xf32>
    %342 = arith.addf %340, %341 : vector<2x32xf32>
    %343 = arith.negf %342 : vector<2x32xf32>
    %344 = math.exp %343 : vector<2x32xf32>
    %cst_169 = arith.constant 1.000000e+00 : f32
    %345 = vector.broadcast %cst_169 : f32 to vector<2x32xf32>
    %346 = arith.addf %345, %344 : vector<2x32xf32>
    %347 = arith.divf %345, %346 : vector<2x32xf32>
    %c2_170 = arith.constant 2 : index
    %348 = arith.index_cast %c7_i32 : i32 to index
    %c0_171 = arith.constant 0 : index
    %c0_172 = arith.constant 0 : index
    %349 = vector.load %arg1[%c2_170, %348, %c0_171, %c0_172] : memref<4x8x2x32xf32, #tpu.memory_space<vmem>>, vector<1x1x2x32xf32>
    %350 = vector.shape_cast %349 : vector<1x1x2x32xf32> to vector<2x32xf32>
    %cst_173 = arith.constant dense<0.000000e+00> : vector<2x32xf32>
    %351 = tpu.matmul %323, %8, %cst_173 {dimension_numbers = #tpu.dot_dimension_numbers<[1], [0], [0], [1], [0, 0, 1, 1], [], []>} : vector<2x32xf32>, vector<32x32xf32>, vector<2x32xf32> -> vector<2x32xf32>
    %352 = arith.addf %350, %351 : vector<2x32xf32>
    %353 = math.tanh %352 : vector<2x32xf32>
    %c3_174 = arith.constant 3 : index
    %354 = arith.index_cast %c7_i32 : i32 to index
    %c0_175 = arith.constant 0 : index
    %c0_176 = arith.constant 0 : index
    %355 = vector.load %arg1[%c3_174, %354, %c0_175, %c0_176] : memref<4x8x2x32xf32, #tpu.memory_space<vmem>>, vector<1x1x2x32xf32>
    %356 = vector.shape_cast %355 : vector<1x1x2x32xf32> to vector<2x32xf32>
    %cst_177 = arith.constant dense<0.000000e+00> : vector<2x32xf32>
    %357 = tpu.matmul %323, %10, %cst_177 {dimension_numbers = #tpu.dot_dimension_numbers<[1], [0], [0], [1], [0, 0, 1, 1], [], []>} : vector<2x32xf32>, vector<32x32xf32>, vector<2x32xf32> -> vector<2x32xf32>
    %358 = arith.addf %356, %357 : vector<2x32xf32>
    %359 = arith.negf %358 : vector<2x32xf32>
    %360 = math.exp %359 : vector<2x32xf32>
    %cst_178 = arith.constant 1.000000e+00 : f32
    %361 = vector.broadcast %cst_178 : f32 to vector<2x32xf32>
    %362 = arith.addf %361, %360 : vector<2x32xf32>
    %363 = arith.divf %361, %362 : vector<2x32xf32>
    %364 = arith.mulf %347, %321 : vector<2x32xf32>
    %365 = arith.mulf %337, %353 : vector<2x32xf32>
    %366 = arith.addf %364, %365 : vector<2x32xf32>
    %367 = math.tanh %366 : vector<2x32xf32>
    %368 = arith.mulf %363, %367 : vector<2x32xf32>
    %369 = arith.index_cast %c7_i32 : i32 to index
    %c0_179 = arith.constant 0 : index
    %c0_180 = arith.constant 0 : index
    %370 = vector.load %arg3[%369, %c0_179, %c0_180] : memref<8x2x32xf32, #tpu.memory_space<vmem>>, vector<1x2x32xf32>
    %371 = vector.shape_cast %370 : vector<1x2x32xf32> to vector<2x32xf32>
    %372 = vector.shape_cast %368 : vector<2x32xf32> to vector<1x2x32xf32>
    tpu.vector_store %arg3[%369, %c0_179, %c0_180], %372 {strides = array<i32>} : memref<8x2x32xf32, #tpu.memory_space<vmem>>, vector<1x2x32xf32>,
    %c8_i32 = arith.constant 8 : i32
    %c0_181 = arith.constant 0 : index
    %c0_182 = arith.constant 0 : index
    %373 = vector.load %arg4[%c0_181, %c0_182] : memref<2x32xf32, #tpu.memory_space<vmem>>, vector<2x32xf32>
    tpu.vector_store %arg4[%c0_181, %c0_182], %368 {strides = array<i32>} : memref<2x32xf32, #tpu.memory_space<vmem>>, vector<2x32xf32>,
    %c0_183 = arith.constant 0 : index
    %c0_184 = arith.constant 0 : index
    %374 = vector.load %arg5[%c0_183, %c0_184] : memref<2x32xf32, #tpu.memory_space<vmem>>, vector<2x32xf32>
    tpu.vector_store %arg5[%c0_183, %c0_184], %366 {strides = array<i32>} : memref<2x32xf32, #tpu.memory_space<vmem>>, vector<2x32xf32>,
    return
  }
  func.func @transform_0(%arg0: i32) -> (i32, i32, i32, i32) {
    %c0_i32 = arith.constant 0 : i32
    %c0_i32_0 = arith.constant 0 : i32
    %c0_i32_1 = arith.constant 0 : i32
    %c0_i32_2 = arith.constant 0 : i32
    return %c0_i32, %arg0, %c0_i32_0, %c0_i32_1 : i32, i32, i32, i32
  }
  func.func @transform_1(%arg0: i32) -> (i32, i32, i32) {
    %c0_i32 = arith.constant 0 : i32
    %c0_i32_0 = arith.constant 0 : i32
    %c0_i32_1 = arith.constant 0 : i32
    %c0_i32_2 = arith.constant 0 : i32
    return %c0_i32, %c0_i32_0, %c0_i32_1 : i32, i32, i32
  }
  func.func @transform_2(%arg0: i32) -> (i32, i32, i32) {
    %c0_i32 = arith.constant 0 : i32
    %c0_i32_0 = arith.constant 0 : i32
    %c0_i32_1 = arith.constant 0 : i32
    return %arg0, %c0_i32, %c0_i32_0 : i32, i32, i32
  }
}

module attributes {stable_mosaic.version = 11 : i64} {
  func.func @_recurrence_kernel(%arg0: i32, %arg1: memref<4x8x2x32xf32, #tpu.memory_space<vmem>>, %arg2: memref<4x32x32xf32, #tpu.memory_space<vmem>>, %arg3: memref<8x2x32xf32, #tpu.memory_space<vmem>>, %arg4: memref<8x2x32xf32, #tpu.memory_space<vmem>>, %arg5: memref<2x32xf32, #tpu.memory_space<vmem>>, %arg6: memref<2x32xf32, #tpu.memory_space<vmem>>) attributes {dimension_semantics = [#tpu.dimension_semantics<arbitrary>], iteration_bounds = array<i64: 1>, scalar_prefetch = 0 : i64, scratch_operands = 2 : i64, tpu.core_type = #tpu.core_type<tc>, window_params = [{transform_indices = @transform_0, window_bounds = array<i64: 4, 8, 2, 32>}, {pipeline_mode = #tpu.pipeline_mode<synchronous>, transform_indices = @transform_1, window_bounds = array<i64: 4, 32, 32>}, {transform_indices = @transform_2, window_bounds = array<i64: 8, 2, 32>}, {transform_indices = @transform_3, window_bounds = array<i64: 8, 2, 32>}]} {
    %c0_i32 = arith.constant 0 : i32
    %0 = arith.cmpi eq, %arg0, %c0_i32 : i32
    %1 = arith.extui %0 : i1 to i32
    %c0_i32_0 = arith.constant 0 : i32
    %2 = arith.cmpi ne, %1, %c0_i32_0 : i32
    scf.if %2 {
      %cst_209 = arith.constant 0.000000e+00 : f32
      %423 = vector.broadcast %cst_209 : f32 to vector<2x32xf32>
      %c0_210 = arith.constant 0 : index
      %c0_211 = arith.constant 0 : index
      %424 = vector.load %arg5[%c0_210, %c0_211] : memref<2x32xf32, #tpu.memory_space<vmem>>, vector<2x32xf32>
      tpu.vector_store %arg5[%c0_210, %c0_211], %423 {strides = array<i32>} : memref<2x32xf32, #tpu.memory_space<vmem>>, vector<2x32xf32>,
      %cst_212 = arith.constant 0.000000e+00 : f32
      %425 = vector.broadcast %cst_212 : f32 to vector<2x32xf32>
      %c0_213 = arith.constant 0 : index
      %c0_214 = arith.constant 0 : index
      %426 = vector.load %arg6[%c0_213, %c0_214] : memref<2x32xf32, #tpu.memory_space<vmem>>, vector<2x32xf32>
      tpu.vector_store %arg6[%c0_213, %c0_214], %425 {strides = array<i32>} : memref<2x32xf32, #tpu.memory_space<vmem>>, vector<2x32xf32>,
    } else {
    }
    %c0 = arith.constant 0 : index
    %c0_1 = arith.constant 0 : index
    %c0_2 = arith.constant 0 : index
    %3 = vector.load %arg2[%c0, %c0_1, %c0_2] : memref<4x32x32xf32, #tpu.memory_space<vmem>>, vector<1x32x32xf32>
    %4 = vector.shape_cast %3 : vector<1x32x32xf32> to vector<32x32xf32>
    %c1 = arith.constant 1 : index
    %c0_3 = arith.constant 0 : index
    %c0_4 = arith.constant 0 : index
    %5 = vector.load %arg2[%c1, %c0_3, %c0_4] : memref<4x32x32xf32, #tpu.memory_space<vmem>>, vector<1x32x32xf32>
    %6 = vector.shape_cast %5 : vector<1x32x32xf32> to vector<32x32xf32>
    %c2 = arith.constant 2 : index
    %c0_5 = arith.constant 0 : index
    %c0_6 = arith.constant 0 : index
    %7 = vector.load %arg2[%c2, %c0_5, %c0_6] : memref<4x32x32xf32, #tpu.memory_space<vmem>>, vector<1x32x32xf32>
    %8 = vector.shape_cast %7 : vector<1x32x32xf32> to vector<32x32xf32>
    %c3 = arith.constant 3 : index
    %c0_7 = arith.constant 0 : index
    %c0_8 = arith.constant 0 : index
    %9 = vector.load %arg2[%c3, %c0_7, %c0_8] : memref<4x32x32xf32, #tpu.memory_space<vmem>>, vector<1x32x32xf32>
    %10 = vector.shape_cast %9 : vector<1x32x32xf32> to vector<32x32xf32>
    %c0_9 = arith.constant 0 : index
    %c0_10 = arith.constant 0 : index
    %11 = vector.load %arg5[%c0_9, %c0_10] : memref<2x32xf32, #tpu.memory_space<vmem>>, vector<2x32xf32>
    %c0_11 = arith.constant 0 : index
    %c0_12 = arith.constant 0 : index
    %12 = vector.load %arg6[%c0_11, %c0_12] : memref<2x32xf32, #tpu.memory_space<vmem>>, vector<2x32xf32>
    %c0_i32_13 = arith.constant 0 : i32
    %c0_14 = arith.constant 0 : index
    %13 = arith.index_cast %c0_i32_13 : i32 to index
    %c0_15 = arith.constant 0 : index
    %c0_16 = arith.constant 0 : index
    %14 = vector.load %arg1[%c0_14, %13, %c0_15, %c0_16] : memref<4x8x2x32xf32, #tpu.memory_space<vmem>>, vector<1x1x2x32xf32>
    %15 = vector.shape_cast %14 : vector<1x1x2x32xf32> to vector<2x32xf32>
    %cst = arith.constant dense<0.000000e+00> : vector<2x32xf32>
    %16 = tpu.matmul %11, %4, %cst {dimension_numbers = #tpu.dot_dimension_numbers<[1], [0], [0], [1], [0, 0, 1, 1], [], []>} : vector<2x32xf32>, vector<32x32xf32>, vector<2x32xf32> -> vector<2x32xf32>
    %17 = arith.addf %15, %16 : vector<2x32xf32>
    %18 = arith.negf %17 : vector<2x32xf32>
    %19 = math.exp %18 : vector<2x32xf32>
    %cst_17 = arith.constant 1.000000e+00 : f32
    %20 = vector.broadcast %cst_17 : f32 to vector<2x32xf32>
    %21 = arith.addf %20, %19 : vector<2x32xf32>
    %22 = arith.divf %20, %21 : vector<2x32xf32>
    %c1_18 = arith.constant 1 : index
    %23 = arith.index_cast %c0_i32_13 : i32 to index
    %c0_19 = arith.constant 0 : index
    %c0_20 = arith.constant 0 : index
    %24 = vector.load %arg1[%c1_18, %23, %c0_19, %c0_20] : memref<4x8x2x32xf32, #tpu.memory_space<vmem>>, vector<1x1x2x32xf32>
    %25 = vector.shape_cast %24 : vector<1x1x2x32xf32> to vector<2x32xf32>
    %cst_21 = arith.constant dense<0.000000e+00> : vector<2x32xf32>
    %26 = tpu.matmul %11, %6, %cst_21 {dimension_numbers = #tpu.dot_dimension_numbers<[1], [0], [0], [1], [0, 0, 1, 1], [], []>} : vector<2x32xf32>, vector<32x32xf32>, vector<2x32xf32> -> vector<2x32xf32>
    %27 = arith.addf %25, %26 : vector<2x32xf32>
    %28 = arith.negf %27 : vector<2x32xf32>
    %29 = math.exp %28 : vector<2x32xf32>
    %cst_22 = arith.constant 1.000000e+00 : f32
    %30 = vector.broadcast %cst_22 : f32 to vector<2x32xf32>
    %31 = arith.addf %30, %29 : vector<2x32xf32>
    %32 = arith.divf %30, %31 : vector<2x32xf32>
    %c2_23 = arith.constant 2 : index
    %33 = arith.index_cast %c0_i32_13 : i32 to index
    %c0_24 = arith.constant 0 : index
    %c0_25 = arith.constant 0 : index
    %34 = vector.load %arg1[%c2_23, %33, %c0_24, %c0_25] : memref<4x8x2x32xf32, #tpu.memory_space<vmem>>, vector<1x1x2x32xf32>
    %35 = vector.shape_cast %34 : vector<1x1x2x32xf32> to vector<2x32xf32>
    %cst_26 = arith.constant dense<0.000000e+00> : vector<2x32xf32>
    %36 = tpu.matmul %11, %8, %cst_26 {dimension_numbers = #tpu.dot_dimension_numbers<[1], [0], [0], [1], [0, 0, 1, 1], [], []>} : vector<2x32xf32>, vector<32x32xf32>, vector<2x32xf32> -> vector<2x32xf32>
    %37 = arith.addf %35, %36 : vector<2x32xf32>
    %38 = math.tanh %37 : vector<2x32xf32>
    %c3_27 = arith.constant 3 : index
    %39 = arith.index_cast %c0_i32_13 : i32 to index
    %c0_28 = arith.constant 0 : index
    %c0_29 = arith.constant 0 : index
    %40 = vector.load %arg1[%c3_27, %39, %c0_28, %c0_29] : memref<4x8x2x32xf32, #tpu.memory_space<vmem>>, vector<1x1x2x32xf32>
    %41 = vector.shape_cast %40 : vector<1x1x2x32xf32> to vector<2x32xf32>
    %cst_30 = arith.constant dense<0.000000e+00> : vector<2x32xf32>
    %42 = tpu.matmul %11, %10, %cst_30 {dimension_numbers = #tpu.dot_dimension_numbers<[1], [0], [0], [1], [0, 0, 1, 1], [], []>} : vector<2x32xf32>, vector<32x32xf32>, vector<2x32xf32> -> vector<2x32xf32>
    %43 = arith.addf %41, %42 : vector<2x32xf32>
    %44 = arith.negf %43 : vector<2x32xf32>
    %45 = math.exp %44 : vector<2x32xf32>
    %cst_31 = arith.constant 1.000000e+00 : f32
    %46 = vector.broadcast %cst_31 : f32 to vector<2x32xf32>
    %47 = arith.addf %46, %45 : vector<2x32xf32>
    %48 = arith.divf %46, %47 : vector<2x32xf32>
    %49 = arith.mulf %32, %12 : vector<2x32xf32>
    %50 = arith.mulf %22, %38 : vector<2x32xf32>
    %51 = arith.addf %49, %50 : vector<2x32xf32>
    %52 = math.tanh %51 : vector<2x32xf32>
    %53 = arith.mulf %48, %52 : vector<2x32xf32>
    %54 = arith.index_cast %c0_i32_13 : i32 to index
    %c0_32 = arith.constant 0 : index
    %c0_33 = arith.constant 0 : index
    %55 = vector.load %arg3[%54, %c0_32, %c0_33] : memref<8x2x32xf32, #tpu.memory_space<vmem>>, vector<1x2x32xf32>
    %56 = vector.shape_cast %55 : vector<1x2x32xf32> to vector<2x32xf32>
    %57 = arith.addf %53, %56 : vector<2x32xf32>
    %cst_34 = arith.constant 0.000000e+00 : f32
    %58 = vector.broadcast %cst_34 : f32 to vector<2x32xf32>
    %59 = arith.maximumf %57, %58 : vector<2x32xf32>
    %60 = arith.index_cast %c0_i32_13 : i32 to index
    %c0_35 = arith.constant 0 : index
    %c0_36 = arith.constant 0 : index
    %61 = vector.load %arg4[%60, %c0_35, %c0_36] : memref<8x2x32xf32, #tpu.memory_space<vmem>>, vector<1x2x32xf32>
    %62 = vector.shape_cast %61 : vector<1x2x32xf32> to vector<2x32xf32>
    %63 = vector.shape_cast %59 : vector<2x32xf32> to vector<1x2x32xf32>
    tpu.vector_store %arg4[%60, %c0_35, %c0_36], %63 {strides = array<i32>} : memref<8x2x32xf32, #tpu.memory_space<vmem>>, vector<1x2x32xf32>,
    %c1_i32 = arith.constant 1 : i32
    %c0_37 = arith.constant 0 : index
    %64 = arith.index_cast %c1_i32 : i32 to index
    %c0_38 = arith.constant 0 : index
    %c0_39 = arith.constant 0 : index
    %65 = vector.load %arg1[%c0_37, %64, %c0_38, %c0_39] : memref<4x8x2x32xf32, #tpu.memory_space<vmem>>, vector<1x1x2x32xf32>
    %66 = vector.shape_cast %65 : vector<1x1x2x32xf32> to vector<2x32xf32>
    %cst_40 = arith.constant dense<0.000000e+00> : vector<2x32xf32>
    %67 = tpu.matmul %53, %4, %cst_40 {dimension_numbers = #tpu.dot_dimension_numbers<[1], [0], [0], [1], [0, 0, 1, 1], [], []>} : vector<2x32xf32>, vector<32x32xf32>, vector<2x32xf32> -> vector<2x32xf32>
    %68 = arith.addf %66, %67 : vector<2x32xf32>
    %69 = arith.negf %68 : vector<2x32xf32>
    %70 = math.exp %69 : vector<2x32xf32>
    %cst_41 = arith.constant 1.000000e+00 : f32
    %71 = vector.broadcast %cst_41 : f32 to vector<2x32xf32>
    %72 = arith.addf %71, %70 : vector<2x32xf32>
    %73 = arith.divf %71, %72 : vector<2x32xf32>
    %c1_42 = arith.constant 1 : index
    %74 = arith.index_cast %c1_i32 : i32 to index
    %c0_43 = arith.constant 0 : index
    %c0_44 = arith.constant 0 : index
    %75 = vector.load %arg1[%c1_42, %74, %c0_43, %c0_44] : memref<4x8x2x32xf32, #tpu.memory_space<vmem>>, vector<1x1x2x32xf32>
    %76 = vector.shape_cast %75 : vector<1x1x2x32xf32> to vector<2x32xf32>
    %cst_45 = arith.constant dense<0.000000e+00> : vector<2x32xf32>
    %77 = tpu.matmul %53, %6, %cst_45 {dimension_numbers = #tpu.dot_dimension_numbers<[1], [0], [0], [1], [0, 0, 1, 1], [], []>} : vector<2x32xf32>, vector<32x32xf32>, vector<2x32xf32> -> vector<2x32xf32>
    %78 = arith.addf %76, %77 : vector<2x32xf32>
    %79 = arith.negf %78 : vector<2x32xf32>
    %80 = math.exp %79 : vector<2x32xf32>
    %cst_46 = arith.constant 1.000000e+00 : f32
    %81 = vector.broadcast %cst_46 : f32 to vector<2x32xf32>
    %82 = arith.addf %81, %80 : vector<2x32xf32>
    %83 = arith.divf %81, %82 : vector<2x32xf32>
    %c2_47 = arith.constant 2 : index
    %84 = arith.index_cast %c1_i32 : i32 to index
    %c0_48 = arith.constant 0 : index
    %c0_49 = arith.constant 0 : index
    %85 = vector.load %arg1[%c2_47, %84, %c0_48, %c0_49] : memref<4x8x2x32xf32, #tpu.memory_space<vmem>>, vector<1x1x2x32xf32>
    %86 = vector.shape_cast %85 : vector<1x1x2x32xf32> to vector<2x32xf32>
    %cst_50 = arith.constant dense<0.000000e+00> : vector<2x32xf32>
    %87 = tpu.matmul %53, %8, %cst_50 {dimension_numbers = #tpu.dot_dimension_numbers<[1], [0], [0], [1], [0, 0, 1, 1], [], []>} : vector<2x32xf32>, vector<32x32xf32>, vector<2x32xf32> -> vector<2x32xf32>
    %88 = arith.addf %86, %87 : vector<2x32xf32>
    %89 = math.tanh %88 : vector<2x32xf32>
    %c3_51 = arith.constant 3 : index
    %90 = arith.index_cast %c1_i32 : i32 to index
    %c0_52 = arith.constant 0 : index
    %c0_53 = arith.constant 0 : index
    %91 = vector.load %arg1[%c3_51, %90, %c0_52, %c0_53] : memref<4x8x2x32xf32, #tpu.memory_space<vmem>>, vector<1x1x2x32xf32>
    %92 = vector.shape_cast %91 : vector<1x1x2x32xf32> to vector<2x32xf32>
    %cst_54 = arith.constant dense<0.000000e+00> : vector<2x32xf32>
    %93 = tpu.matmul %53, %10, %cst_54 {dimension_numbers = #tpu.dot_dimension_numbers<[1], [0], [0], [1], [0, 0, 1, 1], [], []>} : vector<2x32xf32>, vector<32x32xf32>, vector<2x32xf32> -> vector<2x32xf32>
    %94 = arith.addf %92, %93 : vector<2x32xf32>
    %95 = arith.negf %94 : vector<2x32xf32>
    %96 = math.exp %95 : vector<2x32xf32>
    %cst_55 = arith.constant 1.000000e+00 : f32
    %97 = vector.broadcast %cst_55 : f32 to vector<2x32xf32>
    %98 = arith.addf %97, %96 : vector<2x32xf32>
    %99 = arith.divf %97, %98 : vector<2x32xf32>
    %100 = arith.mulf %83, %51 : vector<2x32xf32>
    %101 = arith.mulf %73, %89 : vector<2x32xf32>
    %102 = arith.addf %100, %101 : vector<2x32xf32>
    %103 = math.tanh %102 : vector<2x32xf32>
    %104 = arith.mulf %99, %103 : vector<2x32xf32>
    %105 = arith.index_cast %c1_i32 : i32 to index
    %c0_56 = arith.constant 0 : index
    %c0_57 = arith.constant 0 : index
    %106 = vector.load %arg3[%105, %c0_56, %c0_57] : memref<8x2x32xf32, #tpu.memory_space<vmem>>, vector<1x2x32xf32>
    %107 = vector.shape_cast %106 : vector<1x2x32xf32> to vector<2x32xf32>
    %108 = arith.addf %104, %107 : vector<2x32xf32>
    %cst_58 = arith.constant 0.000000e+00 : f32
    %109 = vector.broadcast %cst_58 : f32 to vector<2x32xf32>
    %110 = arith.maximumf %108, %109 : vector<2x32xf32>
    %111 = arith.index_cast %c1_i32 : i32 to index
    %c0_59 = arith.constant 0 : index
    %c0_60 = arith.constant 0 : index
    %112 = vector.load %arg4[%111, %c0_59, %c0_60] : memref<8x2x32xf32, #tpu.memory_space<vmem>>, vector<1x2x32xf32>
    %113 = vector.shape_cast %112 : vector<1x2x32xf32> to vector<2x32xf32>
    %114 = vector.shape_cast %110 : vector<2x32xf32> to vector<1x2x32xf32>
    tpu.vector_store %arg4[%111, %c0_59, %c0_60], %114 {strides = array<i32>} : memref<8x2x32xf32, #tpu.memory_space<vmem>>, vector<1x2x32xf32>,
    %c2_i32 = arith.constant 2 : i32
    %c0_61 = arith.constant 0 : index
    %115 = arith.index_cast %c2_i32 : i32 to index
    %c0_62 = arith.constant 0 : index
    %c0_63 = arith.constant 0 : index
    %116 = vector.load %arg1[%c0_61, %115, %c0_62, %c0_63] : memref<4x8x2x32xf32, #tpu.memory_space<vmem>>, vector<1x1x2x32xf32>
    %117 = vector.shape_cast %116 : vector<1x1x2x32xf32> to vector<2x32xf32>
    %cst_64 = arith.constant dense<0.000000e+00> : vector<2x32xf32>
    %118 = tpu.matmul %104, %4, %cst_64 {dimension_numbers = #tpu.dot_dimension_numbers<[1], [0], [0], [1], [0, 0, 1, 1], [], []>} : vector<2x32xf32>, vector<32x32xf32>, vector<2x32xf32> -> vector<2x32xf32>
    %119 = arith.addf %117, %118 : vector<2x32xf32>
    %120 = arith.negf %119 : vector<2x32xf32>
    %121 = math.exp %120 : vector<2x32xf32>
    %cst_65 = arith.constant 1.000000e+00 : f32
    %122 = vector.broadcast %cst_65 : f32 to vector<2x32xf32>
    %123 = arith.addf %122, %121 : vector<2x32xf32>
    %124 = arith.divf %122, %123 : vector<2x32xf32>
    %c1_66 = arith.constant 1 : index
    %125 = arith.index_cast %c2_i32 : i32 to index
    %c0_67 = arith.constant 0 : index
    %c0_68 = arith.constant 0 : index
    %126 = vector.load %arg1[%c1_66, %125, %c0_67, %c0_68] : memref<4x8x2x32xf32, #tpu.memory_space<vmem>>, vector<1x1x2x32xf32>
    %127 = vector.shape_cast %126 : vector<1x1x2x32xf32> to vector<2x32xf32>
    %cst_69 = arith.constant dense<0.000000e+00> : vector<2x32xf32>
    %128 = tpu.matmul %104, %6, %cst_69 {dimension_numbers = #tpu.dot_dimension_numbers<[1], [0], [0], [1], [0, 0, 1, 1], [], []>} : vector<2x32xf32>, vector<32x32xf32>, vector<2x32xf32> -> vector<2x32xf32>
    %129 = arith.addf %127, %128 : vector<2x32xf32>
    %130 = arith.negf %129 : vector<2x32xf32>
    %131 = math.exp %130 : vector<2x32xf32>
    %cst_70 = arith.constant 1.000000e+00 : f32
    %132 = vector.broadcast %cst_70 : f32 to vector<2x32xf32>
    %133 = arith.addf %132, %131 : vector<2x32xf32>
    %134 = arith.divf %132, %133 : vector<2x32xf32>
    %c2_71 = arith.constant 2 : index
    %135 = arith.index_cast %c2_i32 : i32 to index
    %c0_72 = arith.constant 0 : index
    %c0_73 = arith.constant 0 : index
    %136 = vector.load %arg1[%c2_71, %135, %c0_72, %c0_73] : memref<4x8x2x32xf32, #tpu.memory_space<vmem>>, vector<1x1x2x32xf32>
    %137 = vector.shape_cast %136 : vector<1x1x2x32xf32> to vector<2x32xf32>
    %cst_74 = arith.constant dense<0.000000e+00> : vector<2x32xf32>
    %138 = tpu.matmul %104, %8, %cst_74 {dimension_numbers = #tpu.dot_dimension_numbers<[1], [0], [0], [1], [0, 0, 1, 1], [], []>} : vector<2x32xf32>, vector<32x32xf32>, vector<2x32xf32> -> vector<2x32xf32>
    %139 = arith.addf %137, %138 : vector<2x32xf32>
    %140 = math.tanh %139 : vector<2x32xf32>
    %c3_75 = arith.constant 3 : index
    %141 = arith.index_cast %c2_i32 : i32 to index
    %c0_76 = arith.constant 0 : index
    %c0_77 = arith.constant 0 : index
    %142 = vector.load %arg1[%c3_75, %141, %c0_76, %c0_77] : memref<4x8x2x32xf32, #tpu.memory_space<vmem>>, vector<1x1x2x32xf32>
    %143 = vector.shape_cast %142 : vector<1x1x2x32xf32> to vector<2x32xf32>
    %cst_78 = arith.constant dense<0.000000e+00> : vector<2x32xf32>
    %144 = tpu.matmul %104, %10, %cst_78 {dimension_numbers = #tpu.dot_dimension_numbers<[1], [0], [0], [1], [0, 0, 1, 1], [], []>} : vector<2x32xf32>, vector<32x32xf32>, vector<2x32xf32> -> vector<2x32xf32>
    %145 = arith.addf %143, %144 : vector<2x32xf32>
    %146 = arith.negf %145 : vector<2x32xf32>
    %147 = math.exp %146 : vector<2x32xf32>
    %cst_79 = arith.constant 1.000000e+00 : f32
    %148 = vector.broadcast %cst_79 : f32 to vector<2x32xf32>
    %149 = arith.addf %148, %147 : vector<2x32xf32>
    %150 = arith.divf %148, %149 : vector<2x32xf32>
    %151 = arith.mulf %134, %102 : vector<2x32xf32>
    %152 = arith.mulf %124, %140 : vector<2x32xf32>
    %153 = arith.addf %151, %152 : vector<2x32xf32>
    %154 = math.tanh %153 : vector<2x32xf32>
    %155 = arith.mulf %150, %154 : vector<2x32xf32>
    %156 = arith.index_cast %c2_i32 : i32 to index
    %c0_80 = arith.constant 0 : index
    %c0_81 = arith.constant 0 : index
    %157 = vector.load %arg3[%156, %c0_80, %c0_81] : memref<8x2x32xf32, #tpu.memory_space<vmem>>, vector<1x2x32xf32>
    %158 = vector.shape_cast %157 : vector<1x2x32xf32> to vector<2x32xf32>
    %159 = arith.addf %155, %158 : vector<2x32xf32>
    %cst_82 = arith.constant 0.000000e+00 : f32
    %160 = vector.broadcast %cst_82 : f32 to vector<2x32xf32>
    %161 = arith.maximumf %159, %160 : vector<2x32xf32>
    %162 = arith.index_cast %c2_i32 : i32 to index
    %c0_83 = arith.constant 0 : index
    %c0_84 = arith.constant 0 : index
    %163 = vector.load %arg4[%162, %c0_83, %c0_84] : memref<8x2x32xf32, #tpu.memory_space<vmem>>, vector<1x2x32xf32>
    %164 = vector.shape_cast %163 : vector<1x2x32xf32> to vector<2x32xf32>
    %165 = vector.shape_cast %161 : vector<2x32xf32> to vector<1x2x32xf32>
    tpu.vector_store %arg4[%162, %c0_83, %c0_84], %165 {strides = array<i32>} : memref<8x2x32xf32, #tpu.memory_space<vmem>>, vector<1x2x32xf32>,
    %c3_i32 = arith.constant 3 : i32
    %c0_85 = arith.constant 0 : index
    %166 = arith.index_cast %c3_i32 : i32 to index
    %c0_86 = arith.constant 0 : index
    %c0_87 = arith.constant 0 : index
    %167 = vector.load %arg1[%c0_85, %166, %c0_86, %c0_87] : memref<4x8x2x32xf32, #tpu.memory_space<vmem>>, vector<1x1x2x32xf32>
    %168 = vector.shape_cast %167 : vector<1x1x2x32xf32> to vector<2x32xf32>
    %cst_88 = arith.constant dense<0.000000e+00> : vector<2x32xf32>
    %169 = tpu.matmul %155, %4, %cst_88 {dimension_numbers = #tpu.dot_dimension_numbers<[1], [0], [0], [1], [0, 0, 1, 1], [], []>} : vector<2x32xf32>, vector<32x32xf32>, vector<2x32xf32> -> vector<2x32xf32>
    %170 = arith.addf %168, %169 : vector<2x32xf32>
    %171 = arith.negf %170 : vector<2x32xf32>
    %172 = math.exp %171 : vector<2x32xf32>
    %cst_89 = arith.constant 1.000000e+00 : f32
    %173 = vector.broadcast %cst_89 : f32 to vector<2x32xf32>
    %174 = arith.addf %173, %172 : vector<2x32xf32>
    %175 = arith.divf %173, %174 : vector<2x32xf32>
    %c1_90 = arith.constant 1 : index
    %176 = arith.index_cast %c3_i32 : i32 to index
    %c0_91 = arith.constant 0 : index
    %c0_92 = arith.constant 0 : index
    %177 = vector.load %arg1[%c1_90, %176, %c0_91, %c0_92] : memref<4x8x2x32xf32, #tpu.memory_space<vmem>>, vector<1x1x2x32xf32>
    %178 = vector.shape_cast %177 : vector<1x1x2x32xf32> to vector<2x32xf32>
    %cst_93 = arith.constant dense<0.000000e+00> : vector<2x32xf32>
    %179 = tpu.matmul %155, %6, %cst_93 {dimension_numbers = #tpu.dot_dimension_numbers<[1], [0], [0], [1], [0, 0, 1, 1], [], []>} : vector<2x32xf32>, vector<32x32xf32>, vector<2x32xf32> -> vector<2x32xf32>
    %180 = arith.addf %178, %179 : vector<2x32xf32>
    %181 = arith.negf %180 : vector<2x32xf32>
    %182 = math.exp %181 : vector<2x32xf32>
    %cst_94 = arith.constant 1.000000e+00 : f32
    %183 = vector.broadcast %cst_94 : f32 to vector<2x32xf32>
    %184 = arith.addf %183, %182 : vector<2x32xf32>
    %185 = arith.divf %183, %184 : vector<2x32xf32>
    %c2_95 = arith.constant 2 : index
    %186 = arith.index_cast %c3_i32 : i32 to index
    %c0_96 = arith.constant 0 : index
    %c0_97 = arith.constant 0 : index
    %187 = vector.load %arg1[%c2_95, %186, %c0_96, %c0_97] : memref<4x8x2x32xf32, #tpu.memory_space<vmem>>, vector<1x1x2x32xf32>
    %188 = vector.shape_cast %187 : vector<1x1x2x32xf32> to vector<2x32xf32>
    %cst_98 = arith.constant dense<0.000000e+00> : vector<2x32xf32>
    %189 = tpu.matmul %155, %8, %cst_98 {dimension_numbers = #tpu.dot_dimension_numbers<[1], [0], [0], [1], [0, 0, 1, 1], [], []>} : vector<2x32xf32>, vector<32x32xf32>, vector<2x32xf32> -> vector<2x32xf32>
    %190 = arith.addf %188, %189 : vector<2x32xf32>
    %191 = math.tanh %190 : vector<2x32xf32>
    %c3_99 = arith.constant 3 : index
    %192 = arith.index_cast %c3_i32 : i32 to index
    %c0_100 = arith.constant 0 : index
    %c0_101 = arith.constant 0 : index
    %193 = vector.load %arg1[%c3_99, %192, %c0_100, %c0_101] : memref<4x8x2x32xf32, #tpu.memory_space<vmem>>, vector<1x1x2x32xf32>
    %194 = vector.shape_cast %193 : vector<1x1x2x32xf32> to vector<2x32xf32>
    %cst_102 = arith.constant dense<0.000000e+00> : vector<2x32xf32>
    %195 = tpu.matmul %155, %10, %cst_102 {dimension_numbers = #tpu.dot_dimension_numbers<[1], [0], [0], [1], [0, 0, 1, 1], [], []>} : vector<2x32xf32>, vector<32x32xf32>, vector<2x32xf32> -> vector<2x32xf32>
    %196 = arith.addf %194, %195 : vector<2x32xf32>
    %197 = arith.negf %196 : vector<2x32xf32>
    %198 = math.exp %197 : vector<2x32xf32>
    %cst_103 = arith.constant 1.000000e+00 : f32
    %199 = vector.broadcast %cst_103 : f32 to vector<2x32xf32>
    %200 = arith.addf %199, %198 : vector<2x32xf32>
    %201 = arith.divf %199, %200 : vector<2x32xf32>
    %202 = arith.mulf %185, %153 : vector<2x32xf32>
    %203 = arith.mulf %175, %191 : vector<2x32xf32>
    %204 = arith.addf %202, %203 : vector<2x32xf32>
    %205 = math.tanh %204 : vector<2x32xf32>
    %206 = arith.mulf %201, %205 : vector<2x32xf32>
    %207 = arith.index_cast %c3_i32 : i32 to index
    %c0_104 = arith.constant 0 : index
    %c0_105 = arith.constant 0 : index
    %208 = vector.load %arg3[%207, %c0_104, %c0_105] : memref<8x2x32xf32, #tpu.memory_space<vmem>>, vector<1x2x32xf32>
    %209 = vector.shape_cast %208 : vector<1x2x32xf32> to vector<2x32xf32>
    %210 = arith.addf %206, %209 : vector<2x32xf32>
    %cst_106 = arith.constant 0.000000e+00 : f32
    %211 = vector.broadcast %cst_106 : f32 to vector<2x32xf32>
    %212 = arith.maximumf %210, %211 : vector<2x32xf32>
    %213 = arith.index_cast %c3_i32 : i32 to index
    %c0_107 = arith.constant 0 : index
    %c0_108 = arith.constant 0 : index
    %214 = vector.load %arg4[%213, %c0_107, %c0_108] : memref<8x2x32xf32, #tpu.memory_space<vmem>>, vector<1x2x32xf32>
    %215 = vector.shape_cast %214 : vector<1x2x32xf32> to vector<2x32xf32>
    %216 = vector.shape_cast %212 : vector<2x32xf32> to vector<1x2x32xf32>
    tpu.vector_store %arg4[%213, %c0_107, %c0_108], %216 {strides = array<i32>} : memref<8x2x32xf32, #tpu.memory_space<vmem>>, vector<1x2x32xf32>,
    %c4_i32 = arith.constant 4 : i32
    %c0_109 = arith.constant 0 : index
    %217 = arith.index_cast %c4_i32 : i32 to index
    %c0_110 = arith.constant 0 : index
    %c0_111 = arith.constant 0 : index
    %218 = vector.load %arg1[%c0_109, %217, %c0_110, %c0_111] : memref<4x8x2x32xf32, #tpu.memory_space<vmem>>, vector<1x1x2x32xf32>
    %219 = vector.shape_cast %218 : vector<1x1x2x32xf32> to vector<2x32xf32>
    %cst_112 = arith.constant dense<0.000000e+00> : vector<2x32xf32>
    %220 = tpu.matmul %206, %4, %cst_112 {dimension_numbers = #tpu.dot_dimension_numbers<[1], [0], [0], [1], [0, 0, 1, 1], [], []>} : vector<2x32xf32>, vector<32x32xf32>, vector<2x32xf32> -> vector<2x32xf32>
    %221 = arith.addf %219, %220 : vector<2x32xf32>
    %222 = arith.negf %221 : vector<2x32xf32>
    %223 = math.exp %222 : vector<2x32xf32>
    %cst_113 = arith.constant 1.000000e+00 : f32
    %224 = vector.broadcast %cst_113 : f32 to vector<2x32xf32>
    %225 = arith.addf %224, %223 : vector<2x32xf32>
    %226 = arith.divf %224, %225 : vector<2x32xf32>
    %c1_114 = arith.constant 1 : index
    %227 = arith.index_cast %c4_i32 : i32 to index
    %c0_115 = arith.constant 0 : index
    %c0_116 = arith.constant 0 : index
    %228 = vector.load %arg1[%c1_114, %227, %c0_115, %c0_116] : memref<4x8x2x32xf32, #tpu.memory_space<vmem>>, vector<1x1x2x32xf32>
    %229 = vector.shape_cast %228 : vector<1x1x2x32xf32> to vector<2x32xf32>
    %cst_117 = arith.constant dense<0.000000e+00> : vector<2x32xf32>
    %230 = tpu.matmul %206, %6, %cst_117 {dimension_numbers = #tpu.dot_dimension_numbers<[1], [0], [0], [1], [0, 0, 1, 1], [], []>} : vector<2x32xf32>, vector<32x32xf32>, vector<2x32xf32> -> vector<2x32xf32>
    %231 = arith.addf %229, %230 : vector<2x32xf32>
    %232 = arith.negf %231 : vector<2x32xf32>
    %233 = math.exp %232 : vector<2x32xf32>
    %cst_118 = arith.constant 1.000000e+00 : f32
    %234 = vector.broadcast %cst_118 : f32 to vector<2x32xf32>
    %235 = arith.addf %234, %233 : vector<2x32xf32>
    %236 = arith.divf %234, %235 : vector<2x32xf32>
    %c2_119 = arith.constant 2 : index
    %237 = arith.index_cast %c4_i32 : i32 to index
    %c0_120 = arith.constant 0 : index
    %c0_121 = arith.constant 0 : index
    %238 = vector.load %arg1[%c2_119, %237, %c0_120, %c0_121] : memref<4x8x2x32xf32, #tpu.memory_space<vmem>>, vector<1x1x2x32xf32>
    %239 = vector.shape_cast %238 : vector<1x1x2x32xf32> to vector<2x32xf32>
    %cst_122 = arith.constant dense<0.000000e+00> : vector<2x32xf32>
    %240 = tpu.matmul %206, %8, %cst_122 {dimension_numbers = #tpu.dot_dimension_numbers<[1], [0], [0], [1], [0, 0, 1, 1], [], []>} : vector<2x32xf32>, vector<32x32xf32>, vector<2x32xf32> -> vector<2x32xf32>
    %241 = arith.addf %239, %240 : vector<2x32xf32>
    %242 = math.tanh %241 : vector<2x32xf32>
    %c3_123 = arith.constant 3 : index
    %243 = arith.index_cast %c4_i32 : i32 to index
    %c0_124 = arith.constant 0 : index
    %c0_125 = arith.constant 0 : index
    %244 = vector.load %arg1[%c3_123, %243, %c0_124, %c0_125] : memref<4x8x2x32xf32, #tpu.memory_space<vmem>>, vector<1x1x2x32xf32>
    %245 = vector.shape_cast %244 : vector<1x1x2x32xf32> to vector<2x32xf32>
    %cst_126 = arith.constant dense<0.000000e+00> : vector<2x32xf32>
    %246 = tpu.matmul %206, %10, %cst_126 {dimension_numbers = #tpu.dot_dimension_numbers<[1], [0], [0], [1], [0, 0, 1, 1], [], []>} : vector<2x32xf32>, vector<32x32xf32>, vector<2x32xf32> -> vector<2x32xf32>
    %247 = arith.addf %245, %246 : vector<2x32xf32>
    %248 = arith.negf %247 : vector<2x32xf32>
    %249 = math.exp %248 : vector<2x32xf32>
    %cst_127 = arith.constant 1.000000e+00 : f32
    %250 = vector.broadcast %cst_127 : f32 to vector<2x32xf32>
    %251 = arith.addf %250, %249 : vector<2x32xf32>
    %252 = arith.divf %250, %251 : vector<2x32xf32>
    %253 = arith.mulf %236, %204 : vector<2x32xf32>
    %254 = arith.mulf %226, %242 : vector<2x32xf32>
    %255 = arith.addf %253, %254 : vector<2x32xf32>
    %256 = math.tanh %255 : vector<2x32xf32>
    %257 = arith.mulf %252, %256 : vector<2x32xf32>
    %258 = arith.index_cast %c4_i32 : i32 to index
    %c0_128 = arith.constant 0 : index
    %c0_129 = arith.constant 0 : index
    %259 = vector.load %arg3[%258, %c0_128, %c0_129] : memref<8x2x32xf32, #tpu.memory_space<vmem>>, vector<1x2x32xf32>
    %260 = vector.shape_cast %259 : vector<1x2x32xf32> to vector<2x32xf32>
    %261 = arith.addf %257, %260 : vector<2x32xf32>
    %cst_130 = arith.constant 0.000000e+00 : f32
    %262 = vector.broadcast %cst_130 : f32 to vector<2x32xf32>
    %263 = arith.maximumf %261, %262 : vector<2x32xf32>
    %264 = arith.index_cast %c4_i32 : i32 to index
    %c0_131 = arith.constant 0 : index
    %c0_132 = arith.constant 0 : index
    %265 = vector.load %arg4[%264, %c0_131, %c0_132] : memref<8x2x32xf32, #tpu.memory_space<vmem>>, vector<1x2x32xf32>
    %266 = vector.shape_cast %265 : vector<1x2x32xf32> to vector<2x32xf32>
    %267 = vector.shape_cast %263 : vector<2x32xf32> to vector<1x2x32xf32>
    tpu.vector_store %arg4[%264, %c0_131, %c0_132], %267 {strides = array<i32>} : memref<8x2x32xf32, #tpu.memory_space<vmem>>, vector<1x2x32xf32>,
    %c5_i32 = arith.constant 5 : i32
    %c0_133 = arith.constant 0 : index
    %268 = arith.index_cast %c5_i32 : i32 to index
    %c0_134 = arith.constant 0 : index
    %c0_135 = arith.constant 0 : index
    %269 = vector.load %arg1[%c0_133, %268, %c0_134, %c0_135] : memref<4x8x2x32xf32, #tpu.memory_space<vmem>>, vector<1x1x2x32xf32>
    %270 = vector.shape_cast %269 : vector<1x1x2x32xf32> to vector<2x32xf32>
    %cst_136 = arith.constant dense<0.000000e+00> : vector<2x32xf32>
    %271 = tpu.matmul %257, %4, %cst_136 {dimension_numbers = #tpu.dot_dimension_numbers<[1], [0], [0], [1], [0, 0, 1, 1], [], []>} : vector<2x32xf32>, vector<32x32xf32>, vector<2x32xf32> -> vector<2x32xf32>
    %272 = arith.addf %270, %271 : vector<2x32xf32>
    %273 = arith.negf %272 : vector<2x32xf32>
    %274 = math.exp %273 : vector<2x32xf32>
    %cst_137 = arith.constant 1.000000e+00 : f32
    %275 = vector.broadcast %cst_137 : f32 to vector<2x32xf32>
    %276 = arith.addf %275, %274 : vector<2x32xf32>
    %277 = arith.divf %275, %276 : vector<2x32xf32>
    %c1_138 = arith.constant 1 : index
    %278 = arith.index_cast %c5_i32 : i32 to index
    %c0_139 = arith.constant 0 : index
    %c0_140 = arith.constant 0 : index
    %279 = vector.load %arg1[%c1_138, %278, %c0_139, %c0_140] : memref<4x8x2x32xf32, #tpu.memory_space<vmem>>, vector<1x1x2x32xf32>
    %280 = vector.shape_cast %279 : vector<1x1x2x32xf32> to vector<2x32xf32>
    %cst_141 = arith.constant dense<0.000000e+00> : vector<2x32xf32>
    %281 = tpu.matmul %257, %6, %cst_141 {dimension_numbers = #tpu.dot_dimension_numbers<[1], [0], [0], [1], [0, 0, 1, 1], [], []>} : vector<2x32xf32>, vector<32x32xf32>, vector<2x32xf32> -> vector<2x32xf32>
    %282 = arith.addf %280, %281 : vector<2x32xf32>
    %283 = arith.negf %282 : vector<2x32xf32>
    %284 = math.exp %283 : vector<2x32xf32>
    %cst_142 = arith.constant 1.000000e+00 : f32
    %285 = vector.broadcast %cst_142 : f32 to vector<2x32xf32>
    %286 = arith.addf %285, %284 : vector<2x32xf32>
    %287 = arith.divf %285, %286 : vector<2x32xf32>
    %c2_143 = arith.constant 2 : index
    %288 = arith.index_cast %c5_i32 : i32 to index
    %c0_144 = arith.constant 0 : index
    %c0_145 = arith.constant 0 : index
    %289 = vector.load %arg1[%c2_143, %288, %c0_144, %c0_145] : memref<4x8x2x32xf32, #tpu.memory_space<vmem>>, vector<1x1x2x32xf32>
    %290 = vector.shape_cast %289 : vector<1x1x2x32xf32> to vector<2x32xf32>
    %cst_146 = arith.constant dense<0.000000e+00> : vector<2x32xf32>
    %291 = tpu.matmul %257, %8, %cst_146 {dimension_numbers = #tpu.dot_dimension_numbers<[1], [0], [0], [1], [0, 0, 1, 1], [], []>} : vector<2x32xf32>, vector<32x32xf32>, vector<2x32xf32> -> vector<2x32xf32>
    %292 = arith.addf %290, %291 : vector<2x32xf32>
    %293 = math.tanh %292 : vector<2x32xf32>
    %c3_147 = arith.constant 3 : index
    %294 = arith.index_cast %c5_i32 : i32 to index
    %c0_148 = arith.constant 0 : index
    %c0_149 = arith.constant 0 : index
    %295 = vector.load %arg1[%c3_147, %294, %c0_148, %c0_149] : memref<4x8x2x32xf32, #tpu.memory_space<vmem>>, vector<1x1x2x32xf32>
    %296 = vector.shape_cast %295 : vector<1x1x2x32xf32> to vector<2x32xf32>
    %cst_150 = arith.constant dense<0.000000e+00> : vector<2x32xf32>
    %297 = tpu.matmul %257, %10, %cst_150 {dimension_numbers = #tpu.dot_dimension_numbers<[1], [0], [0], [1], [0, 0, 1, 1], [], []>} : vector<2x32xf32>, vector<32x32xf32>, vector<2x32xf32> -> vector<2x32xf32>
    %298 = arith.addf %296, %297 : vector<2x32xf32>
    %299 = arith.negf %298 : vector<2x32xf32>
    %300 = math.exp %299 : vector<2x32xf32>
    %cst_151 = arith.constant 1.000000e+00 : f32
    %301 = vector.broadcast %cst_151 : f32 to vector<2x32xf32>
    %302 = arith.addf %301, %300 : vector<2x32xf32>
    %303 = arith.divf %301, %302 : vector<2x32xf32>
    %304 = arith.mulf %287, %255 : vector<2x32xf32>
    %305 = arith.mulf %277, %293 : vector<2x32xf32>
    %306 = arith.addf %304, %305 : vector<2x32xf32>
    %307 = math.tanh %306 : vector<2x32xf32>
    %308 = arith.mulf %303, %307 : vector<2x32xf32>
    %309 = arith.index_cast %c5_i32 : i32 to index
    %c0_152 = arith.constant 0 : index
    %c0_153 = arith.constant 0 : index
    %310 = vector.load %arg3[%309, %c0_152, %c0_153] : memref<8x2x32xf32, #tpu.memory_space<vmem>>, vector<1x2x32xf32>
    %311 = vector.shape_cast %310 : vector<1x2x32xf32> to vector<2x32xf32>
    %312 = arith.addf %308, %311 : vector<2x32xf32>
    %cst_154 = arith.constant 0.000000e+00 : f32
    %313 = vector.broadcast %cst_154 : f32 to vector<2x32xf32>
    %314 = arith.maximumf %312, %313 : vector<2x32xf32>
    %315 = arith.index_cast %c5_i32 : i32 to index
    %c0_155 = arith.constant 0 : index
    %c0_156 = arith.constant 0 : index
    %316 = vector.load %arg4[%315, %c0_155, %c0_156] : memref<8x2x32xf32, #tpu.memory_space<vmem>>, vector<1x2x32xf32>
    %317 = vector.shape_cast %316 : vector<1x2x32xf32> to vector<2x32xf32>
    %318 = vector.shape_cast %314 : vector<2x32xf32> to vector<1x2x32xf32>
    tpu.vector_store %arg4[%315, %c0_155, %c0_156], %318 {strides = array<i32>} : memref<8x2x32xf32, #tpu.memory_space<vmem>>, vector<1x2x32xf32>,
    %c6_i32 = arith.constant 6 : i32
    %c0_157 = arith.constant 0 : index
    %319 = arith.index_cast %c6_i32 : i32 to index
    %c0_158 = arith.constant 0 : index
    %c0_159 = arith.constant 0 : index
    %320 = vector.load %arg1[%c0_157, %319, %c0_158, %c0_159] : memref<4x8x2x32xf32, #tpu.memory_space<vmem>>, vector<1x1x2x32xf32>
    %321 = vector.shape_cast %320 : vector<1x1x2x32xf32> to vector<2x32xf32>
    %cst_160 = arith.constant dense<0.000000e+00> : vector<2x32xf32>
    %322 = tpu.matmul %308, %4, %cst_160 {dimension_numbers = #tpu.dot_dimension_numbers<[1], [0], [0], [1], [0, 0, 1, 1], [], []>} : vector<2x32xf32>, vector<32x32xf32>, vector<2x32xf32> -> vector<2x32xf32>
    %323 = arith.addf %321, %322 : vector<2x32xf32>
    %324 = arith.negf %323 : vector<2x32xf32>
    %325 = math.exp %324 : vector<2x32xf32>
    %cst_161 = arith.constant 1.000000e+00 : f32
    %326 = vector.broadcast %cst_161 : f32 to vector<2x32xf32>
    %327 = arith.addf %326, %325 : vector<2x32xf32>
    %328 = arith.divf %326, %327 : vector<2x32xf32>
    %c1_162 = arith.constant 1 : index
    %329 = arith.index_cast %c6_i32 : i32 to index
    %c0_163 = arith.constant 0 : index
    %c0_164 = arith.constant 0 : index
    %330 = vector.load %arg1[%c1_162, %329, %c0_163, %c0_164] : memref<4x8x2x32xf32, #tpu.memory_space<vmem>>, vector<1x1x2x32xf32>
    %331 = vector.shape_cast %330 : vector<1x1x2x32xf32> to vector<2x32xf32>
    %cst_165 = arith.constant dense<0.000000e+00> : vector<2x32xf32>
    %332 = tpu.matmul %308, %6, %cst_165 {dimension_numbers = #tpu.dot_dimension_numbers<[1], [0], [0], [1], [0, 0, 1, 1], [], []>} : vector<2x32xf32>, vector<32x32xf32>, vector<2x32xf32> -> vector<2x32xf32>
    %333 = arith.addf %331, %332 : vector<2x32xf32>
    %334 = arith.negf %333 : vector<2x32xf32>
    %335 = math.exp %334 : vector<2x32xf32>
    %cst_166 = arith.constant 1.000000e+00 : f32
    %336 = vector.broadcast %cst_166 : f32 to vector<2x32xf32>
    %337 = arith.addf %336, %335 : vector<2x32xf32>
    %338 = arith.divf %336, %337 : vector<2x32xf32>
    %c2_167 = arith.constant 2 : index
    %339 = arith.index_cast %c6_i32 : i32 to index
    %c0_168 = arith.constant 0 : index
    %c0_169 = arith.constant 0 : index
    %340 = vector.load %arg1[%c2_167, %339, %c0_168, %c0_169] : memref<4x8x2x32xf32, #tpu.memory_space<vmem>>, vector<1x1x2x32xf32>
    %341 = vector.shape_cast %340 : vector<1x1x2x32xf32> to vector<2x32xf32>
    %cst_170 = arith.constant dense<0.000000e+00> : vector<2x32xf32>
    %342 = tpu.matmul %308, %8, %cst_170 {dimension_numbers = #tpu.dot_dimension_numbers<[1], [0], [0], [1], [0, 0, 1, 1], [], []>} : vector<2x32xf32>, vector<32x32xf32>, vector<2x32xf32> -> vector<2x32xf32>
    %343 = arith.addf %341, %342 : vector<2x32xf32>
    %344 = math.tanh %343 : vector<2x32xf32>
    %c3_171 = arith.constant 3 : index
    %345 = arith.index_cast %c6_i32 : i32 to index
    %c0_172 = arith.constant 0 : index
    %c0_173 = arith.constant 0 : index
    %346 = vector.load %arg1[%c3_171, %345, %c0_172, %c0_173] : memref<4x8x2x32xf32, #tpu.memory_space<vmem>>, vector<1x1x2x32xf32>
    %347 = vector.shape_cast %346 : vector<1x1x2x32xf32> to vector<2x32xf32>
    %cst_174 = arith.constant dense<0.000000e+00> : vector<2x32xf32>
    %348 = tpu.matmul %308, %10, %cst_174 {dimension_numbers = #tpu.dot_dimension_numbers<[1], [0], [0], [1], [0, 0, 1, 1], [], []>} : vector<2x32xf32>, vector<32x32xf32>, vector<2x32xf32> -> vector<2x32xf32>
    %349 = arith.addf %347, %348 : vector<2x32xf32>
    %350 = arith.negf %349 : vector<2x32xf32>
    %351 = math.exp %350 : vector<2x32xf32>
    %cst_175 = arith.constant 1.000000e+00 : f32
    %352 = vector.broadcast %cst_175 : f32 to vector<2x32xf32>
    %353 = arith.addf %352, %351 : vector<2x32xf32>
    %354 = arith.divf %352, %353 : vector<2x32xf32>
    %355 = arith.mulf %338, %306 : vector<2x32xf32>
    %356 = arith.mulf %328, %344 : vector<2x32xf32>
    %357 = arith.addf %355, %356 : vector<2x32xf32>
    %358 = math.tanh %357 : vector<2x32xf32>
    %359 = arith.mulf %354, %358 : vector<2x32xf32>
    %360 = arith.index_cast %c6_i32 : i32 to index
    %c0_176 = arith.constant 0 : index
    %c0_177 = arith.constant 0 : index
    %361 = vector.load %arg3[%360, %c0_176, %c0_177] : memref<8x2x32xf32, #tpu.memory_space<vmem>>, vector<1x2x32xf32>
    %362 = vector.shape_cast %361 : vector<1x2x32xf32> to vector<2x32xf32>
    %363 = arith.addf %359, %362 : vector<2x32xf32>
    %cst_178 = arith.constant 0.000000e+00 : f32
    %364 = vector.broadcast %cst_178 : f32 to vector<2x32xf32>
    %365 = arith.maximumf %363, %364 : vector<2x32xf32>
    %366 = arith.index_cast %c6_i32 : i32 to index
    %c0_179 = arith.constant 0 : index
    %c0_180 = arith.constant 0 : index
    %367 = vector.load %arg4[%366, %c0_179, %c0_180] : memref<8x2x32xf32, #tpu.memory_space<vmem>>, vector<1x2x32xf32>
    %368 = vector.shape_cast %367 : vector<1x2x32xf32> to vector<2x32xf32>
    %369 = vector.shape_cast %365 : vector<2x32xf32> to vector<1x2x32xf32>
    tpu.vector_store %arg4[%366, %c0_179, %c0_180], %369 {strides = array<i32>} : memref<8x2x32xf32, #tpu.memory_space<vmem>>, vector<1x2x32xf32>,
    %c7_i32 = arith.constant 7 : i32
    %c0_181 = arith.constant 0 : index
    %370 = arith.index_cast %c7_i32 : i32 to index
    %c0_182 = arith.constant 0 : index
    %c0_183 = arith.constant 0 : index
    %371 = vector.load %arg1[%c0_181, %370, %c0_182, %c0_183] : memref<4x8x2x32xf32, #tpu.memory_space<vmem>>, vector<1x1x2x32xf32>
    %372 = vector.shape_cast %371 : vector<1x1x2x32xf32> to vector<2x32xf32>
    %cst_184 = arith.constant dense<0.000000e+00> : vector<2x32xf32>
    %373 = tpu.matmul %359, %4, %cst_184 {dimension_numbers = #tpu.dot_dimension_numbers<[1], [0], [0], [1], [0, 0, 1, 1], [], []>} : vector<2x32xf32>, vector<32x32xf32>, vector<2x32xf32> -> vector<2x32xf32>
    %374 = arith.addf %372, %373 : vector<2x32xf32>
    %375 = arith.negf %374 : vector<2x32xf32>
    %376 = math.exp %375 : vector<2x32xf32>
    %cst_185 = arith.constant 1.000000e+00 : f32
    %377 = vector.broadcast %cst_185 : f32 to vector<2x32xf32>
    %378 = arith.addf %377, %376 : vector<2x32xf32>
    %379 = arith.divf %377, %378 : vector<2x32xf32>
    %c1_186 = arith.constant 1 : index
    %380 = arith.index_cast %c7_i32 : i32 to index
    %c0_187 = arith.constant 0 : index
    %c0_188 = arith.constant 0 : index
    %381 = vector.load %arg1[%c1_186, %380, %c0_187, %c0_188] : memref<4x8x2x32xf32, #tpu.memory_space<vmem>>, vector<1x1x2x32xf32>
    %382 = vector.shape_cast %381 : vector<1x1x2x32xf32> to vector<2x32xf32>
    %cst_189 = arith.constant dense<0.000000e+00> : vector<2x32xf32>
    %383 = tpu.matmul %359, %6, %cst_189 {dimension_numbers = #tpu.dot_dimension_numbers<[1], [0], [0], [1], [0, 0, 1, 1], [], []>} : vector<2x32xf32>, vector<32x32xf32>, vector<2x32xf32> -> vector<2x32xf32>
    %384 = arith.addf %382, %383 : vector<2x32xf32>
    %385 = arith.negf %384 : vector<2x32xf32>
    %386 = math.exp %385 : vector<2x32xf32>
    %cst_190 = arith.constant 1.000000e+00 : f32
    %387 = vector.broadcast %cst_190 : f32 to vector<2x32xf32>
    %388 = arith.addf %387, %386 : vector<2x32xf32>
    %389 = arith.divf %387, %388 : vector<2x32xf32>
    %c2_191 = arith.constant 2 : index
    %390 = arith.index_cast %c7_i32 : i32 to index
    %c0_192 = arith.constant 0 : index
    %c0_193 = arith.constant 0 : index
    %391 = vector.load %arg1[%c2_191, %390, %c0_192, %c0_193] : memref<4x8x2x32xf32, #tpu.memory_space<vmem>>, vector<1x1x2x32xf32>
    %392 = vector.shape_cast %391 : vector<1x1x2x32xf32> to vector<2x32xf32>
    %cst_194 = arith.constant dense<0.000000e+00> : vector<2x32xf32>
    %393 = tpu.matmul %359, %8, %cst_194 {dimension_numbers = #tpu.dot_dimension_numbers<[1], [0], [0], [1], [0, 0, 1, 1], [], []>} : vector<2x32xf32>, vector<32x32xf32>, vector<2x32xf32> -> vector<2x32xf32>
    %394 = arith.addf %392, %393 : vector<2x32xf32>
    %395 = math.tanh %394 : vector<2x32xf32>
    %c3_195 = arith.constant 3 : index
    %396 = arith.index_cast %c7_i32 : i32 to index
    %c0_196 = arith.constant 0 : index
    %c0_197 = arith.constant 0 : index
    %397 = vector.load %arg1[%c3_195, %396, %c0_196, %c0_197] : memref<4x8x2x32xf32, #tpu.memory_space<vmem>>, vector<1x1x2x32xf32>
    %398 = vector.shape_cast %397 : vector<1x1x2x32xf32> to vector<2x32xf32>
    %cst_198 = arith.constant dense<0.000000e+00> : vector<2x32xf32>
    %399 = tpu.matmul %359, %10, %cst_198 {dimension_numbers = #tpu.dot_dimension_numbers<[1], [0], [0], [1], [0, 0, 1, 1], [], []>} : vector<2x32xf32>, vector<32x32xf32>, vector<2x32xf32> -> vector<2x32xf32>
    %400 = arith.addf %398, %399 : vector<2x32xf32>
    %401 = arith.negf %400 : vector<2x32xf32>
    %402 = math.exp %401 : vector<2x32xf32>
    %cst_199 = arith.constant 1.000000e+00 : f32
    %403 = vector.broadcast %cst_199 : f32 to vector<2x32xf32>
    %404 = arith.addf %403, %402 : vector<2x32xf32>
    %405 = arith.divf %403, %404 : vector<2x32xf32>
    %406 = arith.mulf %389, %357 : vector<2x32xf32>
    %407 = arith.mulf %379, %395 : vector<2x32xf32>
    %408 = arith.addf %406, %407 : vector<2x32xf32>
    %409 = math.tanh %408 : vector<2x32xf32>
    %410 = arith.mulf %405, %409 : vector<2x32xf32>
    %411 = arith.index_cast %c7_i32 : i32 to index
    %c0_200 = arith.constant 0 : index
    %c0_201 = arith.constant 0 : index
    %412 = vector.load %arg3[%411, %c0_200, %c0_201] : memref<8x2x32xf32, #tpu.memory_space<vmem>>, vector<1x2x32xf32>
    %413 = vector.shape_cast %412 : vector<1x2x32xf32> to vector<2x32xf32>
    %414 = arith.addf %410, %413 : vector<2x32xf32>
    %cst_202 = arith.constant 0.000000e+00 : f32
    %415 = vector.broadcast %cst_202 : f32 to vector<2x32xf32>
    %416 = arith.maximumf %414, %415 : vector<2x32xf32>
    %417 = arith.index_cast %c7_i32 : i32 to index
    %c0_203 = arith.constant 0 : index
    %c0_204 = arith.constant 0 : index
    %418 = vector.load %arg4[%417, %c0_203, %c0_204] : memref<8x2x32xf32, #tpu.memory_space<vmem>>, vector<1x2x32xf32>
    %419 = vector.shape_cast %418 : vector<1x2x32xf32> to vector<2x32xf32>
    %420 = vector.shape_cast %416 : vector<2x32xf32> to vector<1x2x32xf32>
    tpu.vector_store %arg4[%417, %c0_203, %c0_204], %420 {strides = array<i32>} : memref<8x2x32xf32, #tpu.memory_space<vmem>>, vector<1x2x32xf32>,
    %c8_i32 = arith.constant 8 : i32
    %c0_205 = arith.constant 0 : index
    %c0_206 = arith.constant 0 : index
    %421 = vector.load %arg5[%c0_205, %c0_206] : memref<2x32xf32, #tpu.memory_space<vmem>>, vector<2x32xf32>
    tpu.vector_store %arg5[%c0_205, %c0_206], %410 {strides = array<i32>} : memref<2x32xf32, #tpu.memory_space<vmem>>, vector<2x32xf32>,
    %c0_207 = arith.constant 0 : index
    %c0_208 = arith.constant 0 : index
    %422 = vector.load %arg6[%c0_207, %c0_208] : memref<2x32xf32, #tpu.memory_space<vmem>>, vector<2x32xf32>
    tpu.vector_store %arg6[%c0_207, %c0_208], %408 {strides = array<i32>} : memref<2x32xf32, #tpu.memory_space<vmem>>, vector<2x32xf32>,
    return
  }
  func.func @transform_0(%arg0: i32) -> (i32, i32, i32, i32) {
    %c0_i32 = arith.constant 0 : i32
    %c0_i32_0 = arith.constant 0 : i32
    %c0_i32_1 = arith.constant 0 : i32
    %c0_i32_2 = arith.constant 0 : i32
    return %c0_i32, %arg0, %c0_i32_0, %c0_i32_1 : i32, i32, i32, i32
  }
  func.func @transform_1(%arg0: i32) -> (i32, i32, i32) {
    %c0_i32 = arith.constant 0 : i32
    %c0_i32_0 = arith.constant 0 : i32
    %c0_i32_1 = arith.constant 0 : i32
    %c0_i32_2 = arith.constant 0 : i32
    return %c0_i32, %c0_i32_0, %c0_i32_1 : i32, i32, i32
  }
  func.func @transform_2(%arg0: i32) -> (i32, i32, i32) {
    %c0_i32 = arith.constant 0 : i32
    %c0_i32_0 = arith.constant 0 : i32
    %c0_i32_1 = arith.constant 0 : i32
    return %arg0, %c0_i32, %c0_i32_0 : i32, i32, i32
  }
  func.func @transform_3(%arg0: i32) -> (i32, i32, i32) {
    %c0_i32 = arith.constant 0 : i32
    %c0_i32_0 = arith.constant 0 : i32
    %c0_i32_1 = arith.constant 0 : i32
    return %arg0, %c0_i32, %c0_i32_0 : i32, i32, i32
  }
}

module attributes {stable_mosaic.version = 11 : i64} {
  func.func @_head_kernel(%arg0: i32, %arg1: memref<16x32xf32, #tpu.memory_space<vmem>>, %arg2: memref<32x32xf32, #tpu.memory_space<vmem>>, %arg3: memref<1x32xf32, #tpu.memory_space<vmem>>, %arg4: memref<16x32xf32, #tpu.memory_space<vmem>>) attributes {dimension_semantics = [#tpu.dimension_semantics<parallel>], iteration_bounds = array<i64: 1>, scalar_prefetch = 0 : i64, scratch_operands = 0 : i64, tpu.core_type = #tpu.core_type<tc>, window_params = [{transform_indices = @transform_0, window_bounds = array<i64: 16, 32>}, {pipeline_mode = #tpu.pipeline_mode<synchronous>, transform_indices = @transform_1, window_bounds = array<i64: 32, 32>}, {pipeline_mode = #tpu.pipeline_mode<synchronous>, transform_indices = @transform_2, window_bounds = array<i64: 1, 32>}, {transform_indices = @transform_3, window_bounds = array<i64: 16, 32>}]} {
    %c0 = arith.constant 0 : index
    %c0_0 = arith.constant 0 : index
    %0 = vector.load %arg1[%c0, %c0_0] : memref<16x32xf32, #tpu.memory_space<vmem>>, vector<16x32xf32>
    %1 = math.tanh %0 : vector<16x32xf32>
    %c0_1 = arith.constant 0 : index
    %c0_2 = arith.constant 0 : index
    %2 = vector.load %arg2[%c0_1, %c0_2] : memref<32x32xf32, #tpu.memory_space<vmem>>, vector<32x32xf32>
    %cst = arith.constant dense<0.000000e+00> : vector<16x32xf32>
    %3 = tpu.matmul %1, %2, %cst {dimension_numbers = #tpu.dot_dimension_numbers<[1], [0], [0], [1], [0, 0, 1, 1], [], []>} : vector<16x32xf32>, vector<32x32xf32>, vector<16x32xf32> -> vector<16x32xf32>
    %c0_3 = arith.constant 0 : index
    %c0_4 = arith.constant 0 : index
    %4 = vector.load %arg3[%c0_3, %c0_4] : memref<1x32xf32, #tpu.memory_space<vmem>>, vector<1x32xf32>
    %5 = vector.broadcast %4 : vector<1x32xf32> to vector<16x32xf32>
    %6 = arith.addf %3, %5 : vector<16x32xf32>
    %c0_5 = arith.constant 0 : index
    %c0_6 = arith.constant 0 : index
    %7 = vector.load %arg4[%c0_5, %c0_6] : memref<16x32xf32, #tpu.memory_space<vmem>>, vector<16x32xf32>
    tpu.vector_store %arg4[%c0_5, %c0_6], %6 {strides = array<i32>} : memref<16x32xf32, #tpu.memory_space<vmem>>, vector<16x32xf32>,
    return
  }
  func.func @transform_0(%arg0: i32) -> (i32, i32) {
    %c0_i32 = arith.constant 0 : i32
    %c0_i32_0 = arith.constant 0 : i32
    return %arg0, %c0_i32 : i32, i32
  }
  func.func @transform_1(%arg0: i32) -> (i32, i32) {
    %c0_i32 = arith.constant 0 : i32
    %c0_i32_0 = arith.constant 0 : i32
    %c0_i32_1 = arith.constant 0 : i32
    return %c0_i32, %c0_i32_0 : i32, i32
  }
  func.func @transform_2(%arg0: i32) -> (i32, i32) {
    %c0_i32 = arith.constant 0 : i32
    %c0_i32_0 = arith.constant 0 : i32
    %c0_i32_1 = arith.constant 0 : i32
    return %c0_i32, %c0_i32_0 : i32, i32
  }
  func.func @transform_3(%arg0: i32) -> (i32, i32) {
    %c0_i32 = arith.constant 0 : i32
    %c0_i32_0 = arith.constant 0 : i32
    return %arg0, %c0_i32 : i32, i32
  }
}

</mosaic_0001>

<bundles_post_ra>
// kernel: residual_lstm_forward.15
= control target key start
LH: loop header
LB: loop body
LE: loop exit
PB: predicated region body
PF: predicated region fallthrough
CT: control target
= control target key end

     0   :  { %vm27_vm0 = vcmask 261120   ;;  %s647_s1 = inlined_call_operand.vmem [shape: f32[4,32,32], index: 1, kind: input, shape index: {}]   ;;  %s648_s0 = inlined_call_operand.vmem [shape: f32[16,32], index: 0, kind: input, shape index: {}]   ;;  %s649_s2 = inlined_call_operand.vmem [shape: f32[4,1,32], index: 2, kind: input, shape index: {}]   ;;  %s650_s3 = inlined_call_operand.vmem [shape: f32[4,16,32], index: 3, kind: output, shape index: {}]  }
   0x1   :  { %v16_v0 = vld [vmem:[%s647_s1] sm:$0xff]  ;;  %v17_v1 = vld [vmem:[%s647_s1 + $0x8] sm:$0xff]  ;;  %v18_v5 = vld [vmem:[%s647_s1 + $0x10] sm:$0xff] }
   0x2   :  { %v391_v2 = vld [vmem:[%s647_s1 + $0x20] sm:$0xff]  ;;  %v489_v3 = vpack.c.bf16 %v17_v1, %v16_v0  ;;  %v392_v4 = vld [vmem:[%s647_s1 + $0x28] sm:$0xff]  ;;  %v19_v6 = vld [vmem:[%s647_s1 + $0x18] sm:$0xff] }
   0x3   :  { %v497_v7 = vpack.c.bf16 %v392_v4, %v391_v2  ;;  %v493_v8 = vpack.c.bf16 %v19_v6, %v18_v5  ;;  %v393_v9 = vld [vmem:[%s647_s1 + $0x30] sm:$0xff]  ;;  %v394_v10 = vld [vmem:[%s647_s1 + $0x38] sm:$0xff]  ;;  %v14_v11 = vld [vmem:[%s648_s0] sm:$0xff] }
   0x4   :  { %490 = vmatprep.subr.bf16.mxu0 %v489_v3  ;;  %v501_v12 = vpack.c.bf16 %v394_v10, %v393_v9  ;;  %453 = vmatprep.mubr.msk.f32.mxu0 %vm27_vm0, %v14_v11  ;;  %v401_v13 = vld [vmem:[%s647_s1 + $0x40] sm:$0xff]  ;;  %v402_v14 = vld [vmem:[%s647_s1 + $0x48] sm:$0xff]  ;;  %v403_v19 = vld [vmem:[%s647_s1 + $0x50] sm:$0xff] }
   0x5   :  { %498 = vmatprep.subr.bf16.mxu1 %v497_v7  ;;  %492 = vmatpush3.bf16.msra.mxu0 %v489_v3  ;;  %v411_v15 = vld [vmem:[%s647_s1 + $0x60] sm:$0xff]  ;;  %v412_v16 = vld [vmem:[%s647_s1 + $0x68] sm:$0xff]  ;;  %v505_v17 = vpack.c.bf16 %v402_v14, %v401_v13  ;;  %v404_v20 = vld [vmem:[%s647_s1 + $0x58] sm:$0xff] }
   0x6   :  { %500 = vmatpush3.bf16.msra.mxu1 %v497_v7  ;;  %494 = vmatprep.subr.bf16.mxu0 %v493_v8  ;;  %v513_v18 = vpack.c.bf16 %v412_v16, %v411_v15  ;;  %v413_v21 = vld [vmem:[%s647_s1 + $0x70] sm:$0xff]  ;;  %v414_v22 = vld [vmem:[%s647_s1 + $0x78] sm:$0xff]  ;;  %v15_v23 = vld [vmem:[%s648_s0 + $0x8] sm:$0xff]  ;;  %v509_v24 = vpack.c.bf16 %v404_v20, %v403_v19 }
   0x7   :  { %502 = vmatprep.subr.bf16.mxu1 %v501_v12  ;;  %464 = vmatprep.mubr.msk.f32.mxu1 %vm27_vm0, %v14_v11  ;;  %v517_v25 = vpack.c.bf16 %v414_v22, %v413_v21  ;;  %v388_v26 = vld [vmem:[%s649_s2] ss:$0 sm:$0xff]  ;;  %v396_v27 = vld [vmem:[%s649_s2 + $0x1] ss:$0 sm:$0xff]  ;;  %v406_v36 = vld [vmem:[%s649_s2 + $0x2] ss:$0 sm:$0xff] }
   0x8   :  { %v416_v37 = vld [vmem:[%s649_s2 + $0x3] ss:$0 sm:$0xff] }
   0x9   :  { %496 = vmatpush3.bf16.msra.mxu0 %v493_v8 }
   0xa   :  { %504 = vmatpush3.bf16.msra.mxu1 %v501_v12  ;;  %506 = vmatprep.subr.bf16.mxu0 %v505_v17 }
   0xb   :  { %514 = vmatprep.subr.bf16.mxu1 %v513_v18 }
   0xc   :  { %454 = vmatmul.mubr.msk.f32.vlgmr.msra.gmra.mrb[0].mxu0 %vm27_vm0, %v15_v23 }
   0xd   :  { %465 = vmatmul.mubr.msk.f32.vlgmr.msra.gmra.mrb[0].mxu1 %vm27_vm0, %v15_v23  ;;  %508 = vmatpush3.bf16.msra.mxu0 %v505_v17 }
   0xe   :  { %516 = vmatpush3.bf16.msra.mxu1 %v513_v18  ;;  %510 = vmatprep.subr.bf16.mxu0 %v509_v24 }
   0xf   :  { %518 = vmatprep.subr.bf16.mxu1 %v517_v25  ;;  %475 = vmatprep.mubr.msk.f32.mxu0 %vm27_vm0, %v14_v11 }
  0x10   :  { %486 = vmatprep.mubr.msk.f32.mxu1 %vm27_vm0, %v14_v11 }
  0x11   :  { %512 = vmatpush3.bf16.msra.mxu0 %v509_v24 }
  0x12   :  { %520 = vmatpush3.bf16.msra.mxu1 %v517_v25 }
  0x14   :  { %476 = vmatmul.mubr.msk.f32.vlgmr.msra.gmra.mrb[2].mxu0 %vm27_vm0, %v15_v23 }
  0x15   :  { %487 = vmatmul.mubr.msk.f32.vlgmr.msra.gmra.mrb[2].mxu1 %vm27_vm0, %v15_v23 }
  0xdf   :  { %v455_v28 = vpop.f32.mrb[0].mxu0 }
  0xe0   :  { %v106_v29 = vadd.f32 %v455_v28, %v388_v26  ;;  %v466_v30 = vpop.f32.mrb[0].mxu1  ;;  %v100_v31 = vpop.f32.mrb[1].mxu0 }
  0xe1   :  { %v196_v32 = vadd.f32 %v466_v30, %v396_v27  ;;  %v101_v33 = vadd.f32 %v388_v26, %v100_v31  ;;  %v190_v34 = vpop.f32.mrb[1].mxu1 }
  0xe2   :  { %110 = vst.msk [vmem:[%s650_s3 + $0x8] sm:$0xff] %vm27_vm0, %v106_v29  ;;  %v191_v35 = vadd.f32 %v396_v27, %v190_v34 }
  0xe3   :  { %400 = vst.msk [vmem:[%s650_s3 + $0x18] sm:$0xff] %vm27_vm0, %v196_v32  ;;  %109 = vst.msk [vmem:[%s650_s3] sm:$0xff] %vm27_vm0, %v101_v33 }
  0xe4   :  { %399 = vst.msk [vmem:[%s650_s3 + $0x10] sm:$0xff] %vm27_vm0, %v191_v35 }
  0xe7   :  { %v477_v38 = vpop.f32.mrb[2].mxu0 }
  0xe8   :  { %v287_v39 = vadd.f32 %v477_v38, %v406_v36  ;;  %v488_v40 = vpop.f32.mrb[2].mxu1  ;;  %v281_v41 = vpop.f32.mrb[3].mxu0 }
  0xe9   :  { %v378_v42 = vadd.f32 %v488_v40, %v416_v37  ;;  %v282_v43 = vadd.f32 %v406_v36, %v281_v41  ;;  %v372_v44 = vpop.f32.mrb[3].mxu1 }
  0xea   :  { %410 = vst.msk [vmem:[%s650_s3 + $0x28] sm:$0xff] %vm27_vm0, %v287_v39  ;;  %v373_v45 = vadd.f32 %v416_v37, %v372_v44 }
  0xeb   :  { %420 = vst.msk [vmem:[%s650_s3 + $0x38] sm:$0xff] %vm27_vm0, %v378_v42  ;;  %409 = vst.msk [vmem:[%s650_s3 + $0x20] sm:$0xff] %vm27_vm0, %v282_v43 }
  0xec   :  { %419 = vst.msk [vmem:[%s650_s3 + $0x30] sm:$0xff] %vm27_vm0, %v373_v45 }

// kernel: residual_lstm_forward.13
= control target key start
LH: loop header
LB: loop body
LE: loop exit
PB: predicated region body
PF: predicated region fallthrough
CT: control target
= control target key end

     0   :  { %8 = vsyncpa [#allocation3], 0  ;;  %s489_s12 = smov [#allocation2]   ;;  %s590_s0 = inlined_call_operand.vmem [shape: f32[16,4], index: 0, kind: input, shape index: {}]   ;;  %s591_s1 = inlined_call_operand.hbm [shape: f32[4,4,32], index: 1, kind: input, shape index: {}]   ;;  %s592_s2 = inlined_call_operand.vmem [shape: f32[4,1,32], index: 2, kind: input, shape index: {}]   ;;  %s593_s3 = inlined_call_operand.vmem [shape: f32[4,16,32], index: 3, kind: output, shape index: {}]  }
   0x1   :  { %s16_s13 = sshll.u32 %s489_s12, 4  ;;  %s465_s16 = scalar_lea.hbm %s591_s1, 256  ;;  %s17_s13 = int_to_ptr.vmem [resolvable:$true] %s16_s13 }
   0x2   :  { %p466_p0 = scmp.ne.s32.totalorder %s591_s1, %s465_s16  ;;  %p469_p1 = scmp.lt.u32.totalorder %s465_s16, %s591_s1 }
   0x4   :  { %p471_p2 = pnand %p469_p1, %p466_p0 }
   0x6   :  { %474 = shalt.err (!%p471_p2)
}
   0x7   :  { %s475_s21 = scalar_lea.vmem %s17_s13, 256  ;;  %p480_p4 = scmp.lt.s32.totalorder %s17_s13, %s17_s13 }
   0x8   :  { %p476_p3 = scmp.ne.s32.totalorder %s17_s13, %s475_s21  ;;  %p481_p5 = scmp.lt.s32.totalorder %s475_s21, %s475_s21 }
   0xa   :  { %p482_p6 = por %p481_p5, %p480_p4 }
   0xc   :  { %p483_p7 = pnand %p482_p6, %p476_p3 }
   0xe   :  { %486 = shalt.err (!%p483_p7)
}
   0xf   :  { %s490_s22 = smov 64   ;;  %s491_s23 = smov 4  }
  0x10   :  { %22 = dma.hbm_to_vmem [thread:$0]  %s591_s1, 256, %s17_s13, [#allocation3], %s490_s22, %s490_s22, %s491_s23  }
  0x11   :  { %487 = dma.done.wait [#allocation3], 256  }
  0x12   :  { %488 = vsyncadd [#allocation3], 4294967040  ;;  %vm45_vm0 = vcmask 1043456   ;;  %vm38_vm1 = vcmask 31744   ;;  %v30_v0 = vld [vmem:[#allocation2] sm:$0xf] }
  0x13   :  { %v128_v1 = vld [vmem:[#allocation2 + $0x4] sm:$0xf]  ;;  %442 = vmatprep.subr.msk.mxu0 %vm45_vm0, %v30_v0  ;;  %v29_v3 = vld [vmem:[%s590_s0 + $0x8] sm:$0xff]  ;;  %v405_v6 = vld [vmem:[%s592_s2] ss:$0 sm:$0xff]  ;;  %vm124_vm2 = vcmask 261120  }
  0x14   :  { %v28_v2 = vld [vmem:[%s590_s0] sm:$0xff]  ;;  %447 = vmatprep.subr.msk.mxu1 %vm45_vm0, %v128_v1  ;;  %443 = vmatpush3.msk.msra.mxu0 %vm45_vm0, %v30_v0  ;;  %v219_v4 = vld [vmem:[#allocation2 + $0x8] sm:$0xf]  ;;  %v310_v5 = vld [vmem:[#allocation2 + $0xc] sm:$0xf] }
  0x15   :  { %444 = vmatprep.mubr.msk.f32.mxu0 %vm38_vm1, %v28_v2  ;;  %448 = vmatpush3.msk.msra.mxu1 %vm45_vm0, %v128_v1  ;;  %v410_v7 = vld [vmem:[%s592_s2 + $0x1] ss:$0 sm:$0xff]  ;;  %v417_v16 = vld [vmem:[%s592_s2 + $0x2] ss:$0 sm:$0xff]  ;;  %v424_v17 = vld [vmem:[%s592_s2 + $0x3] ss:$0 sm:$0xff] }
  0x16   :  { %449 = vmatprep.mubr.msk.f32.mxu1 %vm38_vm1, %v28_v2  ;;  %445 = vmatmul.mubr.msk.f32.vlgmr.msra.gmra.mrb[0].mxu0 %vm38_vm1, %v29_v3 }
  0x17   :  { %450 = vmatmul.mubr.msk.f32.vlgmr.msra.gmra.mrb[0].mxu1 %vm38_vm1, %v29_v3  ;;  %452 = vmatprep.subr.msk.mxu0 %vm45_vm0, %v219_v4 }
  0x18   :  { %457 = vmatprep.subr.msk.mxu1 %vm45_vm0, %v310_v5  ;;  %453 = vmatpush3.msk.msra.mxu0 %vm45_vm0, %v219_v4 }
  0x19   :  { %458 = vmatpush3.msk.msra.mxu1 %vm45_vm0, %v310_v5  ;;  %454 = vmatprep.mubr.msk.f32.mxu0 %vm38_vm1, %v28_v2 }
  0x1a   :  { %459 = vmatprep.mubr.msk.f32.mxu1 %vm38_vm1, %v28_v2  ;;  %455 = vmatmul.mubr.msk.f32.vlgmr.msra.gmra.mrb[2].mxu0 %vm38_vm1, %v29_v3 }
  0x1b   :  { %460 = vmatmul.mubr.msk.f32.vlgmr.msra.gmra.mrb[2].mxu1 %vm38_vm1, %v29_v3 }
  0xe9   :  { %v446_v8 = vpop.f32.mrb[0].mxu0 }
  0xea   :  { %v451_v9 = vpop.f32.mrb[0].mxu1  ;;  %v121_v10 = vadd.f32 %v446_v8, %v405_v6  ;;  %v115_v12 = vpop.f32.mrb[1].mxu0 }
  0xeb   :  { %v212_v11 = vadd.f32 %v451_v9, %v410_v7  ;;  %v206_v13 = vpop.f32.mrb[1].mxu1  ;;  %v116_v14 = vadd.f32 %v405_v6, %v115_v12 }
  0xec   :  { %v207_v15 = vadd.f32 %v410_v7, %v206_v13  ;;  %126 = vst.msk [vmem:[%s593_s3 + $0x8] sm:$0xff] %vm124_vm2, %v121_v10 }
  0xed   :  { %415 = vst.msk [vmem:[%s593_s3 + $0x18] sm:$0xff] %vm124_vm2, %v212_v11  ;;  %125 = vst.msk [vmem:[%s593_s3] sm:$0xff] %vm124_vm2, %v116_v14  ;;  %v456_v18 = vpop.f32.mrb[2].mxu0 }
  0xee   :  { %414 = vst.msk [vmem:[%s593_s3 + $0x10] sm:$0xff] %vm124_vm2, %v207_v15  ;;  %v461_v19 = vpop.f32.mrb[2].mxu1  ;;  %v303_v20 = vadd.f32 %v456_v18, %v417_v16  ;;  %v297_v22 = vpop.f32.mrb[3].mxu0 }
  0xef   :  { %v394_v21 = vadd.f32 %v461_v19, %v424_v17  ;;  %v388_v23 = vpop.f32.mrb[3].mxu1  ;;  %v298_v24 = vadd.f32 %v417_v16, %v297_v22 }
  0xf0   :  { %v389_v25 = vadd.f32 %v424_v17, %v388_v23  ;;  %422 = vst.msk [vmem:[%s593_s3 + $0x28] sm:$0xff] %vm124_vm2, %v303_v20 }
  0xf1   :  { %429 = vst.msk [vmem:[%s593_s3 + $0x38] sm:$0xff] %vm124_vm2, %v394_v21  ;;  %421 = vst.msk [vmem:[%s593_s3 + $0x20] sm:$0xff] %vm124_vm2, %v298_v24 }
  0xf2   :  { %428 = vst.msk [vmem:[%s593_s3 + $0x30] sm:$0xff] %vm124_vm2, %v389_v25 }
  0xf3   :  { %404 = vsyncpa [#allocation3], 1 }

// kernel: residual_lstm_forward.25
= control target key start
LH: loop header
LB: loop body
LE: loop exit
PB: predicated region body
PF: predicated region fallthrough
CT: control target
= control target key end

     0   :  { %vm29_vm0 = vcmask 261120   ;;  %s196_s1 = inlined_call_operand.vmem [shape: f32[32,32], index: 1, kind: input, shape index: {}]   ;;  %s197_s0 = inlined_call_operand.vmem [shape: f32[16,32], index: 0, kind: input, shape index: {}]   ;;  %s198_s2 = inlined_call_operand.vmem [shape: f32[1,32], index: 2, kind: input, shape index: {}]   ;;  %s199_s3 = inlined_call_operand.vmem [shape: f32[16,32], index: 3, kind: output, shape index: {}]  }
   0x1   :  { %v18_v0 = vld [vmem:[%s196_s1] sm:$0xff]  ;;  %v19_v1 = vld [vmem:[%s196_s1 + $0x8] sm:$0xff]  ;;  %v20_v2 = vld [vmem:[%s196_s1 + $0x10] sm:$0xff] }
   0x2   :  { %v137_v3 = vpack.c.bf16 %v19_v1, %v18_v0  ;;  %v21_v4 = vld [vmem:[%s196_s1 + $0x18] sm:$0xff]  ;;  %v14_v5 = vld [vmem:[%s197_s0] sm:$0xff]  ;;  %v15_v6 = vld [vmem:[%s197_s0 + $0x8] sm:$0xff] }
   0x3   :  { %v141_v7 = vpack.c.bf16 %v21_v4, %v20_v2  ;;  %145 = vtanh.f32 %v14_v5  ;;  %v117_v10 = vld [vmem:[%s198_s2] ss:$0 sm:$0xff] }
   0x4   :  { %138 = vmatprep.subr.bf16.mxu0 %v137_v3  ;;  %147 = vtanh.f32 %v15_v6 }
   0x5   :  { %140 = vmatpush3.bf16.msra.mxu0 %v137_v3 }
   0x6   :  { %142 = vmatprep.subr.bf16.mxu0 %v141_v7 }
   0x9   :  { %144 = vmatpush3.bf16.msra.mxu0 %v141_v7 }
   0xd   :  { %v146_v8 = vpop.eup %145 }
   0xe   :  { %v148_v9 = vpop.eup %147  ;;  %134 = vmatprep.mubr.msk.f32.mxu0 %vm29_vm0, %v146_v8 }
   0xf   :  { %135 = vmatmul.mubr.msk.f32.vlgmr.msra.gmra.mrb[0].mxu0 %vm29_vm0, %v148_v9 }
  0xe2   :  { %v136_v11 = vpop.f32.mrb[0].mxu0 }
  0xe3   :  { %v108_v12 = vadd.f32 %v136_v11, %v117_v10  ;;  %v102_v13 = vpop.f32.mrb[1].mxu0 }
  0xe4   :  { %v103_v14 = vadd.f32 %v117_v10, %v102_v13 }
  0xe5   :  { %112 = vst.msk [vmem:[%s199_s3 + $0x8] sm:$0xff] %vm29_vm0, %v108_v12 }
  0xe6   :  { %111 = vst.msk [vmem:[%s199_s3] sm:$0xff] %vm29_vm0, %v103_v14 }

// kernel: residual_lstm_forward.14
= control target key start
LH: loop header
LB: loop body
LE: loop exit
PB: predicated region body
PF: predicated region fallthrough
CT: control target
= control target key end

     0   :  { %vm15_vm0 = vcmask 254976   ;;  %v3554_v0 = vmov 0.0|0.0   ;;  %v3555_v4 = vmov 0.0   ;;  %vm3556_vm1 = vmmov 0   ;;  %s4018_s1 = inlined_call_operand.vmem [shape: f32[4,32,32], index: 1, kind: input, shape index: {}]   ;;  %s4019_s0 = inlined_call_operand.vmem [shape: f32[4,8,2,32], index: 0, kind: input, shape index: {}]   ;;  %s4020_s2 = inlined_call_operand.vmem [shape: f32[8,2,32], index: 2, kind: output, shape index: {}]  }
   0x1   :  { %3231 = vmatprep.subr.bf16.mxu0 %v3554_v0  ;;  %3237 = vmatprep.subr.bf16.mxu1 %v3554_v0  ;;  %v18_v1 = vld [vmem:[%s4018_s1] sm:$0xff]  ;;  %v19_v2 = vld [vmem:[%s4018_s1 + $0x8] sm:$0xff]  ;;  %16 = vst.msk [vmem:[#allocation2] sm:$0x3] %vm15_vm0, %v3555_v4  ;;  %17 = vst.msk [vmem:[#allocation3] sm:$0x3] %vm15_vm0, %v3555_v4 }
   0x2   :  { %v2613_v3 = vld [vmem:[%s4018_s1 + $0x20] sm:$0xff]  ;;  %v3587_v5 = vpack.c.bf16 %v19_v2, %v18_v1  ;;  %v2614_v6 = vld [vmem:[%s4018_s1 + $0x28] sm:$0xff]  ;;  %v20_v7 = vld [vmem:[%s4018_s1 + $0x10] sm:$0xff]  ;;  %2887 = vmatprep.mubr.msk.f32.mxu0 %vm3556_vm1, %v3555_v4  ;;  %2898 = vmatprep.mubr.msk.f32.mxu1 %vm3556_vm1, %v3555_v4  ;;  %vm40_vm2 = vcmask 261120  }
   0x3   :  { %v21_v8 = vld [vmem:[%s4018_s1 + $0x18] sm:$0xff]  ;;  %v3602_v9 = vpack.c.bf16 %v2614_v6, %v2613_v3  ;;  %v2615_v10 = vld [vmem:[%s4018_s1 + $0x30] sm:$0xff]  ;;  %v2617_v14 = vld [vmem:[%s4018_s1 + $0x40] sm:$0xff] }
   0x4   :  { %v2616_v11 = vld [vmem:[%s4018_s1 + $0x38] sm:$0xff]  ;;  %3233 = vmatpush3.bf16.msra.mxu0 %v3587_v5  ;;  %v3611_v12 = vpack.c.bf16 %v21_v8, %v20_v7  ;;  %v2618_v15 = vld [vmem:[%s4018_s1 + $0x48] sm:$0xff]  ;;  %v2621_v16 = vld [vmem:[%s4018_s1 + $0x60] sm:$0xff] }
   0x5   :  { %3239 = vmatpush3.bf16.msra.mxu1 %v3602_v9  ;;  %3234 = vmatprep.subr.bf16.mxu0 %v3554_v0  ;;  %v3615_v13 = vpack.c.bf16 %v2616_v11, %v2615_v10  ;;  %v2622_v17 = vld [vmem:[%s4018_s1 + $0x68] sm:$0xff]  ;;  %v3631_v19 = vpack.c.bf16 %v2618_v15, %v2617_v14  ;;  %v2619_v21 = vld [vmem:[%s4018_s1 + $0x50] sm:$0xff]  ;;  %v2620_v22 = vld [vmem:[%s4018_s1 + $0x58] sm:$0xff] }
   0x6   :  { %3240 = vmatprep.subr.bf16.mxu1 %v3554_v0  ;;  %v3635_v20 = vpack.c.bf16 %v2622_v17, %v2621_v16  ;;  %v2623_v23 = vld [vmem:[%s4018_s1 + $0x70] sm:$0xff]  ;;  %v2624_v24 = vld [vmem:[%s4018_s1 + $0x78] sm:$0xff]  ;;  %v3653_v25 = vpack.c.bf16 %v2620_v22, %v2619_v21  ;;  %v39_v27 = vld [vmem:[%s4019_s0] sm:$0x3] }
   0x7   :  { %v3657_v26 = vpack.c.bf16 %v2624_v24, %v2623_v23  ;;  %v2627_v28 = vld [vmem:[%s4019_s0 + $0x10] sm:$0x3]  ;;  %v2630_v39 = vld [vmem:[%s4019_s0 + $0x20] sm:$0x3]  ;;  %v2635_v62 = vld [vmem:[%s4019_s0 + $0x2] sm:$0x3] }
   0x8   :  { %3236 = vmatpush3.bf16.msra.mxu0 %v3611_v12  ;;  %v37_v18 = vld [vmem:[#allocation2] sm:$0x3]  ;;  %v2632_v37 = vld [vmem:[%s4019_s0 + $0x30] sm:$0x3]  ;;  %v38_v52 = vld [vmem:[#allocation3] sm:$0x3] }
   0x9   :  { %3242 = vmatpush3.bf16.msra.mxu1 %v3615_v13  ;;  %3243 = vmatprep.subr.bf16.mxu0 %v3554_v0  ;;  %v2638_v63 = vld [vmem:[%s4019_s0 + $0x12] sm:$0x3]  ;;  %v2641_v22 = vld [vmem:[%s4019_s0 + $0x22] sm:$0x3] }
   0xa   :  { %3249 = vmatprep.subr.bf16.mxu1 %v3554_v0  ;;  %v2643_v14 = vld [vmem:[%s4019_s0 + $0x32] sm:$0x3] }
   0xb   :  { %2888 = vmatmul.mubr.msk.f32.vlgmr.msra.gmra.mrb[0].mxu0 %vm40_vm2, %v37_v18 }
   0xc   :  { %2899 = vmatmul.mubr.msk.f32.vlgmr.msra.gmra.mrb[0].mxu1 %vm40_vm2, %v37_v18  ;;  %3245 = vmatpush3.bf16.msra.mxu0 %v3631_v19 }
   0xd   :  { %3251 = vmatpush3.bf16.msra.mxu1 %v3635_v20  ;;  %3246 = vmatprep.subr.bf16.mxu0 %v3554_v0 }
   0xe   :  { %3252 = vmatprep.subr.bf16.mxu1 %v3554_v0  ;;  %2909 = vmatprep.mubr.msk.f32.mxu0 %vm3556_vm1, %v3555_v4 }
   0xf   :  { %2920 = vmatprep.mubr.msk.f32.mxu1 %vm3556_vm1, %v3555_v4 }
  0x10   :  { %3248 = vmatpush3.bf16.msra.mxu0 %v3653_v25 }
  0x11   :  { %3254 = vmatpush3.bf16.msra.mxu1 %v3657_v26  ;;  %3255 = vmatprep.subr.bf16.mxu0 %v3554_v0 }
  0x12   :  { %3261 = vmatprep.subr.bf16.mxu1 %v3554_v0 }
  0x13   :  { %2910 = vmatmul.mubr.msk.f32.vlgmr.msra.gmra.mrb[2].mxu0 %vm40_vm2, %v37_v18 }
  0x14   :  { %2921 = vmatmul.mubr.msk.f32.vlgmr.msra.gmra.mrb[2].mxu1 %vm40_vm2, %v37_v18  ;;  %3257 = vmatpush3.bf16.msra.mxu0 %v3587_v5 }
  0x15   :  { %3263 = vmatpush3.bf16.msra.mxu1 %v3602_v9  ;;  %3258 = vmatprep.subr.bf16.mxu0 %v3554_v0 }
  0x16   :  { %3264 = vmatprep.subr.bf16.mxu1 %v3554_v0  ;;  %2931 = vmatprep.mubr.msk.f32.mxu0 %vm3556_vm1, %v3555_v4 }
  0x17   :  { %2942 = vmatprep.mubr.msk.f32.mxu1 %vm3556_vm1, %v3555_v4 }
  0x18   :  { %3260 = vmatpush3.bf16.msra.mxu0 %v3611_v12 }
  0x19   :  { %3266 = vmatpush3.bf16.msra.mxu1 %v3615_v13  ;;  %3267 = vmatprep.subr.bf16.mxu0 %v3554_v0 }
  0x1a   :  { %3273 = vmatprep.subr.bf16.mxu1 %v3554_v0 }
  0xde   :  { %v110_v29 = vpop.f32.mrb[0].mxu0 }
  0xdf   :  { %v114_v30 = vadd.f32 %v110_v29, %v39_v27  ;;  %v189_v31 = vpop.f32.mrb[0].mxu1  ;;  %v2889_v32 = vpop.f32.mrb[1].mxu0 }
  0xe0   :  { %v193_v33 = vadd.f32 %v2627_v28, %v189_v31  ;;  %v2900_v34 = vpop.f32.mrb[1].mxu1 }
  0xe1   :  { %v2626_v35 = vmul.f32 -1.442695, %v114_v30 }
  0xe2   :  { %v2629_v36 = vmul.f32 -1.442695, %v193_v33 }
  0xe3   :  { %3426 = vpow2.f32 %v2626_v35 }
  0xe4   :  { %3428 = vpow2.f32 %v2629_v36 }
  0xe6   :  { %v268_v38 = vpop.f32.mrb[2].mxu0 }
  0xe7   :  { %v342_v40 = vpop.f32.mrb[2].mxu1  ;;  %v2911_v41 = vpop.f32.mrb[3].mxu0  ;;  %v272_v44 = vadd.f32 %v2630_v39, %v268_v38 }
  0xe8   :  { %v346_v42 = vadd.f32 %v2632_v37, %v342_v40  ;;  %v2922_v43 = vpop.f32.mrb[3].mxu1 }
  0xe9   :  { %v2650_v43 = vld [vmem:[%s4019_s0 + $0x14] sm:$0x3] }
  0xea   :  { %v2634_v45 = vmul.f32 -1.442695, %v346_v42  ;;  %v2647_v42 = vld [vmem:[%s4019_s0 + $0x4] sm:$0x3] }
  0xec   :  { %3430 = vpow2.f32 %v2634_v45 }
  0xed   :  { %v3427_v46 = vpop.eup %3426  ;;  %3432 = vtanh.f32 %v272_v44 }
  0xee   :  { %v3429_v47 = vpop.eup %3428  ;;  %v118_v48 = vadd.f32 1.0, %v3427_v46 }
  0xef   :  { %v197_v49 = vadd.f32 1.0, %v3429_v47 }
  0xf0   :  { %3434 = vrcp.f32 %v118_v48 }
  0xf1   :  { %3436 = vrcp.f32 %v197_v49 }
  0xf6   :  { %v3431_v50 = vpop.eup %3430 }
  0xf7   :  { %v3433_v51 = vpop.eup %3432  ;;  %v350_v54 = vadd.f32 1.0, %v3431_v50 }
  0xf9   :  { %3438 = vrcp.f32 %v350_v54 }
  0xfa   :  { %v3435_v53 = vpop.eup %3434 }
  0xfb   :  { %v3437_v55 = vpop.eup %3436  ;;  %v354_v56 = vmul.f32 %v3435_v53, %v3433_v51 }
  0xfc   :  { %v353_v57 = vmul.f32 %v3437_v55, %v38_v52  ;;  %v2655_v52 = vld [vmem:[%s4019_s0 + $0x34] sm:$0x3] }
  0xfe   :  { %v3694_v58 = vadd.f32 %v354_v56, %v353_v57 }
 0x100   :  { %3440 = vtanh.f32 %v3694_v58 }
 0x103   :  { %v3439_v59 = vpop.eup %3438 }
 0x10a   :  { %v3441_v60 = vpop.eup %3440 }
 0x10b   :  { %v357_v61 = vmul.f32 %v3441_v60, %v3439_v59 }
 0x10d   :  { %359 = vst.msk [vmem:[%s4020_s2] sm:$0x3] %vm15_vm0, %v357_v61  ;;  %2932 = vmatmul.mubr.msk.f32.vlgmr.msra.gmra.mrb[4].mxu0 %vm40_vm2, %v357_v61  ;;  %2943 = vmatmul.mubr.msk.f32.vlgmr.msra.gmra.mrb[4].mxu1 %vm40_vm2, %v357_v61 }
 0x10e   :  { %3269 = vmatpush3.bf16.msra.mxu0 %v3631_v19  ;;  %3275 = vmatpush3.bf16.msra.mxu1 %v3635_v20 }
 0x10f   :  { %3270 = vmatprep.subr.bf16.mxu0 %v3554_v0  ;;  %3276 = vmatprep.subr.bf16.mxu1 %v3554_v0 }
 0x110   :  { %2953 = vmatprep.mubr.msk.f32.mxu0 %vm3556_vm1, %v3555_v4  ;;  %2964 = vmatprep.mubr.msk.f32.mxu1 %vm3556_vm1, %v3555_v4 }
 0x112   :  { %3272 = vmatpush3.bf16.msra.mxu0 %v3653_v25  ;;  %3278 = vmatpush3.bf16.msra.mxu1 %v3657_v26 }
 0x113   :  { %3279 = vmatprep.subr.bf16.mxu0 %v3554_v0  ;;  %3285 = vmatprep.subr.bf16.mxu1 %v3554_v0 }
 0x115   :  { %2954 = vmatmul.mubr.msk.f32.vlgmr.msra.gmra.mrb[6].mxu0 %vm40_vm2, %v357_v61  ;;  %2965 = vmatmul.mubr.msk.f32.vlgmr.msra.gmra.mrb[6].mxu1 %vm40_vm2, %v357_v61 }
 0x116   :  { %3281 = vmatpush3.bf16.msra.mxu0 %v3587_v5  ;;  %3287 = vmatpush3.bf16.msra.mxu1 %v3602_v9 }
 0x117   :  { %3282 = vmatprep.subr.bf16.mxu0 %v3554_v0  ;;  %3288 = vmatprep.subr.bf16.mxu1 %v3554_v0 }
 0x118   :  { %2975 = vmatprep.mubr.msk.f32.mxu0 %vm3556_vm1, %v3555_v4  ;;  %2986 = vmatprep.mubr.msk.f32.mxu1 %vm3556_vm1, %v3555_v4 }
 0x11a   :  { %3284 = vmatpush3.bf16.msra.mxu0 %v3611_v12  ;;  %3290 = vmatpush3.bf16.msra.mxu1 %v3615_v13 }
 0x11b   :  { %3291 = vmatprep.subr.bf16.mxu0 %v3554_v0  ;;  %3297 = vmatprep.subr.bf16.mxu1 %v3554_v0 }
 0x1e0   :  { %v431_v1 = vpop.f32.mrb[4].mxu0  ;;  %v510_v2 = vpop.f32.mrb[4].mxu1 }
 0x1e1   :  { %v435_v3 = vadd.f32 %v2635_v62, %v431_v1  ;;  %v514_v6 = vadd.f32 %v2638_v63, %v510_v2  ;;  %v2933_v7 = vpop.f32.mrb[5].mxu0  ;;  %v2944_v8 = vpop.f32.mrb[5].mxu1 }
 0x1e3   :  { %v2637_v10 = vmul.f32 -1.442695, %v435_v3  ;;  %v2640_v11 = vmul.f32 -1.442695, %v514_v6 }
 0x1e5   :  { %3442 = vpow2.f32 %v2637_v10 }
 0x1e6   :  { %3444 = vpow2.f32 %v2640_v11 }
 0x1e8   :  { %v589_v15 = vpop.f32.mrb[6].mxu0  ;;  %v663_v16 = vpop.f32.mrb[6].mxu1 }
 0x1e9   :  { %v667_v17 = vadd.f32 %v2643_v14, %v663_v16  ;;  %v2955_v18 = vpop.f32.mrb[7].mxu0  ;;  %v2966_v21 = vpop.f32.mrb[7].mxu1  ;;  %v593_v24 = vadd.f32 %v2641_v22, %v589_v15 }
 0x1ea   :  { %v2659_v18 = vld [vmem:[%s4019_s0 + $0x6] sm:$0x3]  ;;  %v2662_v21 = vld [vmem:[%s4019_s0 + $0x16] sm:$0x3] }
 0x1eb   :  { %v2645_v23 = vmul.f32 -1.442695, %v667_v17 }
 0x1ed   :  { %3446 = vpow2.f32 %v2645_v23 }
 0x1ee   :  { %3448 = vtanh.f32 %v593_v24 }
 0x1ef   :  { %v3443_v27 = vpop.eup %3442 }
 0x1f0   :  { %v3445_v28 = vpop.eup %3444  ;;  %v439_v29 = vadd.f32 1.0, %v3443_v27 }
 0x1f1   :  { %v518_v30 = vadd.f32 1.0, %v3445_v28 }
 0x1f2   :  { %3450 = vrcp.f32 %v439_v29 }
 0x1f3   :  { %3452 = vrcp.f32 %v518_v30 }
 0x1f7   :  { %v3447_v31 = vpop.eup %3446 }
 0x1f8   :  { %v3449_v32 = vpop.eup %3448  ;;  %v671_v36 = vadd.f32 1.0, %v3447_v31 }
 0x1fa   :  { %3454 = vrcp.f32 %v671_v36 }
 0x1fc   :  { %v3451_v33 = vpop.eup %3450 }
 0x1fd   :  { %v3453_v34 = vpop.eup %3452  ;;  %v675_v35 = vmul.f32 %v3451_v33, %v3449_v32  ;;  %v2667_v32 = vld [vmem:[%s4019_s0 + $0x36] sm:$0x3] }
 0x1fe   :  { %v674_v37 = vmul.f32 %v3453_v34, %v3694_v58  ;;  %v2653_v58 = vld [vmem:[%s4019_s0 + $0x24] sm:$0x3] }
 0x200   :  { %v3742_v38 = vadd.f32 %v675_v35, %v674_v37 }
 0x202   :  { %3456 = vtanh.f32 %v3742_v38 }
 0x204   :  { %v3455_v39 = vpop.eup %3454 }
 0x20c   :  { %v3457_v40 = vpop.eup %3456 }
 0x20d   :  { %v678_v41 = vmul.f32 %v3457_v40, %v3455_v39 }
 0x20f   :  { %2646 = vst.msk [vmem:[%s4020_s2 + $0x2] sm:$0x3] %vm15_vm0, %v678_v41  ;;  %2976 = vmatmul.mubr.msk.f32.vlgmr.msra.gmra.mrb[8].mxu0 %vm40_vm2, %v678_v41  ;;  %2987 = vmatmul.mubr.msk.f32.vlgmr.msra.gmra.mrb[8].mxu1 %vm40_vm2, %v678_v41 }
 0x210   :  { %3293 = vmatpush3.bf16.msra.mxu0 %v3631_v19  ;;  %3299 = vmatpush3.bf16.msra.mxu1 %v3635_v20 }
 0x211   :  { %3294 = vmatprep.subr.bf16.mxu0 %v3554_v0  ;;  %3300 = vmatprep.subr.bf16.mxu1 %v3554_v0 }
 0x212   :  { %2997 = vmatprep.mubr.msk.f32.mxu0 %vm3556_vm1, %v3555_v4  ;;  %3008 = vmatprep.mubr.msk.f32.mxu1 %vm3556_vm1, %v3555_v4 }
 0x214   :  { %3296 = vmatpush3.bf16.msra.mxu0 %v3653_v25  ;;  %3302 = vmatpush3.bf16.msra.mxu1 %v3657_v26 }
 0x215   :  { %3303 = vmatprep.subr.bf16.mxu0 %v3554_v0  ;;  %3309 = vmatprep.subr.bf16.mxu1 %v3554_v0 }
 0x217   :  { %2998 = vmatmul.mubr.msk.f32.vlgmr.msra.gmra.mrb[10].mxu0 %vm40_vm2, %v678_v41  ;;  %3009 = vmatmul.mubr.msk.f32.vlgmr.msra.gmra.mrb[10].mxu1 %vm40_vm2, %v678_v41 }
 0x218   :  { %3305 = vmatpush3.bf16.msra.mxu0 %v3587_v5  ;;  %3311 = vmatpush3.bf16.msra.mxu1 %v3602_v9 }
 0x219   :  { %3306 = vmatprep.subr.bf16.mxu0 %v3554_v0  ;;  %3312 = vmatprep.subr.bf16.mxu1 %v3554_v0 }
 0x21a   :  { %3019 = vmatprep.mubr.msk.f32.mxu0 %vm3556_vm1, %v3555_v4  ;;  %3030 = vmatprep.mubr.msk.f32.mxu1 %vm3556_vm1, %v3555_v4 }
 0x21c   :  { %3308 = vmatpush3.bf16.msra.mxu0 %v3611_v12  ;;  %3314 = vmatpush3.bf16.msra.mxu1 %v3615_v13 }
 0x21d   :  { %3315 = vmatprep.subr.bf16.mxu0 %v3554_v0  ;;  %3321 = vmatprep.subr.bf16.mxu1 %v3554_v0 }
 0x2e2   :  { %v752_v44 = vpop.f32.mrb[8].mxu0  ;;  %v831_v45 = vpop.f32.mrb[8].mxu1 }
 0x2e3   :  { %v756_v46 = vadd.f32 %v2647_v42, %v752_v44  ;;  %v835_v47 = vadd.f32 %v2650_v43, %v831_v45  ;;  %v2977_v48 = vpop.f32.mrb[9].mxu0  ;;  %v2988_v49 = vpop.f32.mrb[9].mxu1 }
 0x2e5   :  { %v2649_v50 = vmul.f32 -1.442695, %v756_v46  ;;  %v2652_v51 = vmul.f32 -1.442695, %v835_v47 }
 0x2e7   :  { %3458 = vpow2.f32 %v2649_v50 }
 0x2e8   :  { %3460 = vpow2.f32 %v2652_v51 }
 0x2ea   :  { %v910_v53 = vpop.f32.mrb[10].mxu0  ;;  %v984_v54 = vpop.f32.mrb[10].mxu1 }
 0x2eb   :  { %v988_v55 = vadd.f32 %v2655_v52, %v984_v54  ;;  %v2999_v56 = vpop.f32.mrb[11].mxu0  ;;  %v3010_v57 = vpop.f32.mrb[11].mxu1  ;;  %v914_v60 = vadd.f32 %v2653_v58, %v910_v53 }
 0x2ec   :  { %v2671_v56 = vld [vmem:[%s4019_s0 + $0x8] sm:$0x3]  ;;  %v2674_v57 = vld [vmem:[%s4019_s0 + $0x18] sm:$0x3] }
 0x2ed   :  { %v2657_v59 = vmul.f32 -1.442695, %v988_v55 }
 0x2ef   :  { %3462 = vpow2.f32 %v2657_v59 }
 0x2f0   :  { %3464 = vtanh.f32 %v914_v60 }
 0x2f1   :  { %v3459_v61 = vpop.eup %3458 }
 0x2f2   :  { %v3461_v62 = vpop.eup %3460  ;;  %v760_v63 = vadd.f32 1.0, %v3459_v61 }
 0x2f3   :  { %v839_v1 = vadd.f32 1.0, %v3461_v62 }
 0x2f4   :  { %3466 = vrcp.f32 %v760_v63 }
 0x2f5   :  { %3468 = vrcp.f32 %v839_v1 }
 0x2f9   :  { %v3463_v2 = vpop.eup %3462 }
 0x2fa   :  { %v3465_v3 = vpop.eup %3464  ;;  %v992_v10 = vadd.f32 1.0, %v3463_v2 }
 0x2fc   :  { %3470 = vrcp.f32 %v992_v10 }
 0x2fe   :  { %v3467_v6 = vpop.eup %3466 }
 0x2ff   :  { %v3469_v7 = vpop.eup %3468  ;;  %v996_v8 = vmul.f32 %v3467_v6, %v3465_v3  ;;  %v2679_v3 = vld [vmem:[%s4019_s0 + $0x38] sm:$0x3] }
 0x300   :  { %v995_v11 = vmul.f32 %v3469_v7, %v3742_v38  ;;  %v2665_v38 = vld [vmem:[%s4019_s0 + $0x26] sm:$0x3] }
 0x302   :  { %v3790_v14 = vadd.f32 %v996_v8, %v995_v11 }
 0x304   :  { %3472 = vtanh.f32 %v3790_v14 }
 0x306   :  { %v3471_v15 = vpop.eup %3470 }
 0x30e   :  { %v3473_v16 = vpop.eup %3472 }
 0x30f   :  { %v999_v17 = vmul.f32 %v3473_v16, %v3471_v15 }
 0x311   :  { %2658 = vst.msk [vmem:[%s4020_s2 + $0x4] sm:$0x3] %vm15_vm0, %v999_v17  ;;  %3020 = vmatmul.mubr.msk.f32.vlgmr.msra.gmra.mrb[12].mxu0 %vm40_vm2, %v999_v17  ;;  %3031 = vmatmul.mubr.msk.f32.vlgmr.msra.gmra.mrb[12].mxu1 %vm40_vm2, %v999_v17 }
 0x312   :  { %3317 = vmatpush3.bf16.msra.mxu0 %v3631_v19  ;;  %3323 = vmatpush3.bf16.msra.mxu1 %v3635_v20 }
 0x313   :  { %3318 = vmatprep.subr.bf16.mxu0 %v3554_v0  ;;  %3324 = vmatprep.subr.bf16.mxu1 %v3554_v0 }
 0x314   :  { %3041 = vmatprep.mubr.msk.f32.mxu0 %vm3556_vm1, %v3555_v4  ;;  %3052 = vmatprep.mubr.msk.f32.mxu1 %vm3556_vm1, %v3555_v4 }
 0x316   :  { %3320 = vmatpush3.bf16.msra.mxu0 %v3653_v25  ;;  %3326 = vmatpush3.bf16.msra.mxu1 %v3657_v26 }
 0x317   :  { %3327 = vmatprep.subr.bf16.mxu0 %v3554_v0  ;;  %3333 = vmatprep.subr.bf16.mxu1 %v3554_v0 }
 0x319   :  { %3042 = vmatmul.mubr.msk.f32.vlgmr.msra.gmra.mrb[14].mxu0 %vm40_vm2, %v999_v17  ;;  %3053 = vmatmul.mubr.msk.f32.vlgmr.msra.gmra.mrb[14].mxu1 %vm40_vm2, %v999_v17 }
 0x31a   :  { %3329 = vmatpush3.bf16.msra.mxu0 %v3587_v5  ;;  %3335 = vmatpush3.bf16.msra.mxu1 %v3602_v9 }
 0x31b   :  { %3330 = vmatprep.subr.bf16.mxu0 %v3554_v0  ;;  %3336 = vmatprep.subr.bf16.mxu1 %v3554_v0 }
 0x31c   :  { %3063 = vmatprep.mubr.msk.f32.mxu0 %vm3556_vm1, %v3555_v4  ;;  %3074 = vmatprep.mubr.msk.f32.mxu1 %vm3556_vm1, %v3555_v4 }
 0x31e   :  { %3332 = vmatpush3.bf16.msra.mxu0 %v3611_v12  ;;  %3338 = vmatpush3.bf16.msra.mxu1 %v3615_v13 }
 0x31f   :  { %3339 = vmatprep.subr.bf16.mxu0 %v3554_v0  ;;  %3345 = vmatprep.subr.bf16.mxu1 %v3554_v0 }
 0x3e4   :  { %v1073_v22 = vpop.f32.mrb[12].mxu0  ;;  %v1152_v23 = vpop.f32.mrb[12].mxu1 }
 0x3e5   :  { %v1077_v24 = vadd.f32 %v2659_v18, %v1073_v22  ;;  %v1156_v27 = vadd.f32 %v2662_v21, %v1152_v23  ;;  %v3021_v28 = vpop.f32.mrb[13].mxu0  ;;  %v3032_v29 = vpop.f32.mrb[13].mxu1 }
 0x3e7   :  { %v2661_v30 = vmul.f32 -1.442695, %v1077_v24  ;;  %v2664_v31 = vmul.f32 -1.442695, %v1156_v27 }
 0x3e9   :  { %3474 = vpow2.f32 %v2661_v30 }
 0x3ea   :  { %3476 = vpow2.f32 %v2664_v31 }
 0x3ec   :  { %v1231_v33 = vpop.f32.mrb[14].mxu0  ;;  %v1305_v34 = vpop.f32.mrb[14].mxu1 }
 0x3ed   :  { %v1309_v35 = vadd.f32 %v2667_v32, %v1305_v34  ;;  %v3043_v36 = vpop.f32.mrb[15].mxu0  ;;  %v3054_v37 = vpop.f32.mrb[15].mxu1  ;;  %v1235_v40 = vadd.f32 %v2665_v38, %v1231_v33 }
 0x3ee   :  { %v2683_v36 = vld [vmem:[%s4019_s0 + $0xa] sm:$0x3]  ;;  %v2686_v37 = vld [vmem:[%s4019_s0 + $0x1a] sm:$0x3] }
 0x3ef   :  { %v2669_v39 = vmul.f32 -1.442695, %v1309_v35 }
 0x3f1   :  { %3478 = vpow2.f32 %v2669_v39 }
 0x3f2   :  { %3480 = vtanh.f32 %v1235_v40 }
 0x3f3   :  { %v3475_v41 = vpop.eup %3474 }
 0x3f4   :  { %v3477_v42 = vpop.eup %3476  ;;  %v1081_v43 = vadd.f32 1.0, %v3475_v41 }
 0x3f5   :  { %v1160_v44 = vadd.f32 1.0, %v3477_v42 }
 0x3f6   :  { %3482 = vrcp.f32 %v1081_v43 }
 0x3f7   :  { %3484 = vrcp.f32 %v1160_v44 }
 0x3fb   :  { %v3479_v45 = vpop.eup %3478 }
 0x3fc   :  { %v3481_v46 = vpop.eup %3480  ;;  %v1313_v50 = vadd.f32 1.0, %v3479_v45 }
 0x3fe   :  { %3486 = vrcp.f32 %v1313_v50 }
 0x400   :  { %v3483_v47 = vpop.eup %3482 }
 0x401   :  { %v3485_v48 = vpop.eup %3484  ;;  %v1317_v49 = vmul.f32 %v3483_v47, %v3481_v46  ;;  %v2691_v46 = vld [vmem:[%s4019_s0 + $0x3a] sm:$0x3] }
 0x402   :  { %v1316_v51 = vmul.f32 %v3485_v48, %v3790_v14  ;;  %v2677_v14 = vld [vmem:[%s4019_s0 + $0x28] sm:$0x3] }
 0x404   :  { %v3838_v52 = vadd.f32 %v1317_v49, %v1316_v51 }
 0x406   :  { %3488 = vtanh.f32 %v3838_v52 }
 0x408   :  { %v3487_v53 = vpop.eup %3486 }
 0x410   :  { %v3489_v54 = vpop.eup %3488 }
 0x411   :  { %v1320_v55 = vmul.f32 %v3489_v54, %v3487_v53 }
 0x413   :  { %2670 = vst.msk [vmem:[%s4020_s2 + $0x6] sm:$0x3] %vm15_vm0, %v1320_v55  ;;  %3064 = vmatmul.mubr.msk.f32.vlgmr.msra.gmra.mrb[16].mxu0 %vm40_vm2, %v1320_v55  ;;  %3075 = vmatmul.mubr.msk.f32.vlgmr.msra.gmra.mrb[16].mxu1 %vm40_vm2, %v1320_v55 }
 0x414   :  { %3341 = vmatpush3.bf16.msra.mxu0 %v3631_v19  ;;  %3347 = vmatpush3.bf16.msra.mxu1 %v3635_v20 }
 0x415   :  { %3342 = vmatprep.subr.bf16.mxu0 %v3554_v0  ;;  %3348 = vmatprep.subr.bf16.mxu1 %v3554_v0 }
 0x416   :  { %3085 = vmatprep.mubr.msk.f32.mxu0 %vm3556_vm1, %v3555_v4  ;;  %3096 = vmatprep.mubr.msk.f32.mxu1 %vm3556_vm1, %v3555_v4 }
 0x418   :  { %3344 = vmatpush3.bf16.msra.mxu0 %v3653_v25  ;;  %3350 = vmatpush3.bf16.msra.mxu1 %v3657_v26 }
 0x419   :  { %3351 = vmatprep.subr.bf16.mxu0 %v3554_v0  ;;  %3357 = vmatprep.subr.bf16.mxu1 %v3554_v0 }
 0x41b   :  { %3086 = vmatmul.mubr.msk.f32.vlgmr.msra.gmra.mrb[18].mxu0 %vm40_vm2, %v1320_v55  ;;  %3097 = vmatmul.mubr.msk.f32.vlgmr.msra.gmra.mrb[18].mxu1 %vm40_vm2, %v1320_v55 }
 0x41c   :  { %3353 = vmatpush3.bf16.msra.mxu0 %v3587_v5  ;;  %3359 = vmatpush3.bf16.msra.mxu1 %v3602_v9 }
 0x41d   :  { %3354 = vmatprep.subr.bf16.mxu0 %v3554_v0  ;;  %3360 = vmatprep.subr.bf16.mxu1 %v3554_v0 }
 0x41e   :  { %3107 = vmatprep.mubr.msk.f32.mxu0 %vm3556_vm1, %v3555_v4  ;;  %3118 = vmatprep.mubr.msk.f32.mxu1 %vm3556_vm1, %v3555_v4 }
 0x420   :  { %3356 = vmatpush3.bf16.msra.mxu0 %v3611_v12  ;;  %3362 = vmatpush3.bf16.msra.mxu1 %v3615_v13 }
 0x421   :  { %3363 = vmatprep.subr.bf16.mxu0 %v3554_v0  ;;  %3369 = vmatprep.subr.bf16.mxu1 %v3554_v0 }
 0x4e6   :  { %v1394_v58 = vpop.f32.mrb[16].mxu0  ;;  %v1473_v59 = vpop.f32.mrb[16].mxu1 }
 0x4e7   :  { %v1398_v60 = vadd.f32 %v2671_v56, %v1394_v58  ;;  %v1477_v61 = vadd.f32 %v2674_v57, %v1473_v59  ;;  %v3065_v62 = vpop.f32.mrb[17].mxu0  ;;  %v3076_v63 = vpop.f32.mrb[17].mxu1 }
 0x4e9   :  { %v2673_v1 = vmul.f32 -1.442695, %v1398_v60  ;;  %v2676_v2 = vmul.f32 -1.442695, %v1477_v61 }
 0x4eb   :  { %3490 = vpow2.f32 %v2673_v1 }
 0x4ec   :  { %3492 = vpow2.f32 %v2676_v2 }
 0x4ee   :  { %v1552_v6 = vpop.f32.mrb[18].mxu0  ;;  %v1626_v7 = vpop.f32.mrb[18].mxu1 }
 0x4ef   :  { %v1630_v8 = vadd.f32 %v2679_v3, %v1626_v7  ;;  %v3087_v10 = vpop.f32.mrb[19].mxu0  ;;  %v3098_v11 = vpop.f32.mrb[19].mxu1  ;;  %v1556_v16 = vadd.f32 %v2677_v14, %v1552_v6 }
 0x4f1   :  { %v2681_v15 = vmul.f32 -1.442695, %v1630_v8 }
 0x4f3   :  { %3494 = vpow2.f32 %v2681_v15 }
 0x4f4   :  { %3496 = vtanh.f32 %v1556_v16 }
 0x4f5   :  { %v3491_v17 = vpop.eup %3490 }
 0x4f6   :  { %v3493_v18 = vpop.eup %3492  ;;  %v1402_v21 = vadd.f32 1.0, %v3491_v17 }
 0x4f7   :  { %v1481_v22 = vadd.f32 1.0, %v3493_v18  ;;  %v2703_v18 = vld [vmem:[%s4019_s0 + $0x3c] sm:$0x3] }
 0x4f8   :  { %3498 = vrcp.f32 %v1402_v21 }
 0x4f9   :  { %3500 = vrcp.f32 %v1481_v22 }
 0x4fd   :  { %v3495_v23 = vpop.eup %3494 }
 0x4fe   :  { %v3497_v24 = vpop.eup %3496  ;;  %v1634_v30 = vadd.f32 1.0, %v3495_v23 }
 0x500   :  { %3502 = vrcp.f32 %v1634_v30 }
 0x502   :  { %v3499_v27 = vpop.eup %3498 }
 0x503   :  { %v3501_v28 = vpop.eup %3500  ;;  %v1638_v29 = vmul.f32 %v3499_v27, %v3497_v24 }
 0x504   :  { %v1637_v31 = vmul.f32 %v3501_v28, %v3838_v52  ;;  %v2689_v52 = vld [vmem:[%s4019_s0 + $0x2a] sm:$0x3]  ;;  %v2701_v28 = vld [vmem:[%s4019_s0 + $0x2c] sm:$0x3] }
 0x506   :  { %v3886_v32 = vadd.f32 %v1638_v29, %v1637_v31 }
 0x508   :  { %3504 = vtanh.f32 %v3886_v32 }
 0x50a   :  { %v3503_v33 = vpop.eup %3502 }
 0x512   :  { %v3505_v34 = vpop.eup %3504 }
 0x513   :  { %v1641_v35 = vmul.f32 %v3505_v34, %v3503_v33 }
 0x515   :  { %2682 = vst.msk [vmem:[%s4020_s2 + $0x8] sm:$0x3] %vm15_vm0, %v1641_v35  ;;  %3108 = vmatmul.mubr.msk.f32.vlgmr.msra.gmra.mrb[20].mxu0 %vm40_vm2, %v1641_v35  ;;  %3119 = vmatmul.mubr.msk.f32.vlgmr.msra.gmra.mrb[20].mxu1 %vm40_vm2, %v1641_v35 }
 0x516   :  { %3365 = vmatpush3.bf16.msra.mxu0 %v3631_v19  ;;  %3371 = vmatpush3.bf16.msra.mxu1 %v3635_v20 }
 0x517   :  { %3366 = vmatprep.subr.bf16.mxu0 %v3554_v0  ;;  %3372 = vmatprep.subr.bf16.mxu1 %v3554_v0 }
 0x518   :  { %3129 = vmatprep.mubr.msk.f32.mxu0 %vm3556_vm1, %v3555_v4  ;;  %3140 = vmatprep.mubr.msk.f32.mxu1 %vm3556_vm1, %v3555_v4 }
 0x51a   :  { %3368 = vmatpush3.bf16.msra.mxu0 %v3653_v25  ;;  %3374 = vmatpush3.bf16.msra.mxu1 %v3657_v26 }
 0x51b   :  { %3375 = vmatprep.subr.bf16.mxu0 %v3554_v0  ;;  %3381 = vmatprep.subr.bf16.mxu1 %v3554_v0 }
 0x51d   :  { %3130 = vmatmul.mubr.msk.f32.vlgmr.msra.gmra.mrb[22].mxu0 %vm40_vm2, %v1641_v35  ;;  %3141 = vmatmul.mubr.msk.f32.vlgmr.msra.gmra.mrb[22].mxu1 %vm40_vm2, %v1641_v35 }
 0x51e   :  { %3377 = vmatpush3.bf16.msra.mxu0 %v3587_v5  ;;  %3383 = vmatpush3.bf16.msra.mxu1 %v3602_v9 }
 0x51f   :  { %3378 = vmatprep.subr.bf16.mxu0 %v3554_v0  ;;  %3384 = vmatprep.subr.bf16.mxu1 %v3554_v0 }
 0x520   :  { %3151 = vmatprep.mubr.msk.f32.mxu0 %vm3556_vm1, %v3555_v4  ;;  %3162 = vmatprep.mubr.msk.f32.mxu1 %vm3556_vm1, %v3555_v4 }
 0x522   :  { %3380 = vmatpush3.bf16.msra.mxu0 %v3611_v12  ;;  %3386 = vmatpush3.bf16.msra.mxu1 %v3615_v13 }
 0x523   :  { %3387 = vmatprep.subr.bf16.mxu0 %v3554_v0  ;;  %3393 = vmatprep.subr.bf16.mxu1 %v3554_v0 }
 0x5e8   :  { %v1715_v38 = vpop.f32.mrb[20].mxu0  ;;  %v1794_v39 = vpop.f32.mrb[20].mxu1 }
 0x5e9   :  { %v1719_v40 = vadd.f32 %v2683_v36, %v1715_v38  ;;  %v1798_v41 = vadd.f32 %v2686_v37, %v1794_v39  ;;  %v3109_v42 = vpop.f32.mrb[21].mxu0  ;;  %v3120_v43 = vpop.f32.mrb[21].mxu1 }
 0x5eb   :  { %v2685_v44 = vmul.f32 -1.442695, %v1719_v40  ;;  %v2688_v45 = vmul.f32 -1.442695, %v1798_v41 }
 0x5ed   :  { %3506 = vpow2.f32 %v2685_v44 }
 0x5ee   :  { %3508 = vpow2.f32 %v2688_v45 }
 0x5f0   :  { %v1873_v47 = vpop.f32.mrb[22].mxu0  ;;  %v1947_v48 = vpop.f32.mrb[22].mxu1 }
 0x5f1   :  { %v1951_v49 = vadd.f32 %v2691_v46, %v1947_v48  ;;  %v3131_v50 = vpop.f32.mrb[23].mxu0  ;;  %v3142_v51 = vpop.f32.mrb[23].mxu1  ;;  %v1877_v54 = vadd.f32 %v2689_v52, %v1873_v47 }
 0x5f2   :  { %v2715_v50 = vld [vmem:[%s4019_s0 + $0x3e] sm:$0x3] }
 0x5f3   :  { %v2693_v53 = vmul.f32 -1.442695, %v1951_v49 }
 0x5f5   :  { %3510 = vpow2.f32 %v2693_v53 }
 0x5f6   :  { %3512 = vtanh.f32 %v1877_v54 }
 0x5f7   :  { %v3507_v55 = vpop.eup %3506 }
 0x5f8   :  { %v3509_v56 = vpop.eup %3508  ;;  %v1723_v57 = vadd.f32 1.0, %v3507_v55 }
 0x5f9   :  { %v1802_v58 = vadd.f32 1.0, %v3509_v56  ;;  %v2713_v56 = vld [vmem:[%s4019_s0 + $0x2e] sm:$0x3] }
 0x5fa   :  { %3514 = vrcp.f32 %v1723_v57 }
 0x5fb   :  { %3516 = vrcp.f32 %v1802_v58 }
 0x5ff   :  { %v3511_v59 = vpop.eup %3510 }
 0x600   :  { %v3513_v60 = vpop.eup %3512  ;;  %v1955_v1 = vadd.f32 1.0, %v3511_v59 }
 0x602   :  { %3518 = vrcp.f32 %v1955_v1 }
 0x604   :  { %v3515_v61 = vpop.eup %3514 }
 0x605   :  { %v3517_v62 = vpop.eup %3516  ;;  %v1959_v63 = vmul.f32 %v3515_v61, %v3513_v60 }
 0x606   :  { %v1958_v2 = vmul.f32 %v3517_v62, %v3886_v32 }
 0x608   :  { %v3934_v3 = vadd.f32 %v1959_v63, %v1958_v2 }
 0x60a   :  { %3520 = vtanh.f32 %v3934_v3 }
 0x60c   :  { %v3519_v6 = vpop.eup %3518 }
 0x614   :  { %v3521_v7 = vpop.eup %3520 }
 0x615   :  { %v1962_v8 = vmul.f32 %v3521_v7, %v3519_v6 }
 0x617   :  { %2694 = vst.msk [vmem:[%s4020_s2 + $0xa] sm:$0x3] %vm15_vm0, %v1962_v8  ;;  %3152 = vmatmul.mubr.msk.f32.vlgmr.msra.gmra.mrb[24].mxu0 %vm40_vm2, %v1962_v8  ;;  %3163 = vmatmul.mubr.msk.f32.vlgmr.msra.gmra.mrb[24].mxu1 %vm40_vm2, %v1962_v8 }
 0x618   :  { %3389 = vmatpush3.bf16.msra.mxu0 %v3631_v19  ;;  %3395 = vmatpush3.bf16.msra.mxu1 %v3635_v20 }
 0x619   :  { %3390 = vmatprep.subr.bf16.mxu0 %v3554_v0  ;;  %3396 = vmatprep.subr.bf16.mxu1 %v3554_v0 }
 0x61a   :  { %3173 = vmatprep.mubr.msk.f32.mxu0 %vm3556_vm1, %v3555_v4  ;;  %3184 = vmatprep.mubr.msk.f32.mxu1 %vm3556_vm1, %v3555_v4 }
 0x61c   :  { %3392 = vmatpush3.bf16.msra.mxu0 %v3653_v25  ;;  %3398 = vmatpush3.bf16.msra.mxu1 %v3657_v26 }
 0x61d   :  { %3399 = vmatprep.subr.bf16.mxu0 %v3554_v0  ;;  %3405 = vmatprep.subr.bf16.mxu1 %v3554_v0 }
 0x61f   :  { %3174 = vmatmul.mubr.msk.f32.vlgmr.msra.gmra.mrb[26].mxu0 %vm40_vm2, %v1962_v8  ;;  %3185 = vmatmul.mubr.msk.f32.vlgmr.msra.gmra.mrb[26].mxu1 %vm40_vm2, %v1962_v8 }
 0x620   :  { %3401 = vmatpush3.bf16.msra.mxu0 %v3587_v5  ;;  %3407 = vmatpush3.bf16.msra.mxu1 %v3602_v9  ;;  %v2695_v5 = vld [vmem:[%s4019_s0 + $0xc] sm:$0x3]  ;;  %v2698_v9 = vld [vmem:[%s4019_s0 + $0x1c] sm:$0x3] }
 0x621   :  { %3402 = vmatprep.subr.bf16.mxu0 %v3554_v0  ;;  %3408 = vmatprep.subr.bf16.mxu1 %v3554_v0 }
 0x622   :  { %3195 = vmatprep.mubr.msk.f32.mxu0 %vm3556_vm1, %v3555_v4  ;;  %3206 = vmatprep.mubr.msk.f32.mxu1 %vm3556_vm1, %v3555_v4 }
 0x624   :  { %3404 = vmatpush3.bf16.msra.mxu0 %v3611_v12  ;;  %3410 = vmatpush3.bf16.msra.mxu1 %v3615_v13 }
 0x625   :  { %3411 = vmatprep.subr.bf16.mxu0 %v3554_v0  ;;  %3417 = vmatprep.subr.bf16.mxu1 %v3554_v0 }
 0x6ea   :  { %v2036_v10 = vpop.f32.mrb[24].mxu0  ;;  %v2115_v11 = vpop.f32.mrb[24].mxu1 }
 0x6eb   :  { %v2040_v14 = vadd.f32 %v2695_v5, %v2036_v10  ;;  %v2119_v15 = vadd.f32 %v2698_v9, %v2115_v11  ;;  %v3153_v16 = vpop.f32.mrb[25].mxu0  ;;  %v3164_v12 = vpop.f32.mrb[25].mxu1 }
 0x6ed   :  { %v2697_v17 = vmul.f32 -1.442695, %v2040_v14  ;;  %v2700_v13 = vmul.f32 -1.442695, %v2119_v15 }
 0x6ef   :  { %3522 = vpow2.f32 %v2697_v17 }
 0x6f0   :  { %3524 = vpow2.f32 %v2700_v13 }
 0x6f2   :  { %v2194_v21 = vpop.f32.mrb[26].mxu0  ;;  %v2268_v22 = vpop.f32.mrb[26].mxu1 }
 0x6f3   :  { %v2272_v23 = vadd.f32 %v2703_v18, %v2268_v22  ;;  %v3175_v24 = vpop.f32.mrb[27].mxu0  ;;  %v3186_v27 = vpop.f32.mrb[27].mxu1  ;;  %v2198_v30 = vadd.f32 %v2701_v28, %v2194_v21 }
 0x6f5   :  { %v2705_v29 = vmul.f32 -1.442695, %v2272_v23 }
 0x6f7   :  { %3526 = vpow2.f32 %v2705_v29 }
 0x6f8   :  { %3528 = vtanh.f32 %v2198_v30 }
 0x6f9   :  { %v3523_v31 = vpop.eup %3522 }
 0x6fa   :  { %v3525_v32 = vpop.eup %3524  ;;  %v2044_v33 = vadd.f32 1.0, %v3523_v31 }
 0x6fb   :  { %v2123_v34 = vadd.f32 1.0, %v3525_v32 }
 0x6fc   :  { %3530 = vrcp.f32 %v2044_v33 }
 0x6fd   :  { %3532 = vrcp.f32 %v2123_v34 }
 0x701   :  { %v3527_v35 = vpop.eup %3526 }
 0x702   :  { %v3529_v36 = vpop.eup %3528  ;;  %v2276_v40 = vadd.f32 1.0, %v3527_v35 }
 0x704   :  { %3534 = vrcp.f32 %v2276_v40 }
 0x706   :  { %v3531_v37 = vpop.eup %3530 }
 0x707   :  { %v3533_v38 = vpop.eup %3532  ;;  %v2280_v39 = vmul.f32 %v3531_v37, %v3529_v36 }
 0x708   :  { %v2279_v41 = vmul.f32 %v3533_v38, %v3934_v3 }
 0x70a   :  { %v2281_v42 = vadd.f32 %v2280_v39, %v2279_v41 }
 0x70c   :  { %3536 = vtanh.f32 %v2281_v42 }
 0x70e   :  { %v3535_v43 = vpop.eup %3534 }
 0x716   :  { %v3537_v44 = vpop.eup %3536 }
 0x717   :  { %v2283_v45 = vmul.f32 %v3537_v44, %v3535_v43 }
 0x719   :  { %2706 = vst.msk [vmem:[%s4020_s2 + $0xc] sm:$0x3] %vm15_vm0, %v2283_v45  ;;  %3196 = vmatmul.mubr.msk.f32.vlgmr.msra.gmra.mrb[28].mxu0 %vm40_vm2, %v2283_v45  ;;  %3207 = vmatmul.mubr.msk.f32.vlgmr.msra.gmra.mrb[28].mxu1 %vm40_vm2, %v2283_v45 }
 0x71a   :  { %3413 = vmatpush3.bf16.msra.mxu0 %v3631_v19  ;;  %3419 = vmatpush3.bf16.msra.mxu1 %v3635_v20  ;;  %v2707_v19 = vld [vmem:[%s4019_s0 + $0xe] sm:$0x3] }
 0x71b   :  { %3414 = vmatprep.subr.bf16.mxu0 %v3554_v0  ;;  %3420 = vmatprep.subr.bf16.mxu1 %v3554_v0  ;;  %v2710_v0 = vld [vmem:[%s4019_s0 + $0x1e] sm:$0x3] }
 0x71c   :  { %3217 = vmatprep.mubr.msk.f32.mxu0 %vm3556_vm1, %v3555_v4  ;;  %3228 = vmatprep.mubr.msk.f32.mxu1 %vm3556_vm1, %v3555_v4 }
 0x71e   :  { %3416 = vmatpush3.bf16.msra.mxu0 %v3653_v25  ;;  %3422 = vmatpush3.bf16.msra.mxu1 %v3657_v26 }
 0x721   :  { %3218 = vmatmul.mubr.msk.f32.vlgmr.msra.gmra.mrb[30].mxu0 %vm40_vm2, %v2283_v45  ;;  %3229 = vmatmul.mubr.msk.f32.vlgmr.msra.gmra.mrb[30].mxu1 %vm40_vm2, %v2283_v45 }
 0x7ec   :  { %v2357_v20 = vpop.f32.mrb[28].mxu0  ;;  %v2436_v46 = vpop.f32.mrb[28].mxu1 }
 0x7ed   :  { %v2361_v47 = vadd.f32 %v2707_v19, %v2357_v20  ;;  %v2440_v4 = vadd.f32 %v2710_v0, %v2436_v46  ;;  %v3197_v48 = vpop.f32.mrb[29].mxu0  ;;  %v3208_v25 = vpop.f32.mrb[29].mxu1 }
 0x7ef   :  { %v2709_v49 = vmul.f32 -1.442695, %v2361_v47  ;;  %v2712_v26 = vmul.f32 -1.442695, %v2440_v4 }
 0x7f1   :  { %3538 = vpow2.f32 %v2709_v49 }
 0x7f2   :  { %3540 = vpow2.f32 %v2712_v26 }
 0x7f4   :  { %v2515_v51 = vpop.f32.mrb[30].mxu0  ;;  %v2589_v52 = vpop.f32.mrb[30].mxu1 }
 0x7f5   :  { %v2593_v53 = vadd.f32 %v2715_v50, %v2589_v52  ;;  %v3219_v54 = vpop.f32.mrb[31].mxu0  ;;  %v3230_v55 = vpop.f32.mrb[31].mxu1  ;;  %v2519_v58 = vadd.f32 %v2713_v56, %v2515_v51 }
 0x7f7   :  { %v2717_v57 = vmul.f32 -1.442695, %v2593_v53 }
 0x7f9   :  { %3542 = vpow2.f32 %v2717_v57 }
 0x7fa   :  { %3544 = vtanh.f32 %v2519_v58 }
 0x7fb   :  { %v3539_v59 = vpop.eup %3538 }
 0x7fc   :  { %v3541_v60 = vpop.eup %3540  ;;  %v2365_v61 = vadd.f32 1.0, %v3539_v59 }
 0x7fd   :  { %v2444_v62 = vadd.f32 1.0, %v3541_v60 }
 0x7fe   :  { %3546 = vrcp.f32 %v2365_v61 }
 0x7ff   :  { %3548 = vrcp.f32 %v2444_v62 }
 0x803   :  { %v3543_v63 = vpop.eup %3542 }
 0x804   :  { %v3545_v1 = vpop.eup %3544  ;;  %v2597_v7 = vadd.f32 1.0, %v3543_v63 }
 0x806   :  { %3550 = vrcp.f32 %v2597_v7 }
 0x808   :  { %v3547_v2 = vpop.eup %3546 }
 0x809   :  { %v3549_v3 = vpop.eup %3548  ;;  %v2601_v6 = vmul.f32 %v3547_v2, %v3545_v1 }
 0x80a   :  { %v2600_v8 = vmul.f32 %v3549_v3, %v2281_v42 }
 0x80c   :  { %v2602_v5 = vadd.f32 %v2601_v6, %v2600_v8 }
 0x80e   :  { %3552 = vtanh.f32 %v2602_v5  ;;  %2608 = vst.msk [vmem:[#allocation3] sm:$0x3] %vm15_vm0, %v2602_v5 }
 0x810   :  { %v3551_v9 = vpop.eup %3550 }
 0x818   :  { %v3553_v10 = vpop.eup %3552 }
 0x819   :  { %v2604_v11 = vmul.f32 %v3553_v10, %v3551_v9 }
 0x81b   :  { %2718 = vst.msk [vmem:[%s4020_s2 + $0xe] sm:$0x3] %vm15_vm0, %v2604_v11  ;;  %2607 = vst.msk [vmem:[#allocation2] sm:$0x3] %vm15_vm0, %v2604_v11 }

// kernel: residual_lstm_forward.20
= control target key start
LH: loop header
LB: loop body
LE: loop exit
PB: predicated region body
PF: predicated region fallthrough
CT: control target
= control target key end

     0   :  { %vm18_vm0 = vcmask 254976   ;;  %v3595_v0 = vmov 0.0|0.0   ;;  %v3596_v4 = vmov 0.0   ;;  %vm3597_vm1 = vmmov 0   ;;  %s4088_s1 = inlined_call_operand.vmem [shape: f32[4,32,32], index: 1, kind: input, shape index: {}]   ;;  %s4089_s0 = inlined_call_operand.vmem [shape: f32[4,8,2,32], index: 0, kind: input, shape index: {}]   ;;  %s4090_s2 = inlined_call_operand.vmem [shape: f32[8,2,32], index: 2, kind: input, shape index: {}]   ;;  %s4091_s3 = inlined_call_operand.vmem [shape: f32[8,2,32], index: 3, kind: output, shape index: {}]  }
   0x1   :  { %3272 = vmatprep.subr.bf16.mxu0 %v3595_v0  ;;  %3278 = vmatprep.subr.bf16.mxu1 %v3595_v0  ;;  %v21_v1 = vld [vmem:[%s4088_s1] sm:$0xff]  ;;  %v22_v2 = vld [vmem:[%s4088_s1 + $0x8] sm:$0xff]  ;;  %19 = vst.msk [vmem:[#allocation2] sm:$0x3] %vm18_vm0, %v3596_v4  ;;  %20 = vst.msk [vmem:[#allocation3] sm:$0x3] %vm18_vm0, %v3596_v4 }
   0x2   :  { %v2647_v3 = vld [vmem:[%s4088_s1 + $0x20] sm:$0xff]  ;;  %v3633_v5 = vpack.c.bf16 %v22_v2, %v21_v1  ;;  %v2648_v6 = vld [vmem:[%s4088_s1 + $0x28] sm:$0xff]  ;;  %v23_v7 = vld [vmem:[%s4088_s1 + $0x10] sm:$0xff]  ;;  %2928 = vmatprep.mubr.msk.f32.mxu0 %vm3597_vm1, %v3596_v4  ;;  %2939 = vmatprep.mubr.msk.f32.mxu1 %vm3597_vm1, %v3596_v4  ;;  %vm43_vm2 = vcmask 261120  }
   0x3   :  { %v24_v8 = vld [vmem:[%s4088_s1 + $0x18] sm:$0xff]  ;;  %v3648_v9 = vpack.c.bf16 %v2648_v6, %v2647_v3  ;;  %v2649_v10 = vld [vmem:[%s4088_s1 + $0x30] sm:$0xff]  ;;  %v2651_v14 = vld [vmem:[%s4088_s1 + $0x40] sm:$0xff] }
   0x4   :  { %v2650_v11 = vld [vmem:[%s4088_s1 + $0x38] sm:$0xff]  ;;  %3274 = vmatpush3.bf16.msra.mxu0 %v3633_v5  ;;  %v3657_v12 = vpack.c.bf16 %v24_v8, %v23_v7  ;;  %v2652_v15 = vld [vmem:[%s4088_s1 + $0x48] sm:$0xff]  ;;  %v2655_v16 = vld [vmem:[%s4088_s1 + $0x60] sm:$0xff] }
   0x5   :  { %3280 = vmatpush3.bf16.msra.mxu1 %v3648_v9  ;;  %3275 = vmatprep.subr.bf16.mxu0 %v3595_v0  ;;  %v3661_v13 = vpack.c.bf16 %v2650_v11, %v2649_v10  ;;  %v2656_v17 = vld [vmem:[%s4088_s1 + $0x68] sm:$0xff]  ;;  %v3677_v19 = vpack.c.bf16 %v2652_v15, %v2651_v14  ;;  %v2653_v21 = vld [vmem:[%s4088_s1 + $0x50] sm:$0xff]  ;;  %v2654_v22 = vld [vmem:[%s4088_s1 + $0x58] sm:$0xff] }
   0x6   :  { %3281 = vmatprep.subr.bf16.mxu1 %v3595_v0  ;;  %v3681_v20 = vpack.c.bf16 %v2656_v17, %v2655_v16  ;;  %v2657_v23 = vld [vmem:[%s4088_s1 + $0x70] sm:$0xff]  ;;  %v2658_v24 = vld [vmem:[%s4088_s1 + $0x78] sm:$0xff]  ;;  %v3699_v25 = vpack.c.bf16 %v2654_v22, %v2653_v21  ;;  %v42_v27 = vld [vmem:[%s4089_s0] sm:$0x3] }
   0x7   :  { %v3703_v26 = vpack.c.bf16 %v2658_v24, %v2657_v23  ;;  %v2661_v28 = vld [vmem:[%s4089_s0 + $0x10] sm:$0x3]  ;;  %v2664_v39 = vld [vmem:[%s4089_s0 + $0x20] sm:$0x3]  ;;  %v2669_v2 = vld [vmem:[%s4089_s0 + $0x2] sm:$0x3] }
   0x8   :  { %3277 = vmatpush3.bf16.msra.mxu0 %v3657_v12  ;;  %v40_v18 = vld [vmem:[#allocation2] sm:$0x3]  ;;  %v2666_v37 = vld [vmem:[%s4089_s0 + $0x30] sm:$0x3]  ;;  %v41_v52 = vld [vmem:[#allocation3] sm:$0x3] }
   0x9   :  { %3283 = vmatpush3.bf16.msra.mxu1 %v3661_v13  ;;  %3284 = vmatprep.subr.bf16.mxu0 %v3595_v0  ;;  %v361_v61 = vld [vmem:[%s4090_s2] sm:$0x3]  ;;  %v2672_v3 = vld [vmem:[%s4089_s0 + $0x12] sm:$0x3] }
   0xa   :  { %3290 = vmatprep.subr.bf16.mxu1 %v3595_v0  ;;  %v2677_v17 = vld [vmem:[%s4089_s0 + $0x32] sm:$0x3] }
   0xb   :  { %2929 = vmatmul.mubr.msk.f32.vlgmr.msra.gmra.mrb[0].mxu0 %vm43_vm2, %v40_v18 }
   0xc   :  { %2940 = vmatmul.mubr.msk.f32.vlgmr.msra.gmra.mrb[0].mxu1 %vm43_vm2, %v40_v18  ;;  %3286 = vmatpush3.bf16.msra.mxu0 %v3677_v19 }
   0xd   :  { %3292 = vmatpush3.bf16.msra.mxu1 %v3681_v20  ;;  %3287 = vmatprep.subr.bf16.mxu0 %v3595_v0 }
   0xe   :  { %3293 = vmatprep.subr.bf16.mxu1 %v3595_v0  ;;  %2950 = vmatprep.mubr.msk.f32.mxu0 %vm3597_vm1, %v3596_v4 }
   0xf   :  { %2961 = vmatprep.mubr.msk.f32.mxu1 %vm3597_vm1, %v3596_v4 }
  0x10   :  { %3289 = vmatpush3.bf16.msra.mxu0 %v3699_v25 }
  0x11   :  { %3295 = vmatpush3.bf16.msra.mxu1 %v3703_v26  ;;  %3296 = vmatprep.subr.bf16.mxu0 %v3595_v0 }
  0x12   :  { %3302 = vmatprep.subr.bf16.mxu1 %v3595_v0 }
  0x13   :  { %2951 = vmatmul.mubr.msk.f32.vlgmr.msra.gmra.mrb[2].mxu0 %vm43_vm2, %v40_v18 }
  0x14   :  { %2962 = vmatmul.mubr.msk.f32.vlgmr.msra.gmra.mrb[2].mxu1 %vm43_vm2, %v40_v18  ;;  %3298 = vmatpush3.bf16.msra.mxu0 %v3633_v5 }
  0x15   :  { %3304 = vmatpush3.bf16.msra.mxu1 %v3648_v9  ;;  %3299 = vmatprep.subr.bf16.mxu0 %v3595_v0 }
  0x16   :  { %3305 = vmatprep.subr.bf16.mxu1 %v3595_v0  ;;  %2972 = vmatprep.mubr.msk.f32.mxu0 %vm3597_vm1, %v3596_v4 }
  0x17   :  { %2983 = vmatprep.mubr.msk.f32.mxu1 %vm3597_vm1, %v3596_v4 }
  0x18   :  { %3301 = vmatpush3.bf16.msra.mxu0 %v3657_v12 }
  0x19   :  { %3307 = vmatpush3.bf16.msra.mxu1 %v3661_v13  ;;  %3308 = vmatprep.subr.bf16.mxu0 %v3595_v0 }
  0x1a   :  { %3314 = vmatprep.subr.bf16.mxu1 %v3595_v0 }
  0xde   :  { %v113_v29 = vpop.f32.mrb[0].mxu0 }
  0xdf   :  { %v117_v30 = vadd.f32 %v113_v29, %v42_v27  ;;  %v192_v31 = vpop.f32.mrb[0].mxu1  ;;  %v2930_v32 = vpop.f32.mrb[1].mxu0  ;;  %v2675_v27 = vld [vmem:[%s4089_s0 + $0x22] sm:$0x3] }
  0xe0   :  { %v196_v33 = vadd.f32 %v2661_v28, %v192_v31  ;;  %v2941_v34 = vpop.f32.mrb[1].mxu1 }
  0xe1   :  { %v2660_v35 = vmul.f32 -1.442695, %v117_v30 }
  0xe2   :  { %v2663_v36 = vmul.f32 -1.442695, %v196_v33 }
  0xe3   :  { %3467 = vpow2.f32 %v2660_v35 }
  0xe4   :  { %3469 = vpow2.f32 %v2663_v36 }
  0xe6   :  { %v271_v38 = vpop.f32.mrb[2].mxu0 }
  0xe7   :  { %v345_v40 = vpop.f32.mrb[2].mxu1  ;;  %v2952_v41 = vpop.f32.mrb[3].mxu0  ;;  %v275_v44 = vadd.f32 %v2664_v39, %v271_v38 }
  0xe8   :  { %v349_v42 = vadd.f32 %v2666_v37, %v345_v40  ;;  %v2963_v43 = vpop.f32.mrb[3].mxu1 }
  0xea   :  { %v2668_v45 = vmul.f32 -1.442695, %v349_v42 }
  0xec   :  { %3471 = vpow2.f32 %v2668_v45 }
  0xed   :  { %v3468_v46 = vpop.eup %3467  ;;  %3473 = vtanh.f32 %v275_v44  ;;  %v2680_v44 = vld [vmem:[%s4090_s2 + $0x2] sm:$0x3] }
  0xee   :  { %v3470_v47 = vpop.eup %3469  ;;  %v121_v48 = vadd.f32 1.0, %v3468_v46 }
  0xef   :  { %v200_v49 = vadd.f32 1.0, %v3470_v47 }
  0xf0   :  { %3475 = vrcp.f32 %v121_v48  ;;  %v2682_v48 = vld [vmem:[%s4089_s0 + $0x4] sm:$0x3] }
  0xf1   :  { %3477 = vrcp.f32 %v200_v49  ;;  %v2685_v49 = vld [vmem:[%s4089_s0 + $0x14] sm:$0x3] }
  0xf6   :  { %v3472_v50 = vpop.eup %3471 }
  0xf7   :  { %v3474_v51 = vpop.eup %3473  ;;  %v353_v54 = vadd.f32 1.0, %v3472_v50 }
  0xf9   :  { %3479 = vrcp.f32 %v353_v54 }
  0xfa   :  { %v3476_v53 = vpop.eup %3475 }
  0xfb   :  { %v3478_v55 = vpop.eup %3477  ;;  %v357_v56 = vmul.f32 %v3476_v53, %v3474_v51 }
  0xfc   :  { %v356_v57 = vmul.f32 %v3478_v55, %v41_v52 }
  0xfe   :  { %v3740_v58 = vadd.f32 %v357_v56, %v356_v57 }
 0x100   :  { %3481 = vtanh.f32 %v3740_v58 }
 0x103   :  { %v3480_v59 = vpop.eup %3479 }
 0x10a   :  { %v3482_v60 = vpop.eup %3481 }
 0x10b   :  { %v360_v62 = vmul.f32 %v3482_v60, %v3480_v59 }
 0x10d   :  { %v362_v63 = vadd.f32 %v361_v61, %v360_v62  ;;  %2973 = vmatmul.mubr.msk.f32.vlgmr.msra.gmra.mrb[4].mxu0 %vm43_vm2, %v360_v62  ;;  %2984 = vmatmul.mubr.msk.f32.vlgmr.msra.gmra.mrb[4].mxu1 %vm43_vm2, %v360_v62 }
 0x10e   :  { %3310 = vmatpush3.bf16.msra.mxu0 %v3677_v19  ;;  %3316 = vmatpush3.bf16.msra.mxu1 %v3681_v20 }
 0x10f   :  { %v363_v1 = vmax.f32 %v362_v63, 0.0  ;;  %3311 = vmatprep.subr.bf16.mxu0 %v3595_v0  ;;  %3317 = vmatprep.subr.bf16.mxu1 %v3595_v0 }
 0x110   :  { %2994 = vmatprep.mubr.msk.f32.mxu0 %vm3597_vm1, %v3596_v4  ;;  %3005 = vmatprep.mubr.msk.f32.mxu1 %vm3597_vm1, %v3596_v4 }
 0x111   :  { %365 = vst.msk [vmem:[%s4091_s3] sm:$0x3] %vm18_vm0, %v363_v1  ;;  %v2688_v1 = vld [vmem:[%s4089_s0 + $0x24] sm:$0x3] }
 0x112   :  { %3313 = vmatpush3.bf16.msra.mxu0 %v3699_v25  ;;  %3319 = vmatpush3.bf16.msra.mxu1 %v3703_v26 }
 0x113   :  { %3320 = vmatprep.subr.bf16.mxu0 %v3595_v0  ;;  %3326 = vmatprep.subr.bf16.mxu1 %v3595_v0 }
 0x115   :  { %2995 = vmatmul.mubr.msk.f32.vlgmr.msra.gmra.mrb[6].mxu0 %vm43_vm2, %v360_v62  ;;  %3006 = vmatmul.mubr.msk.f32.vlgmr.msra.gmra.mrb[6].mxu1 %vm43_vm2, %v360_v62 }
 0x116   :  { %3322 = vmatpush3.bf16.msra.mxu0 %v3633_v5  ;;  %3328 = vmatpush3.bf16.msra.mxu1 %v3648_v9 }
 0x117   :  { %3323 = vmatprep.subr.bf16.mxu0 %v3595_v0  ;;  %3329 = vmatprep.subr.bf16.mxu1 %v3595_v0 }
 0x118   :  { %3016 = vmatprep.mubr.msk.f32.mxu0 %vm3597_vm1, %v3596_v4  ;;  %3027 = vmatprep.mubr.msk.f32.mxu1 %vm3597_vm1, %v3596_v4 }
 0x11a   :  { %3325 = vmatpush3.bf16.msra.mxu0 %v3657_v12  ;;  %3331 = vmatpush3.bf16.msra.mxu1 %v3661_v13 }
 0x11b   :  { %3332 = vmatprep.subr.bf16.mxu0 %v3595_v0  ;;  %3338 = vmatprep.subr.bf16.mxu1 %v3595_v0 }
 0x1e0   :  { %v437_v6 = vpop.f32.mrb[4].mxu0  ;;  %v516_v7 = vpop.f32.mrb[4].mxu1 }
 0x1e1   :  { %v441_v8 = vadd.f32 %v2669_v2, %v437_v6  ;;  %v520_v10 = vadd.f32 %v2672_v3, %v516_v7  ;;  %v2974_v11 = vpop.f32.mrb[5].mxu0  ;;  %v2985_v14 = vpop.f32.mrb[5].mxu1 }
 0x1e3   :  { %v2671_v15 = vmul.f32 -1.442695, %v441_v8  ;;  %v2674_v16 = vmul.f32 -1.442695, %v520_v10 }
 0x1e5   :  { %3483 = vpow2.f32 %v2671_v15 }
 0x1e6   :  { %3485 = vpow2.f32 %v2674_v16 }
 0x1e8   :  { %v595_v18 = vpop.f32.mrb[6].mxu0  ;;  %v669_v21 = vpop.f32.mrb[6].mxu1 }
 0x1e9   :  { %v673_v22 = vadd.f32 %v2677_v17, %v669_v21  ;;  %v2996_v23 = vpop.f32.mrb[7].mxu0  ;;  %v3007_v24 = vpop.f32.mrb[7].mxu1  ;;  %v599_v29 = vadd.f32 %v2675_v27, %v595_v18  ;;  %v2693_v27 = vld [vmem:[%s4090_s2 + $0x4] sm:$0x3] }
 0x1eb   :  { %v2679_v28 = vmul.f32 -1.442695, %v673_v22 }
 0x1ed   :  { %3487 = vpow2.f32 %v2679_v28 }
 0x1ee   :  { %3489 = vtanh.f32 %v599_v29 }
 0x1ef   :  { %v3484_v30 = vpop.eup %3483 }
 0x1f0   :  { %v3486_v31 = vpop.eup %3485  ;;  %v445_v32 = vadd.f32 1.0, %v3484_v30 }
 0x1f1   :  { %v524_v33 = vadd.f32 1.0, %v3486_v31  ;;  %v2695_v31 = vld [vmem:[%s4089_s0 + $0x6] sm:$0x3] }
 0x1f2   :  { %3491 = vrcp.f32 %v445_v32  ;;  %v2698_v32 = vld [vmem:[%s4089_s0 + $0x16] sm:$0x3] }
 0x1f3   :  { %3493 = vrcp.f32 %v524_v33 }
 0x1f7   :  { %v3488_v34 = vpop.eup %3487 }
 0x1f8   :  { %v3490_v35 = vpop.eup %3489  ;;  %v677_v39 = vadd.f32 1.0, %v3488_v34 }
 0x1fa   :  { %3495 = vrcp.f32 %v677_v39 }
 0x1fc   :  { %v3492_v36 = vpop.eup %3491 }
 0x1fd   :  { %v3494_v37 = vpop.eup %3493  ;;  %v681_v38 = vmul.f32 %v3492_v36, %v3490_v35 }
 0x1fe   :  { %v680_v40 = vmul.f32 %v3494_v37, %v3740_v58  ;;  %v2690_v58 = vld [vmem:[%s4089_s0 + $0x34] sm:$0x3] }
 0x200   :  { %v3791_v41 = vadd.f32 %v681_v38, %v680_v40 }
 0x202   :  { %3497 = vtanh.f32 %v3791_v41 }
 0x204   :  { %v3496_v42 = vpop.eup %3495 }
 0x20c   :  { %v3498_v43 = vpop.eup %3497 }
 0x20d   :  { %v684_v45 = vmul.f32 %v3498_v43, %v3496_v42 }
 0x20f   :  { %v687_v46 = vadd.f32 %v2680_v44, %v684_v45  ;;  %3017 = vmatmul.mubr.msk.f32.vlgmr.msra.gmra.mrb[8].mxu0 %vm43_vm2, %v684_v45  ;;  %3028 = vmatmul.mubr.msk.f32.vlgmr.msra.gmra.mrb[8].mxu1 %vm43_vm2, %v684_v45 }
 0x210   :  { %3334 = vmatpush3.bf16.msra.mxu0 %v3677_v19  ;;  %3340 = vmatpush3.bf16.msra.mxu1 %v3681_v20 }
 0x211   :  { %v688_v47 = vmax.f32 %v687_v46, 0.0  ;;  %3335 = vmatprep.subr.bf16.mxu0 %v3595_v0  ;;  %3341 = vmatprep.subr.bf16.mxu1 %v3595_v0 }
 0x212   :  { %3038 = vmatprep.mubr.msk.f32.mxu0 %vm3597_vm1, %v3596_v4  ;;  %3049 = vmatprep.mubr.msk.f32.mxu1 %vm3597_vm1, %v3596_v4 }
 0x213   :  { %2681 = vst.msk [vmem:[%s4091_s3 + $0x2] sm:$0x3] %vm18_vm0, %v688_v47  ;;  %v2701_v47 = vld [vmem:[%s4089_s0 + $0x26] sm:$0x3] }
 0x214   :  { %3337 = vmatpush3.bf16.msra.mxu0 %v3699_v25  ;;  %3343 = vmatpush3.bf16.msra.mxu1 %v3703_v26 }
 0x215   :  { %3344 = vmatprep.subr.bf16.mxu0 %v3595_v0  ;;  %3350 = vmatprep.subr.bf16.mxu1 %v3595_v0 }
 0x217   :  { %3039 = vmatmul.mubr.msk.f32.vlgmr.msra.gmra.mrb[10].mxu0 %vm43_vm2, %v684_v45  ;;  %3050 = vmatmul.mubr.msk.f32.vlgmr.msra.gmra.mrb[10].mxu1 %vm43_vm2, %v684_v45 }
 0x218   :  { %3346 = vmatpush3.bf16.msra.mxu0 %v3633_v5  ;;  %3352 = vmatpush3.bf16.msra.mxu1 %v3648_v9 }
 0x219   :  { %3347 = vmatprep.subr.bf16.mxu0 %v3595_v0  ;;  %3353 = vmatprep.subr.bf16.mxu1 %v3595_v0 }
 0x21a   :  { %3060 = vmatprep.mubr.msk.f32.mxu0 %vm3597_vm1, %v3596_v4  ;;  %3071 = vmatprep.mubr.msk.f32.mxu1 %vm3597_vm1, %v3596_v4 }
 0x21c   :  { %3349 = vmatpush3.bf16.msra.mxu0 %v3657_v12  ;;  %3355 = vmatpush3.bf16.msra.mxu1 %v3661_v13 }
 0x21d   :  { %3356 = vmatprep.subr.bf16.mxu0 %v3595_v0  ;;  %3362 = vmatprep.subr.bf16.mxu1 %v3595_v0 }
 0x2e2   :  { %v762_v50 = vpop.f32.mrb[8].mxu0  ;;  %v841_v51 = vpop.f32.mrb[8].mxu1 }
 0x2e3   :  { %v766_v52 = vadd.f32 %v2682_v48, %v762_v50  ;;  %v845_v53 = vadd.f32 %v2685_v49, %v841_v51  ;;  %v3018_v54 = vpop.f32.mrb[9].mxu0  ;;  %v3029_v55 = vpop.f32.mrb[9].mxu1 }
 0x2e5   :  { %v2684_v56 = vmul.f32 -1.442695, %v766_v52  ;;  %v2687_v57 = vmul.f32 -1.442695, %v845_v53 }
 0x2e7   :  { %3499 = vpow2.f32 %v2684_v56 }
 0x2e8   :  { %3501 = vpow2.f32 %v2687_v57 }
 0x2ea   :  { %v920_v59 = vpop.f32.mrb[10].mxu0  ;;  %v994_v60 = vpop.f32.mrb[10].mxu1 }
 0x2eb   :  { %v998_v61 = vadd.f32 %v2690_v58, %v994_v60  ;;  %v3040_v62 = vpop.f32.mrb[11].mxu0  ;;  %v3051_v63 = vpop.f32.mrb[11].mxu1  ;;  %v924_v3 = vadd.f32 %v2688_v1, %v920_v59  ;;  %v2706_v1 = vld [vmem:[%s4090_s2 + $0x6] sm:$0x3] }
 0x2ed   :  { %v2692_v2 = vmul.f32 -1.442695, %v998_v61 }
 0x2ef   :  { %3503 = vpow2.f32 %v2692_v2 }
 0x2f0   :  { %3505 = vtanh.f32 %v924_v3 }
 0x2f1   :  { %v3500_v6 = vpop.eup %3499 }
 0x2f2   :  { %v3502_v7 = vpop.eup %3501  ;;  %v770_v8 = vadd.f32 1.0, %v3500_v6 }
 0x2f3   :  { %v849_v10 = vadd.f32 1.0, %v3502_v7  ;;  %v2708_v7 = vld [vmem:[%s4089_s0 + $0x8] sm:$0x3] }
 0x2f4   :  { %3507 = vrcp.f32 %v770_v8  ;;  %v2711_v8 = vld [vmem:[%s4089_s0 + $0x18] sm:$0x3] }
 0x2f5   :  { %3509 = vrcp.f32 %v849_v10 }
 0x2f9   :  { %v3504_v11 = vpop.eup %3503 }
 0x2fa   :  { %v3506_v14 = vpop.eup %3505  ;;  %v1002_v18 = vadd.f32 1.0, %v3504_v11 }
 0x2fc   :  { %3511 = vrcp.f32 %v1002_v18 }
 0x2fe   :  { %v3508_v15 = vpop.eup %3507 }
 0x2ff   :  { %v3510_v16 = vpop.eup %3509  ;;  %v1006_v17 = vmul.f32 %v3508_v15, %v3506_v14 }
 0x300   :  { %v1005_v21 = vmul.f32 %v3510_v16, %v3791_v41  ;;  %v2703_v41 = vld [vmem:[%s4089_s0 + $0x36] sm:$0x3] }
 0x302   :  { %v3842_v22 = vadd.f32 %v1006_v17, %v1005_v21 }
 0x304   :  { %3513 = vtanh.f32 %v3842_v22 }
 0x306   :  { %v3512_v23 = vpop.eup %3511 }
 0x30e   :  { %v3514_v24 = vpop.eup %3513 }
 0x30f   :  { %v1009_v28 = vmul.f32 %v3514_v24, %v3512_v23 }
 0x311   :  { %v1012_v29 = vadd.f32 %v2693_v27, %v1009_v28  ;;  %3061 = vmatmul.mubr.msk.f32.vlgmr.msra.gmra.mrb[12].mxu0 %vm43_vm2, %v1009_v28  ;;  %3072 = vmatmul.mubr.msk.f32.vlgmr.msra.gmra.mrb[12].mxu1 %vm43_vm2, %v1009_v28 }
 0x312   :  { %3358 = vmatpush3.bf16.msra.mxu0 %v3677_v19  ;;  %3364 = vmatpush3.bf16.msra.mxu1 %v3681_v20 }
 0x313   :  { %v1013_v30 = vmax.f32 %v1012_v29, 0.0  ;;  %3359 = vmatprep.subr.bf16.mxu0 %v3595_v0  ;;  %3365 = vmatprep.subr.bf16.mxu1 %v3595_v0 }
 0x314   :  { %3082 = vmatprep.mubr.msk.f32.mxu0 %vm3597_vm1, %v3596_v4  ;;  %3093 = vmatprep.mubr.msk.f32.mxu1 %vm3597_vm1, %v3596_v4 }
 0x315   :  { %2694 = vst.msk [vmem:[%s4091_s3 + $0x4] sm:$0x3] %vm18_vm0, %v1013_v30  ;;  %v2714_v30 = vld [vmem:[%s4089_s0 + $0x28] sm:$0x3] }
 0x316   :  { %3361 = vmatpush3.bf16.msra.mxu0 %v3699_v25  ;;  %3367 = vmatpush3.bf16.msra.mxu1 %v3703_v26 }
 0x317   :  { %3368 = vmatprep.subr.bf16.mxu0 %v3595_v0  ;;  %3374 = vmatprep.subr.bf16.mxu1 %v3595_v0 }
 0x319   :  { %3083 = vmatmul.mubr.msk.f32.vlgmr.msra.gmra.mrb[14].mxu0 %vm43_vm2, %v1009_v28  ;;  %3094 = vmatmul.mubr.msk.f32.vlgmr.msra.gmra.mrb[14].mxu1 %vm43_vm2, %v1009_v28 }
 0x31a   :  { %3370 = vmatpush3.bf16.msra.mxu0 %v3633_v5  ;;  %3376 = vmatpush3.bf16.msra.mxu1 %v3648_v9 }
 0x31b   :  { %3371 = vmatprep.subr.bf16.mxu0 %v3595_v0  ;;  %3377 = vmatprep.subr.bf16.mxu1 %v3595_v0 }
 0x31c   :  { %3104 = vmatprep.mubr.msk.f32.mxu0 %vm3597_vm1, %v3596_v4  ;;  %3115 = vmatprep.mubr.msk.f32.mxu1 %vm3597_vm1, %v3596_v4 }
 0x31e   :  { %3373 = vmatpush3.bf16.msra.mxu0 %v3657_v12  ;;  %3379 = vmatpush3.bf16.msra.mxu1 %v3661_v13 }
 0x31f   :  { %3380 = vmatprep.subr.bf16.mxu0 %v3595_v0  ;;  %3386 = vmatprep.subr.bf16.mxu1 %v3595_v0 }
 0x3e4   :  { %v1087_v33 = vpop.f32.mrb[12].mxu0  ;;  %v1166_v34 = vpop.f32.mrb[12].mxu1 }
 0x3e5   :  { %v1091_v35 = vadd.f32 %v2695_v31, %v1087_v33  ;;  %v1170_v36 = vadd.f32 %v2698_v32, %v1166_v34  ;;  %v3062_v37 = vpop.f32.mrb[13].mxu0  ;;  %v3073_v38 = vpop.f32.mrb[13].mxu1 }
 0x3e7   :  { %v2697_v39 = vmul.f32 -1.442695, %v1091_v35  ;;  %v2700_v40 = vmul.f32 -1.442695, %v1170_v36 }
 0x3e9   :  { %3515 = vpow2.f32 %v2697_v39 }
 0x3ea   :  { %3517 = vpow2.f32 %v2700_v40 }
 0x3ec   :  { %v1245_v42 = vpop.f32.mrb[14].mxu0  ;;  %v1319_v43 = vpop.f32.mrb[14].mxu1 }
 0x3ed   :  { %v1323_v44 = vadd.f32 %v2703_v41, %v1319_v43  ;;  %v3084_v45 = vpop.f32.mrb[15].mxu0  ;;  %v3095_v46 = vpop.f32.mrb[15].mxu1  ;;  %v1249_v49 = vadd.f32 %v2701_v47, %v1245_v42  ;;  %v2719_v47 = vld [vmem:[%s4090_s2 + $0x8] sm:$0x3] }
 0x3ef   :  { %v2705_v48 = vmul.f32 -1.442695, %v1323_v44 }
 0x3f1   :  { %3519 = vpow2.f32 %v2705_v48 }
 0x3f2   :  { %3521 = vtanh.f32 %v1249_v49 }
 0x3f3   :  { %v3516_v50 = vpop.eup %3515 }
 0x3f4   :  { %v3518_v51 = vpop.eup %3517  ;;  %v1095_v52 = vadd.f32 1.0, %v3516_v50 }
 0x3f5   :  { %v1174_v53 = vadd.f32 1.0, %v3518_v51  ;;  %v2721_v51 = vld [vmem:[%s4089_s0 + $0xa] sm:$0x3] }
 0x3f6   :  { %3523 = vrcp.f32 %v1095_v52  ;;  %v2724_v52 = vld [vmem:[%s4089_s0 + $0x1a] sm:$0x3] }
 0x3f7   :  { %3525 = vrcp.f32 %v1174_v53 }
 0x3fb   :  { %v3520_v54 = vpop.eup %3519 }
 0x3fc   :  { %v3522_v55 = vpop.eup %3521  ;;  %v1327_v59 = vadd.f32 1.0, %v3520_v54 }
 0x3fe   :  { %3527 = vrcp.f32 %v1327_v59 }
 0x400   :  { %v3524_v56 = vpop.eup %3523 }
 0x401   :  { %v3526_v57 = vpop.eup %3525  ;;  %v1331_v58 = vmul.f32 %v3524_v56, %v3522_v55 }
 0x402   :  { %v1330_v60 = vmul.f32 %v3526_v57, %v3842_v22  ;;  %v2716_v22 = vld [vmem:[%s4089_s0 + $0x38] sm:$0x3] }
 0x404   :  { %v3893_v61 = vadd.f32 %v1331_v58, %v1330_v60 }
 0x406   :  { %3529 = vtanh.f32 %v3893_v61 }
 0x408   :  { %v3528_v62 = vpop.eup %3527 }
 0x410   :  { %v3530_v63 = vpop.eup %3529 }
 0x411   :  { %v1334_v2 = vmul.f32 %v3530_v63, %v3528_v62 }
 0x413   :  { %v1337_v3 = vadd.f32 %v2706_v1, %v1334_v2  ;;  %3105 = vmatmul.mubr.msk.f32.vlgmr.msra.gmra.mrb[16].mxu0 %vm43_vm2, %v1334_v2  ;;  %3116 = vmatmul.mubr.msk.f32.vlgmr.msra.gmra.mrb[16].mxu1 %vm43_vm2, %v1334_v2 }
 0x414   :  { %3382 = vmatpush3.bf16.msra.mxu0 %v3677_v19  ;;  %3388 = vmatpush3.bf16.msra.mxu1 %v3681_v20 }
 0x415   :  { %v1338_v6 = vmax.f32 %v1337_v3, 0.0  ;;  %3383 = vmatprep.subr.bf16.mxu0 %v3595_v0  ;;  %3389 = vmatprep.subr.bf16.mxu1 %v3595_v0 }
 0x416   :  { %3126 = vmatprep.mubr.msk.f32.mxu0 %vm3597_vm1, %v3596_v4  ;;  %3137 = vmatprep.mubr.msk.f32.mxu1 %vm3597_vm1, %v3596_v4 }
 0x417   :  { %2707 = vst.msk [vmem:[%s4091_s3 + $0x6] sm:$0x3] %vm18_vm0, %v1338_v6  ;;  %v2727_v6 = vld [vmem:[%s4089_s0 + $0x2a] sm:$0x3] }
 0x418   :  { %3385 = vmatpush3.bf16.msra.mxu0 %v3699_v25  ;;  %3391 = vmatpush3.bf16.msra.mxu1 %v3703_v26 }
 0x419   :  { %3392 = vmatprep.subr.bf16.mxu0 %v3595_v0  ;;  %3398 = vmatprep.subr.bf16.mxu1 %v3595_v0 }
 0x41b   :  { %3127 = vmatmul.mubr.msk.f32.vlgmr.msra.gmra.mrb[18].mxu0 %vm43_vm2, %v1334_v2  ;;  %3138 = vmatmul.mubr.msk.f32.vlgmr.msra.gmra.mrb[18].mxu1 %vm43_vm2, %v1334_v2 }
 0x41c   :  { %3394 = vmatpush3.bf16.msra.mxu0 %v3633_v5  ;;  %3400 = vmatpush3.bf16.msra.mxu1 %v3648_v9 }
 0x41d   :  { %3395 = vmatprep.subr.bf16.mxu0 %v3595_v0  ;;  %3401 = vmatprep.subr.bf16.mxu1 %v3595_v0 }
 0x41e   :  { %3148 = vmatprep.mubr.msk.f32.mxu0 %vm3597_vm1, %v3596_v4  ;;  %3159 = vmatprep.mubr.msk.f32.mxu1 %vm3597_vm1, %v3596_v4 }
 0x420   :  { %3397 = vmatpush3.bf16.msra.mxu0 %v3657_v12  ;;  %3403 = vmatpush3.bf16.msra.mxu1 %v3661_v13 }
 0x421   :  { %3404 = vmatprep.subr.bf16.mxu0 %v3595_v0  ;;  %3410 = vmatprep.subr.bf16.mxu1 %v3595_v0 }
 0x4e6   :  { %v1412_v10 = vpop.f32.mrb[16].mxu0  ;;  %v1491_v11 = vpop.f32.mrb[16].mxu1 }
 0x4e7   :  { %v1416_v14 = vadd.f32 %v2708_v7, %v1412_v10  ;;  %v1495_v15 = vadd.f32 %v2711_v8, %v1491_v11  ;;  %v3106_v16 = vpop.f32.mrb[17].mxu0  ;;  %v3117_v17 = vpop.f32.mrb[17].mxu1 }
 0x4e9   :  { %v2710_v18 = vmul.f32 -1.442695, %v1416_v14  ;;  %v2713_v21 = vmul.f32 -1.442695, %v1495_v15 }
 0x4eb   :  { %3531 = vpow2.f32 %v2710_v18 }
 0x4ec   :  { %3533 = vpow2.f32 %v2713_v21 }
 0x4ee   :  { %v1570_v23 = vpop.f32.mrb[18].mxu0  ;;  %v1644_v24 = vpop.f32.mrb[18].mxu1 }
 0x4ef   :  { %v1648_v27 = vadd.f32 %v2716_v22, %v1644_v24  ;;  %v3128_v28 = vpop.f32.mrb[19].mxu0  ;;  %v3139_v29 = vpop.f32.mrb[19].mxu1  ;;  %v1574_v32 = vadd.f32 %v2714_v30, %v1570_v23  ;;  %v2732_v30 = vld [vmem:[%s4090_s2 + $0xa] sm:$0x3] }
 0x4f1   :  { %v2718_v31 = vmul.f32 -1.442695, %v1648_v27 }
 0x4f3   :  { %3535 = vpow2.f32 %v2718_v31 }
 0x4f4   :  { %3537 = vtanh.f32 %v1574_v32 }
 0x4f5   :  { %v3532_v33 = vpop.eup %3531 }
 0x4f6   :  { %v3534_v34 = vpop.eup %3533  ;;  %v1420_v35 = vadd.f32 1.0, %v3532_v33 }
 0x4f7   :  { %v1499_v36 = vadd.f32 1.0, %v3534_v34 }
 0x4f8   :  { %3539 = vrcp.f32 %v1420_v35 }
 0x4f9   :  { %3541 = vrcp.f32 %v1499_v36 }
 0x4fd   :  { %v3536_v37 = vpop.eup %3535 }
 0x4fe   :  { %v3538_v38 = vpop.eup %3537  ;;  %v1652_v42 = vadd.f32 1.0, %v3536_v37 }
 0x500   :  { %3543 = vrcp.f32 %v1652_v42 }
 0x502   :  { %v3540_v39 = vpop.eup %3539 }
 0x503   :  { %v3542_v40 = vpop.eup %3541  ;;  %v1656_v41 = vmul.f32 %v3540_v39, %v3538_v38 }
 0x504   :  { %v1655_v43 = vmul.f32 %v3542_v40, %v3893_v61  ;;  %v2729_v61 = vld [vmem:[%s4089_s0 + $0x3a] sm:$0x3]  ;;  %v2742_v40 = vld [vmem:[%s4089_s0 + $0x3c] sm:$0x3] }
 0x506   :  { %v3944_v44 = vadd.f32 %v1656_v41, %v1655_v43 }
 0x508   :  { %3545 = vtanh.f32 %v3944_v44 }
 0x50a   :  { %v3544_v45 = vpop.eup %3543 }
 0x512   :  { %v3546_v46 = vpop.eup %3545 }
 0x513   :  { %v1659_v48 = vmul.f32 %v3546_v46, %v3544_v45  ;;  %v2740_v46 = vld [vmem:[%s4089_s0 + $0x2c] sm:$0x3] }
 0x515   :  { %v1662_v49 = vadd.f32 %v2719_v47, %v1659_v48  ;;  %3149 = vmatmul.mubr.msk.f32.vlgmr.msra.gmra.mrb[20].mxu0 %vm43_vm2, %v1659_v48  ;;  %3160 = vmatmul.mubr.msk.f32.vlgmr.msra.gmra.mrb[20].mxu1 %vm43_vm2, %v1659_v48 }
 0x516   :  { %3406 = vmatpush3.bf16.msra.mxu0 %v3677_v19  ;;  %3412 = vmatpush3.bf16.msra.mxu1 %v3681_v20 }
 0x517   :  { %v1663_v50 = vmax.f32 %v1662_v49, 0.0  ;;  %3407 = vmatprep.subr.bf16.mxu0 %v3595_v0  ;;  %3413 = vmatprep.subr.bf16.mxu1 %v3595_v0 }
 0x518   :  { %3170 = vmatprep.mubr.msk.f32.mxu0 %vm3597_vm1, %v3596_v4  ;;  %3181 = vmatprep.mubr.msk.f32.mxu1 %vm3597_vm1, %v3596_v4 }
 0x519   :  { %2720 = vst.msk [vmem:[%s4091_s3 + $0x8] sm:$0x3] %vm18_vm0, %v1663_v50 }
 0x51a   :  { %3409 = vmatpush3.bf16.msra.mxu0 %v3699_v25  ;;  %3415 = vmatpush3.bf16.msra.mxu1 %v3703_v26 }
 0x51b   :  { %3416 = vmatprep.subr.bf16.mxu0 %v3595_v0  ;;  %3422 = vmatprep.subr.bf16.mxu1 %v3595_v0 }
 0x51d   :  { %3171 = vmatmul.mubr.msk.f32.vlgmr.msra.gmra.mrb[22].mxu0 %vm43_vm2, %v1659_v48  ;;  %3182 = vmatmul.mubr.msk.f32.vlgmr.msra.gmra.mrb[22].mxu1 %vm43_vm2, %v1659_v48 }
 0x51e   :  { %3418 = vmatpush3.bf16.msra.mxu0 %v3633_v5  ;;  %3424 = vmatpush3.bf16.msra.mxu1 %v3648_v9 }
 0x51f   :  { %3419 = vmatprep.subr.bf16.mxu0 %v3595_v0  ;;  %3425 = vmatprep.subr.bf16.mxu1 %v3595_v0 }
 0x520   :  { %3192 = vmatprep.mubr.msk.f32.mxu0 %vm3597_vm1, %v3596_v4  ;;  %3203 = vmatprep.mubr.msk.f32.mxu1 %vm3597_vm1, %v3596_v4 }
 0x522   :  { %3421 = vmatpush3.bf16.msra.mxu0 %v3657_v12  ;;  %3427 = vmatpush3.bf16.msra.mxu1 %v3661_v13 }
 0x523   :  { %3428 = vmatprep.subr.bf16.mxu0 %v3595_v0  ;;  %3434 = vmatprep.subr.bf16.mxu1 %v3595_v0 }
 0x5e8   :  { %v1737_v53 = vpop.f32.mrb[20].mxu0  ;;  %v1816_v54 = vpop.f32.mrb[20].mxu1 }
 0x5e9   :  { %v1741_v55 = vadd.f32 %v2721_v51, %v1737_v53  ;;  %v1820_v56 = vadd.f32 %v2724_v52, %v1816_v54  ;;  %v3150_v57 = vpop.f32.mrb[21].mxu0  ;;  %v3161_v58 = vpop.f32.mrb[21].mxu1 }
 0x5eb   :  { %v2723_v59 = vmul.f32 -1.442695, %v1741_v55  ;;  %v2726_v60 = vmul.f32 -1.442695, %v1820_v56 }
 0x5ed   :  { %3547 = vpow2.f32 %v2723_v59 }
 0x5ee   :  { %3549 = vpow2.f32 %v2726_v60 }
 0x5f0   :  { %v1895_v62 = vpop.f32.mrb[22].mxu0  ;;  %v1969_v63 = vpop.f32.mrb[22].mxu1 }
 0x5f1   :  { %v1973_v1 = vadd.f32 %v2729_v61, %v1969_v63  ;;  %v3172_v2 = vpop.f32.mrb[23].mxu0  ;;  %v3183_v3 = vpop.f32.mrb[23].mxu1  ;;  %v1899_v8 = vadd.f32 %v2727_v6, %v1895_v62  ;;  %v2745_v63 = vld [vmem:[%s4090_s2 + $0xc] sm:$0x3] }
 0x5f3   :  { %v2731_v7 = vmul.f32 -1.442695, %v1973_v1 }
 0x5f5   :  { %3551 = vpow2.f32 %v2731_v7 }
 0x5f6   :  { %3553 = vtanh.f32 %v1899_v8 }
 0x5f7   :  { %v3548_v10 = vpop.eup %3547 }
 0x5f8   :  { %v3550_v11 = vpop.eup %3549  ;;  %v1745_v14 = vadd.f32 1.0, %v3548_v10 }
 0x5f9   :  { %v1824_v15 = vadd.f32 1.0, %v3550_v11  ;;  %v2755_v11 = vld [vmem:[%s4089_s0 + $0x3e] sm:$0x3] }
 0x5fa   :  { %3555 = vrcp.f32 %v1745_v14 }
 0x5fb   :  { %3557 = vrcp.f32 %v1824_v15 }
 0x5ff   :  { %v3552_v16 = vpop.eup %3551 }
 0x600   :  { %v3554_v17 = vpop.eup %3553  ;;  %v1977_v23 = vadd.f32 1.0, %v3552_v16 }
 0x602   :  { %3559 = vrcp.f32 %v1977_v23 }
 0x604   :  { %v3556_v18 = vpop.eup %3555 }
 0x605   :  { %v3558_v21 = vpop.eup %3557  ;;  %v1981_v22 = vmul.f32 %v3556_v18, %v3554_v17 }
 0x606   :  { %v1980_v24 = vmul.f32 %v3558_v21, %v3944_v44  ;;  %v2753_v21 = vld [vmem:[%s4089_s0 + $0x2e] sm:$0x3] }
 0x608   :  { %v3995_v27 = vadd.f32 %v1981_v22, %v1980_v24 }
 0x60a   :  { %3561 = vtanh.f32 %v3995_v27 }
 0x60c   :  { %v3560_v28 = vpop.eup %3559 }
 0x614   :  { %v3562_v29 = vpop.eup %3561 }
 0x615   :  { %v1984_v31 = vmul.f32 %v3562_v29, %v3560_v28 }
 0x617   :  { %v1987_v32 = vadd.f32 %v2732_v30, %v1984_v31  ;;  %3193 = vmatmul.mubr.msk.f32.vlgmr.msra.gmra.mrb[24].mxu0 %vm43_vm2, %v1984_v31  ;;  %3204 = vmatmul.mubr.msk.f32.vlgmr.msra.gmra.mrb[24].mxu1 %vm43_vm2, %v1984_v31 }
 0x618   :  { %3430 = vmatpush3.bf16.msra.mxu0 %v3677_v19  ;;  %3436 = vmatpush3.bf16.msra.mxu1 %v3681_v20 }
 0x619   :  { %v1988_v33 = vmax.f32 %v1987_v32, 0.0  ;;  %3431 = vmatprep.subr.bf16.mxu0 %v3595_v0  ;;  %3437 = vmatprep.subr.bf16.mxu1 %v3595_v0 }
 0x61a   :  { %3214 = vmatprep.mubr.msk.f32.mxu0 %vm3597_vm1, %v3596_v4  ;;  %3225 = vmatprep.mubr.msk.f32.mxu1 %vm3597_vm1, %v3596_v4 }
 0x61b   :  { %2733 = vst.msk [vmem:[%s4091_s3 + $0xa] sm:$0x3] %vm18_vm0, %v1988_v33 }
 0x61c   :  { %3433 = vmatpush3.bf16.msra.mxu0 %v3699_v25  ;;  %3439 = vmatpush3.bf16.msra.mxu1 %v3703_v26 }
 0x61d   :  { %3440 = vmatprep.subr.bf16.mxu0 %v3595_v0  ;;  %3446 = vmatprep.subr.bf16.mxu1 %v3595_v0 }
 0x61f   :  { %3215 = vmatmul.mubr.msk.f32.vlgmr.msra.gmra.mrb[26].mxu0 %vm43_vm2, %v1984_v31  ;;  %3226 = vmatmul.mubr.msk.f32.vlgmr.msra.gmra.mrb[26].mxu1 %vm43_vm2, %v1984_v31 }
 0x620   :  { %3442 = vmatpush3.bf16.msra.mxu0 %v3633_v5  ;;  %3448 = vmatpush3.bf16.msra.mxu1 %v3648_v9  ;;  %v2734_v5 = vld [vmem:[%s4089_s0 + $0xc] sm:$0x3]  ;;  %v2737_v9 = vld [vmem:[%s4089_s0 + $0x1c] sm:$0x3] }
 0x621   :  { %3443 = vmatprep.subr.bf16.mxu0 %v3595_v0  ;;  %3449 = vmatprep.subr.bf16.mxu1 %v3595_v0 }
 0x622   :  { %3236 = vmatprep.mubr.msk.f32.mxu0 %vm3597_vm1, %v3596_v4  ;;  %3247 = vmatprep.mubr.msk.f32.mxu1 %vm3597_vm1, %v3596_v4 }
 0x624   :  { %3445 = vmatpush3.bf16.msra.mxu0 %v3657_v12  ;;  %3451 = vmatpush3.bf16.msra.mxu1 %v3661_v13 }
 0x625   :  { %3452 = vmatprep.subr.bf16.mxu0 %v3595_v0  ;;  %3458 = vmatprep.subr.bf16.mxu1 %v3595_v0 }
 0x6ea   :  { %v2062_v34 = vpop.f32.mrb[24].mxu0  ;;  %v2141_v35 = vpop.f32.mrb[24].mxu1 }
 0x6eb   :  { %v2066_v36 = vadd.f32 %v2734_v5, %v2062_v34  ;;  %v2145_v37 = vadd.f32 %v2737_v9, %v2141_v35  ;;  %v3194_v38 = vpop.f32.mrb[25].mxu0  ;;  %v3205_v12 = vpop.f32.mrb[25].mxu1 }
 0x6ec   :  { %v2758_v38 = vld [vmem:[%s4090_s2 + $0xe] sm:$0x3] }
 0x6ed   :  { %v2736_v39 = vmul.f32 -1.442695, %v2066_v36  ;;  %v2739_v13 = vmul.f32 -1.442695, %v2145_v37 }
 0x6ef   :  { %3563 = vpow2.f32 %v2736_v39 }
 0x6f0   :  { %3565 = vpow2.f32 %v2739_v13 }
 0x6f2   :  { %v2220_v41 = vpop.f32.mrb[26].mxu0  ;;  %v2294_v42 = vpop.f32.mrb[26].mxu1 }
 0x6f3   :  { %v2298_v43 = vadd.f32 %v2742_v40, %v2294_v42  ;;  %v3216_v44 = vpop.f32.mrb[27].mxu0  ;;  %v3227_v45 = vpop.f32.mrb[27].mxu1  ;;  %v2224_v48 = vadd.f32 %v2740_v46, %v2220_v41 }
 0x6f5   :  { %v2744_v47 = vmul.f32 -1.442695, %v2298_v43 }
 0x6f7   :  { %3567 = vpow2.f32 %v2744_v47 }
 0x6f8   :  { %3569 = vtanh.f32 %v2224_v48 }
 0x6f9   :  { %v3564_v49 = vpop.eup %3563 }
 0x6fa   :  { %v3566_v50 = vpop.eup %3565  ;;  %v2070_v51 = vadd.f32 1.0, %v3564_v49 }
 0x6fb   :  { %v2149_v52 = vadd.f32 1.0, %v3566_v50 }
 0x6fc   :  { %3571 = vrcp.f32 %v2070_v51 }
 0x6fd   :  { %3573 = vrcp.f32 %v2149_v52 }
 0x701   :  { %v3568_v53 = vpop.eup %3567 }
 0x702   :  { %v3570_v54 = vpop.eup %3569  ;;  %v2302_v58 = vadd.f32 1.0, %v3568_v53 }
 0x704   :  { %3575 = vrcp.f32 %v2302_v58 }
 0x706   :  { %v3572_v55 = vpop.eup %3571 }
 0x707   :  { %v3574_v56 = vpop.eup %3573  ;;  %v2306_v57 = vmul.f32 %v3572_v55, %v3570_v54 }
 0x708   :  { %v2305_v59 = vmul.f32 %v3574_v56, %v3995_v27 }
 0x70a   :  { %v2307_v60 = vadd.f32 %v2306_v57, %v2305_v59 }
 0x70c   :  { %3577 = vtanh.f32 %v2307_v60 }
 0x70e   :  { %v3576_v61 = vpop.eup %3575 }
 0x716   :  { %v3578_v62 = vpop.eup %3577 }
 0x717   :  { %v2309_v1 = vmul.f32 %v3578_v62, %v3576_v61 }
 0x719   :  { %v2312_v2 = vadd.f32 %v2745_v63, %v2309_v1  ;;  %3237 = vmatmul.mubr.msk.f32.vlgmr.msra.gmra.mrb[28].mxu0 %vm43_vm2, %v2309_v1  ;;  %3248 = vmatmul.mubr.msk.f32.vlgmr.msra.gmra.mrb[28].mxu1 %vm43_vm2, %v2309_v1 }
 0x71a   :  { %3454 = vmatpush3.bf16.msra.mxu0 %v3677_v19  ;;  %3460 = vmatpush3.bf16.msra.mxu1 %v3681_v20 }
 0x71b   :  { %v2313_v3 = vmax.f32 %v2312_v2, 0.0  ;;  %3455 = vmatprep.subr.bf16.mxu0 %v3595_v0  ;;  %3461 = vmatprep.subr.bf16.mxu1 %v3595_v0  ;;  %v2747_v0 = vld [vmem:[%s4089_s0 + $0xe] sm:$0x3] }
 0x71c   :  { %3258 = vmatprep.mubr.msk.f32.mxu0 %vm3597_vm1, %v3596_v4  ;;  %3269 = vmatprep.mubr.msk.f32.mxu1 %vm3597_vm1, %v3596_v4  ;;  %v2750_v4 = vld [vmem:[%s4089_s0 + $0x1e] sm:$0x3] }
 0x71d   :  { %2746 = vst.msk [vmem:[%s4091_s3 + $0xc] sm:$0x3] %vm18_vm0, %v2313_v3 }
 0x71e   :  { %3457 = vmatpush3.bf16.msra.mxu0 %v3699_v25  ;;  %3463 = vmatpush3.bf16.msra.mxu1 %v3703_v26 }
 0x721   :  { %3259 = vmatmul.mubr.msk.f32.vlgmr.msra.gmra.mrb[30].mxu0 %vm43_vm2, %v2309_v1  ;;  %3270 = vmatmul.mubr.msk.f32.vlgmr.msra.gmra.mrb[30].mxu1 %vm43_vm2, %v2309_v1 }
 0x7ec   :  { %v2387_v19 = vpop.f32.mrb[28].mxu0  ;;  %v2466_v20 = vpop.f32.mrb[28].mxu1 }
 0x7ed   :  { %v2391_v6 = vadd.f32 %v2747_v0, %v2387_v19  ;;  %v2470_v7 = vadd.f32 %v2750_v4, %v2466_v20  ;;  %v3238_v8 = vpop.f32.mrb[29].mxu0  ;;  %v3249_v25 = vpop.f32.mrb[29].mxu1 }
 0x7ef   :  { %v2749_v10 = vmul.f32 -1.442695, %v2391_v6  ;;  %v2752_v26 = vmul.f32 -1.442695, %v2470_v7 }
 0x7f1   :  { %3579 = vpow2.f32 %v2749_v10 }
 0x7f2   :  { %3581 = vpow2.f32 %v2752_v26 }
 0x7f4   :  { %v2545_v14 = vpop.f32.mrb[30].mxu0  ;;  %v2619_v15 = vpop.f32.mrb[30].mxu1 }
 0x7f5   :  { %v2623_v16 = vadd.f32 %v2755_v11, %v2619_v15  ;;  %v3260_v17 = vpop.f32.mrb[31].mxu0  ;;  %v3271_v18 = vpop.f32.mrb[31].mxu1  ;;  %v2549_v23 = vadd.f32 %v2753_v21, %v2545_v14 }
 0x7f7   :  { %v2757_v22 = vmul.f32 -1.442695, %v2623_v16 }
 0x7f9   :  { %3583 = vpow2.f32 %v2757_v22 }
 0x7fa   :  { %3585 = vtanh.f32 %v2549_v23 }
 0x7fb   :  { %v3580_v24 = vpop.eup %3579 }
 0x7fc   :  { %v3582_v27 = vpop.eup %3581  ;;  %v2395_v28 = vadd.f32 1.0, %v3580_v24 }
 0x7fd   :  { %v2474_v29 = vadd.f32 1.0, %v3582_v27 }
 0x7fe   :  { %3587 = vrcp.f32 %v2395_v28 }
 0x7ff   :  { %3589 = vrcp.f32 %v2474_v29 }
 0x803   :  { %v3584_v30 = vpop.eup %3583 }
 0x804   :  { %v3586_v31 = vpop.eup %3585  ;;  %v2627_v9 = vadd.f32 1.0, %v3584_v30 }
 0x806   :  { %3591 = vrcp.f32 %v2627_v9 }
 0x808   :  { %v3588_v32 = vpop.eup %3587 }
 0x809   :  { %v3590_v33 = vpop.eup %3589  ;;  %v2631_v5 = vmul.f32 %v3588_v32, %v3586_v31 }
 0x80a   :  { %v2630_v34 = vmul.f32 %v3590_v33, %v2307_v60 }
 0x80c   :  { %v2632_v35 = vadd.f32 %v2631_v5, %v2630_v34 }
 0x80e   :  { %3593 = vtanh.f32 %v2632_v35  ;;  %2642 = vst.msk [vmem:[#allocation3] sm:$0x3] %vm18_vm0, %v2632_v35 }
 0x810   :  { %v3592_v36 = vpop.eup %3591 }
 0x818   :  { %v3594_v37 = vpop.eup %3593 }
 0x819   :  { %v2634_v12 = vmul.f32 %v3594_v37, %v3592_v36 }
 0x81b   :  { %v2637_v39 = vadd.f32 %v2758_v38, %v2634_v12  ;;  %2641 = vst.msk [vmem:[#allocation2] sm:$0x3] %vm18_vm0, %v2634_v12 }
 0x81d   :  { %v2638_v13 = vmax.f32 %v2637_v39, 0.0 }
 0x81f   :  { %2759 = vst.msk [vmem:[%s4091_s3 + $0xe] sm:$0x3] %vm18_vm0, %v2638_v13 }

</bundles_post_ra>
